<compile_context>
chip_gen: v7x
topology: tpu7x:2x2x1
jax: 0.10.0
libtpu: 0.0.40
codegen_flags: <defaults>
</compile_context>

<pallas_src>
import math
import functools

import jax
import jax.numpy as jnp
from jax.experimental import pallas as pl
from jax.experimental.pallas import tpu as pltpu


# ----------------------------- helpers --------------------------------------

def _layer_norm(x, g, b, eps=1e-5):
    # PyTorch nn.LayerNorm semantics: biased variance over last dim, eps=1e-5.
    mu = jnp.mean(x, axis=-1, keepdims=True)
    var = jnp.mean(jnp.square(x - mu), axis=-1, keepdims=True)
    return (x - mu) * jax.lax.rsqrt(var + eps) * g + b


def _sinusoid_pos_enc(positions, d_model):
    """Sinusoidal encoding indexed by observation day ('obs_aq_date')."""
    pos = positions.astype(jnp.float32)[..., None]                     # (B,T,1)
    j = jnp.arange(d_model)
    denom = jnp.power(10000.0, (2.0 * (j // 2)).astype(jnp.float32) / d_model)
    ang = pos / denom                                                  # (B,T,D)
    pe = jnp.where(j % 2 == 0, jnp.sin(ang), jnp.cos(ang))
    pe = jnp.where(positions[..., None] == -1, 0.0, pe)
    return pe.astype(jnp.float32)


# ----------------------------- fused kernel ----------------------------------

def fused_forward_kernel(
        # per-batch-element inputs (blocked over grid axis b)
        x_ref, npmask_ref, kbias_ref, pe_ref,
        # stem params (VMEM-resident, constant index_map)
        g_in_ref, b_in_ref, wconv_ref, bconv_ref, gc_ref, bc_ref,
        # stacked encoder-layer params, leading dim = layer
        wqkv_ref, bqkv_ref, wo_ref, bo_ref, g1_ref, b1_ref,
        w1_ref, c1_ref, w2_ref, c2_ref, g2_ref, b2_ref,
        # head params
        wout_ref, cmask_ref,
        # outputs
        logp_ref, attn_ref,
        # scratch: concatenated head outputs (T, D)
        hcat_ref):
    T = x_ref.shape[1]
    D = pe_ref.shape[2]
    L = wqkv_ref.shape[0]
    H = attn_ref.shape[2]
    dk = D // H
    scale = 1.0 / math.sqrt(dk)
    bf16 = jnp.bfloat16
    f32 = jnp.float32

    x = x_ref[0]            # (T, Cin)
    npm = npmask_ref[0]     # (T, 1)
    kbias = kbias_ref[0]    # (1, T)  0 / -1e9 on padded keys
    pe = pe_ref[0]          # (T, D)

    # ---- stem: raw_input_norm -> 1x1 conv (matmul) -> convlayernorm -> *mask -> +PE
    h = _layer_norm(x, g_in_ref[...], b_in_ref[...])
    h = jnp.dot(h.astype(bf16), wconv_ref[...], preferred_element_type=f32) + bconv_ref[...]
    h = _layer_norm(h, gc_ref[...], bc_ref[...])
    h = h * npm + pe        # (T, D) f32 encoder input

    # ---- encoder layers (fully fused; static unroll over the small layer count) ----
    for l in range(L):
        # fused QKV projection: one full-width (T,D)@(D,3D) MXU matmul
        qkv = jnp.dot(h.astype(bf16), wqkv_ref[l], preferred_element_type=f32) + bqkv_ref[l]
        for hh in range(H):
            lo = hh * dk
            qh = qkv[:, lo:lo + dk].astype(bf16)
            kh = qkv[:, D + lo:D + lo + dk].astype(bf16)
            vh = qkv[:, 2 * D + lo:2 * D + lo + dk].astype(bf16)
            s = jnp.einsum('qd,kd->qk', qh, kh, preferred_element_type=f32) * scale
            s = s + kbias                                  # key-padding mask
            s = s - jnp.max(s, axis=-1, keepdims=True)
            e = jnp.exp(s)
            p = e * pl.reciprocal(jnp.sum(e, axis=-1, keepdims=True), approx=True)
            attn_ref[l, 0, hh] = p                         # direct (L,B,H,T,T) layout
            hcat_ref[:, lo:lo + dk] = jnp.dot(p.astype(bf16), vh,
                                              preferred_element_type=f32)
        # single full-width output projection of the concatenated heads
        o = jnp.dot(hcat_ref[...].astype(bf16), wo_ref[l],
                    preferred_element_type=f32) + bo_ref[l]
        a = _layer_norm(o + h, g1_ref[l], b1_ref[l]) * npm
        f = jnp.maximum(
            jnp.dot(a.astype(bf16), w1_ref[l], preferred_element_type=f32) + c1_ref[l],
            0.0)
        f = jnp.dot(f.astype(bf16), w2_ref[l], preferred_element_type=f32) + c2_ref[l]
        h = _layer_norm(f + a, g2_ref[l], b2_ref[l]) * npm

    # ---- head: max-pool over time -> Linear (lane-padded classes) -> LogSoftmax ----
    feat = jnp.max(h, axis=0, keepdims=True)               # (1, D)
    logits = jnp.dot(feat.astype(bf16), wout_ref[...],
                     preferred_element_type=f32) + cmask_ref[...]   # pad classes -> -1e30
    m = jnp.max(logits, axis=-1, keepdims=True)
    lse = jnp.log(jnp.sum(jnp.exp(logits - m), axis=-1, keepdims=True)) + m
    logp_ref[0] = logits - lse                              # (1, NCP) lane-dense store


# ----------------------------- wrapper ---------------------------------------

def init_params(key, c_in, d_model, n_layers, d_inner, n_classes):
    ks = jax.random.split(key, 7)

    def nrm(k, shape, scale=0.02):
        return scale * jax.random.normal(k, shape, jnp.float32)

    D, Di, L = d_model, d_inner, n_layers
    return {
        'g_in': jnp.ones((1, c_in), jnp.float32),
        'b_in': jnp.zeros((1, c_in), jnp.float32),
        'w_conv': nrm(ks[0], (c_in, D)),           # Conv1d(k=1) weight^T
        'b_conv': nrm(ks[1], (1, D)),              # Conv1d bias
        'g_conv': jnp.ones((1, D), jnp.float32),
        'b_convln': jnp.zeros((1, D), jnp.float32),
        'wqkv': nrm(ks[2], (L, D, 3 * D)),         # fused Q|K|V projection
        'bqkv': jnp.zeros((L, 1, 3 * D), jnp.float32),
        'wo': nrm(ks[3], (L, D, D)),
        'bo': jnp.zeros((L, 1, D), jnp.float32),
        'g1': jnp.ones((L, 1, D), jnp.float32),
        'b1': jnp.zeros((L, 1, D), jnp.float32),
        'w1': nrm(ks[4], (L, D, Di)),
        'c1': jnp.zeros((L, 1, Di), jnp.float32),
        'w2': nrm(ks[5], (L, Di, D)),
        'c2': jnp.zeros((L, 1, D), jnp.float32),
        'g2': jnp.ones((L, 1, D), jnp.float32),
        'b2': jnp.zeros((L, 1, D), jnp.float32),
        'w_out': nrm(ks[6], (D, n_classes)),       # outlinear weight^T, no bias
    }


def crop_type_classifier_forward(params, x, positions, num_heads):
    B, T, _ = x.shape
    D = params['w_conv'].shape[1]
    L = params['wqkv'].shape[0]
    NC = params['w_out'].shape[1]
    NCP = 128 * pl.cdiv(NC, 128)                    # lane-dense padded class width

    # glue (plain JAX): non-padding mask, key-padding bias, day-indexed PE
    npmask = (positions != -1).astype(jnp.float32)[:, :, None]                     # (B,T,1)
    kbias = jnp.where(positions == -1, -1e9, 0.0).astype(jnp.float32)[:, None, :]  # (B,1,T)
    pe = _sinusoid_pos_enc(positions, D)                                           # (B,T,D)

    # lane-pad classifier weight; padded logits are masked to -1e30 inside the kernel
    w_out_p = jnp.pad(params['w_out'], ((0, 0), (0, NCP - NC))).astype(jnp.bfloat16)
    cmask = jnp.where(jnp.arange(NCP) < NC, 0.0, -1e30).astype(jnp.float32)[None, :]

    bf = lambda a: a.astype(jnp.bfloat16)           # bf16 matmul operands, f32 accum
    ins = [x, npmask, kbias, pe,
           params['g_in'], params['b_in'], bf(params['w_conv']), params['b_conv'],
           params['g_conv'], params['b_convln'],
           bf(params['wqkv']), params['bqkv'], bf(params['wo']), params['bo'],
           params['g1'], params['b1'],
           bf(params['w1']), params['c1'], bf(params['w2']), params['c2'],
           params['g2'], params['b2'],
           w_out_p, cmask]

    def _bspec(shape):                              # blocked over the batch grid axis
        n = len(shape)
        return pl.BlockSpec((1,) + tuple(shape[1:]),
                            lambda b, _n=n: (b,) + (0,) * (_n - 1))

    def _wspec(shape):                              # constant index_map -> VMEM-resident
        n = len(shape)
        return pl.BlockSpec(tuple(shape), lambda b, _n=n: (0,) * _n)

    in_specs = [_bspec(a.shape) for a in ins[:4]] + [_wspec(a.shape) for a in ins[4:]]

    out_shape = (jax.ShapeDtypeStruct((B, 1, NCP), jnp.float32),
                 jax.ShapeDtypeStruct((L, B, num_heads, T, T), jnp.float32))
    out_specs = (pl.BlockSpec((1, 1, NCP), lambda b: (b, 0, 0)),
                 pl.BlockSpec((L, 1, num_heads, T, T), lambda b: (0, b, 0, 0, 0)))

    logp_p, attn = pl.pallas_call(
        fused_forward_kernel,
        grid=(B,),
        in_specs=in_specs,
        out_shape=out_shape,
        out_specs=out_specs,
        scratch_shapes=[pltpu.VMEM((T, D), jnp.float32)],
        compiler_params=pltpu.CompilerParams(
            dimension_semantics=("parallel",),      # megacore sharding on v7x
            vmem_limit_bytes=32 * 1024 * 1024),
    )(*ins)

    log_probs = logp_p[:, 0, :NC]                   # drop lane padding
    attn_weights = [attn[l] for l in range(L)]      # list of per-layer (B,H,T,T)
    return log_probs, attn_weights


# ----------------------------- main ------------------------------------------

if __name__ == "__main__":
    B, T, C_IN = 2, 8, 4
    D_MODEL, N_HEADS, D_INNER, N_LAYERS, N_CLASSES = 128, 4, 256, 2, 23

    key = jax.random.PRNGKey(0)
    kx, kp = jax.random.split(key)
    x = jax.random.normal(kx, (B, T, C_IN), jnp.float32)
    # days since the earliest observation; -1 marks padded timesteps
    positions = jnp.array([[0, 5, 10, 16, 21, 30, 37, 45],
                           [0, 7, 14, 21, -1, -1, -1, -1]], jnp.int32)

    params = init_params(kp, C_IN, D_MODEL, N_LAYERS, D_INNER, N_CLASSES)

    fwd = jax.jit(functools.partial(crop_type_classifier_forward, num_heads=N_HEADS))
    log_probs, attn_weights = fwd(params, x, positions)
    jax.block_until_ready(log_probs)
    jax.block_until_ready(attn_weights)

    assert log_probs.shape == (B, N_CLASSES)
    assert len(attn_weights) == N_LAYERS and attn_weights[0].shape == (B, N_HEADS, T, T)
    assert bool(jnp.all(jnp.isfinite(log_probs)))
    assert bool(jnp.allclose(jnp.sum(jnp.exp(log_probs), axis=-1), 1.0, atol=1e-4))
    print("KERNEL_OK")
</pallas_src>

<mosaic_0001>
module attributes {stable_mosaic.version = 11 : i64} {
  func.func @fused_forward_kernel(%arg0: i32, %arg1: memref<1x8x4xf32, #tpu.memory_space<vmem>>, %arg2: memref<1x8x1xf32, #tpu.memory_space<vmem>>, %arg3: memref<1x1x8xf32, #tpu.memory_space<vmem>>, %arg4: memref<1x8x128xf32, #tpu.memory_space<vmem>>, %arg5: memref<1x4xf32, #tpu.memory_space<vmem>>, %arg6: memref<1x4xf32, #tpu.memory_space<vmem>>, %arg7: memref<4x128xbf16, #tpu.memory_space<vmem>>, %arg8: memref<1x128xf32, #tpu.memory_space<vmem>>, %arg9: memref<1x128xf32, #tpu.memory_space<vmem>>, %arg10: memref<1x128xf32, #tpu.memory_space<vmem>>, %arg11: memref<2x128x384xbf16, #tpu.memory_space<vmem>>, %arg12: memref<2x1x384xf32, #tpu.memory_space<vmem>>, %arg13: memref<2x128x128xbf16, #tpu.memory_space<vmem>>, %arg14: memref<2x1x128xf32, #tpu.memory_space<vmem>>, %arg15: memref<2x1x128xf32, #tpu.memory_space<vmem>>, %arg16: memref<2x1x128xf32, #tpu.memory_space<vmem>>, %arg17: memref<2x128x256xbf16, #tpu.memory_space<vmem>>, %arg18: memref<2x1x256xf32, #tpu.memory_space<vmem>>, %arg19: memref<2x256x128xbf16, #tpu.memory_space<vmem>>, %arg20: memref<2x1x128xf32, #tpu.memory_space<vmem>>, %arg21: memref<2x1x128xf32, #tpu.memory_space<vmem>>, %arg22: memref<2x1x128xf32, #tpu.memory_space<vmem>>, %arg23: memref<128x128xbf16, #tpu.memory_space<vmem>>, %arg24: memref<1x128xf32, #tpu.memory_space<vmem>>, %arg25: memref<1x1x128xf32, #tpu.memory_space<vmem>>, %arg26: memref<2x1x4x8x8xf32, #tpu.memory_space<vmem>>, %arg27: memref<8x128xf32, #tpu.memory_space<vmem>>) attributes {dimension_semantics = [#tpu.dimension_semantics<parallel>], iteration_bounds = array<i64: 2>, scalar_prefetch = 0 : i64, scratch_operands = 1 : i64, tpu.core_type = #tpu.core_type<tc>, window_params = [{transform_indices = @transform_0, window_bounds = array<i64: 1, 8, 4>}, {transform_indices = @transform_1, window_bounds = array<i64: 1, 8, 1>}, {transform_indices = @transform_2, window_bounds = array<i64: 1, 1, 8>}, {transform_indices = @transform_3, window_bounds = array<i64: 1, 8, 128>}, {pipeline_mode = #tpu.pipeline_mode<synchronous>, transform_indices = @transform_4, window_bounds = array<i64: 1, 4>}, {pipeline_mode = #tpu.pipeline_mode<synchronous>, transform_indices = @transform_5, window_bounds = array<i64: 1, 4>}, {pipeline_mode = #tpu.pipeline_mode<synchronous>, transform_indices = @transform_6, window_bounds = array<i64: 4, 128>}, {pipeline_mode = #tpu.pipeline_mode<synchronous>, transform_indices = @transform_7, window_bounds = array<i64: 1, 128>}, {pipeline_mode = #tpu.pipeline_mode<synchronous>, transform_indices = @transform_8, window_bounds = array<i64: 1, 128>}, {pipeline_mode = #tpu.pipeline_mode<synchronous>, transform_indices = @transform_9, window_bounds = array<i64: 1, 128>}, {pipeline_mode = #tpu.pipeline_mode<synchronous>, transform_indices = @transform_10, window_bounds = array<i64: 2, 128, 384>}, {pipeline_mode = #tpu.pipeline_mode<synchronous>, transform_indices = @transform_11, window_bounds = array<i64: 2, 1, 384>}, {pipeline_mode = #tpu.pipeline_mode<synchronous>, transform_indices = @transform_12, window_bounds = array<i64: 2, 128, 128>}, {pipeline_mode = #tpu.pipeline_mode<synchronous>, transform_indices = @transform_13, window_bounds = array<i64: 2, 1, 128>}, {pipeline_mode = #tpu.pipeline_mode<synchronous>, transform_indices = @transform_14, window_bounds = array<i64: 2, 1, 128>}, {pipeline_mode = #tpu.pipeline_mode<synchronous>, transform_indices = @transform_15, window_bounds = array<i64: 2, 1, 128>}, {pipeline_mode = #tpu.pipeline_mode<synchronous>, transform_indices = @transform_16, window_bounds = array<i64: 2, 128, 256>}, {pipeline_mode = #tpu.pipeline_mode<synchronous>, transform_indices = @transform_17, window_bounds = array<i64: 2, 1, 256>}, {pipeline_mode = #tpu.pipeline_mode<synchronous>, transform_indices = @transform_18, window_bounds = array<i64: 2, 256, 128>}, {pipeline_mode = #tpu.pipeline_mode<synchronous>, transform_indices = @transform_19, window_bounds = array<i64: 2, 1, 128>}, {pipeline_mode = #tpu.pipeline_mode<synchronous>, transform_indices = @transform_20, window_bounds = array<i64: 2, 1, 128>}, {pipeline_mode = #tpu.pipeline_mode<synchronous>, transform_indices = @transform_21, window_bounds = array<i64: 2, 1, 128>}, {pipeline_mode = #tpu.pipeline_mode<synchronous>, transform_indices = @transform_22, window_bounds = array<i64: 128, 128>}, {pipeline_mode = #tpu.pipeline_mode<synchronous>, transform_indices = @transform_23, window_bounds = array<i64: 1, 128>}, {transform_indices = @transform_24, window_bounds = array<i64: 1, 1, 128>}, {transform_indices = @transform_25, window_bounds = array<i64: 2, 1, 4, 8, 8>}]} {
    %c0 = arith.constant 0 : index
    %c0_0 = arith.constant 0 : index
    %c0_1 = arith.constant 0 : index
    %0 = vector.load %arg1[%c0, %c0_0, %c0_1] : memref<1x8x4xf32, #tpu.memory_space<vmem>>, vector<1x8x4xf32>
    %1 = vector.shape_cast %0 : vector<1x8x4xf32> to vector<8x4xf32>
    %c0_2 = arith.constant 0 : index
    %c0_3 = arith.constant 0 : index
    %c0_4 = arith.constant 0 : index
    %2 = vector.load %arg2[%c0_2, %c0_3, %c0_4] : memref<1x8x1xf32, #tpu.memory_space<vmem>>, vector<1x8x1xf32>
    %3 = vector.shape_cast %2 : vector<1x8x1xf32> to vector<8x1xf32>
    %c0_5 = arith.constant 0 : index
    %c0_6 = arith.constant 0 : index
    %c0_7 = arith.constant 0 : index
    %4 = vector.load %arg3[%c0_5, %c0_6, %c0_7] : memref<1x1x8xf32, #tpu.memory_space<vmem>>, vector<1x1x8xf32>
    %5 = vector.shape_cast %4 : vector<1x1x8xf32> to vector<1x8xf32>
    %c0_8 = arith.constant 0 : index
    %c0_9 = arith.constant 0 : index
    %c0_10 = arith.constant 0 : index
    %6 = vector.load %arg4[%c0_8, %c0_9, %c0_10] : memref<1x8x128xf32, #tpu.memory_space<vmem>>, vector<1x8x128xf32>
    %7 = vector.shape_cast %6 : vector<1x8x128xf32> to vector<8x128xf32>
    %c0_11 = arith.constant 0 : index
    %c0_12 = arith.constant 0 : index
    %8 = vector.load %arg5[%c0_11, %c0_12] : memref<1x4xf32, #tpu.memory_space<vmem>>, vector<1x4xf32>
    %c0_13 = arith.constant 0 : index
    %c0_14 = arith.constant 0 : index
    %9 = vector.load %arg6[%c0_13, %c0_14] : memref<1x4xf32, #tpu.memory_space<vmem>>, vector<1x4xf32>
    %cst = arith.constant dense<0.000000e+00> : vector<8xf32>
    %10 = vector.multi_reduction <add>, %1, %cst [1] : vector<8x4xf32> to vector<8xf32>
    %11 = vector.shape_cast %10 : vector<8xf32> to vector<8x1xf32>
    %cst_15 = arith.constant 4.000000e+00 : f32
    %12 = vector.broadcast %cst_15 : f32 to vector<8x1xf32>
    %13 = arith.divf %11, %12 : vector<8x1xf32>
    %14 = vector.broadcast %13 : vector<8x1xf32> to vector<8x4xf32>
    %15 = arith.subf %1, %14 : vector<8x4xf32>
    %16 = arith.mulf %15, %15 : vector<8x4xf32>
    %cst_16 = arith.constant dense<0.000000e+00> : vector<8xf32>
    %17 = vector.multi_reduction <add>, %16, %cst_16 [1] : vector<8x4xf32> to vector<8xf32>
    %18 = vector.shape_cast %17 : vector<8xf32> to vector<8x1xf32>
    %cst_17 = arith.constant 4.000000e+00 : f32
    %19 = vector.broadcast %cst_17 : f32 to vector<8x1xf32>
    %20 = arith.divf %18, %19 : vector<8x1xf32>
    %21 = vector.broadcast %13 : vector<8x1xf32> to vector<8x4xf32>
    %22 = arith.subf %1, %21 : vector<8x4xf32>
    %cst_18 = arith.constant 9.99999974E-6 : f32
    %23 = vector.broadcast %cst_18 : f32 to vector<8x1xf32>
    %24 = arith.addf %20, %23 : vector<8x1xf32>
    %25 = math.rsqrt %24 : vector<8x1xf32>
    %26 = vector.broadcast %25 : vector<8x1xf32> to vector<8x4xf32>
    %27 = arith.mulf %22, %26 : vector<8x4xf32>
    %28 = vector.broadcast %8 : vector<1x4xf32> to vector<8x4xf32>
    %29 = arith.mulf %27, %28 : vector<8x4xf32>
    %30 = vector.broadcast %9 : vector<1x4xf32> to vector<8x4xf32>
    %31 = arith.addf %29, %30 : vector<8x4xf32>
    %32 = arith.truncf %31 : vector<8x4xf32> to vector<8x4xbf16>
    %c0_19 = arith.constant 0 : index
    %c0_20 = arith.constant 0 : index
    %33 = vector.load %arg7[%c0_19, %c0_20] : memref<4x128xbf16, #tpu.memory_space<vmem>>, vector<4x128xbf16>
    %cst_21 = arith.constant dense<0.000000e+00> : vector<8x128xf32>
    %34 = tpu.matmul %32, %33, %cst_21 {dimension_numbers = #tpu.dot_dimension_numbers<[1], [0], [0], [1], [0, 0, 1, 1], [], []>} : vector<8x4xbf16>, vector<4x128xbf16>, vector<8x128xf32> -> vector<8x128xf32>
    %c0_22 = arith.constant 0 : index
    %c0_23 = arith.constant 0 : index
    %35 = vector.load %arg8[%c0_22, %c0_23] : memref<1x128xf32, #tpu.memory_space<vmem>>, vector<1x128xf32>
    %36 = vector.broadcast %35 : vector<1x128xf32> to vector<8x128xf32>
    %37 = arith.addf %34, %36 : vector<8x128xf32>
    %c0_24 = arith.constant 0 : index
    %c0_25 = arith.constant 0 : index
    %38 = vector.load %arg9[%c0_24, %c0_25] : memref<1x128xf32, #tpu.memory_space<vmem>>, vector<1x128xf32>
    %c0_26 = arith.constant 0 : index
    %c0_27 = arith.constant 0 : index
    %39 = vector.load %arg10[%c0_26, %c0_27] : memref<1x128xf32, #tpu.memory_space<vmem>>, vector<1x128xf32>
    %cst_28 = arith.constant dense<0.000000e+00> : vector<8xf32>
    %40 = vector.multi_reduction <add>, %37, %cst_28 [1] : vector<8x128xf32> to vector<8xf32>
    %41 = vector.shape_cast %40 : vector<8xf32> to vector<8x1xf32>
    %cst_29 = arith.constant 1.280000e+02 : f32
    %42 = vector.broadcast %cst_29 : f32 to vector<8x1xf32>
    %43 = arith.divf %41, %42 : vector<8x1xf32>
    %44 = vector.broadcast %43 : vector<8x1xf32> to vector<8x128xf32>
    %45 = arith.subf %37, %44 : vector<8x128xf32>
    %46 = arith.mulf %45, %45 : vector<8x128xf32>
    %cst_30 = arith.constant dense<0.000000e+00> : vector<8xf32>
    %47 = vector.multi_reduction <add>, %46, %cst_30 [1] : vector<8x128xf32> to vector<8xf32>
    %48 = vector.shape_cast %47 : vector<8xf32> to vector<8x1xf32>
    %cst_31 = arith.constant 1.280000e+02 : f32
    %49 = vector.broadcast %cst_31 : f32 to vector<8x1xf32>
    %50 = arith.divf %48, %49 : vector<8x1xf32>
    %51 = vector.broadcast %43 : vector<8x1xf32> to vector<8x128xf32>
    %52 = arith.subf %37, %51 : vector<8x128xf32>
    %cst_32 = arith.constant 9.99999974E-6 : f32
    %53 = vector.broadcast %cst_32 : f32 to vector<8x1xf32>
    %54 = arith.addf %50, %53 : vector<8x1xf32>
    %55 = math.rsqrt %54 : vector<8x1xf32>
    %56 = vector.broadcast %55 : vector<8x1xf32> to vector<8x128xf32>
    %57 = arith.mulf %52, %56 : vector<8x128xf32>
    %58 = vector.broadcast %38 : vector<1x128xf32> to vector<8x128xf32>
    %59 = arith.mulf %57, %58 : vector<8x128xf32>
    %60 = vector.broadcast %39 : vector<1x128xf32> to vector<8x128xf32>
    %61 = arith.addf %59, %60 : vector<8x128xf32>
    %62 = vector.broadcast %3 : vector<8x1xf32> to vector<8x128xf32>
    %63 = arith.mulf %61, %62 : vector<8x128xf32>
    %64 = arith.addf %63, %7 : vector<8x128xf32>
    %65 = arith.truncf %64 : vector<8x128xf32> to vector<8x128xbf16>
    %c0_33 = arith.constant 0 : index
    %c0_34 = arith.constant 0 : index
    %c0_35 = arith.constant 0 : index
    %66 = vector.load %arg11[%c0_33, %c0_34, %c0_35] : memref<2x128x384xbf16, #tpu.memory_space<vmem>>, vector<1x128x384xbf16>
    %67 = vector.shape_cast %66 : vector<1x128x384xbf16> to vector<128x384xbf16>
    %cst_36 = arith.constant dense<0.000000e+00> : vector<8x384xf32>
    %68 = tpu.matmul %65, %67, %cst_36 {dimension_numbers = #tpu.dot_dimension_numbers<[1], [0], [0], [1], [0, 0, 1, 1], [], []>} : vector<8x128xbf16>, vector<128x384xbf16>, vector<8x384xf32> -> vector<8x384xf32>
    %c0_37 = arith.constant 0 : index
    %c0_38 = arith.constant 0 : index
    %c0_39 = arith.constant 0 : index
    %69 = vector.load %arg12[%c0_37, %c0_38, %c0_39] : memref<2x1x384xf32, #tpu.memory_space<vmem>>, vector<1x1x384xf32>
    %70 = vector.shape_cast %69 : vector<1x1x384xf32> to vector<1x384xf32>
    %71 = vector.broadcast %70 : vector<1x384xf32> to vector<8x384xf32>
    %72 = arith.addf %68, %71 : vector<8x384xf32>
    %73 = vector.extract_strided_slice %72 {offsets = [0, 0], sizes = [8, 32], strides = [1, 1]} : vector<8x384xf32> to vector<8x32xf32>
    %74 = arith.truncf %73 : vector<8x32xf32> to vector<8x32xbf16>
    %75 = vector.extract_strided_slice %72 {offsets = [0, 128], sizes = [8, 32], strides = [1, 1]} : vector<8x384xf32> to vector<8x32xf32>
    %76 = arith.truncf %75 : vector<8x32xf32> to vector<8x32xbf16>
    %77 = vector.extract_strided_slice %72 {offsets = [0, 256], sizes = [8, 32], strides = [1, 1]} : vector<8x384xf32> to vector<8x32xf32>
    %78 = arith.truncf %77 : vector<8x32xf32> to vector<8x32xbf16>
    "tpu.trace_start"() <{level = 10 : i32, message = "qd,kd->qk"}> : () -> ()
    %cst_40 = arith.constant dense<0.000000e+00> : vector<8x8xf32>
    %79 = tpu.matmul %74, %76, %cst_40 {dimension_numbers = #tpu.dot_dimension_numbers<[1], [1], [0], [0], [0, 0, 1, 0], [], []>} : vector<8x32xbf16>, vector<8x32xbf16>, vector<8x8xf32> -> vector<8x8xf32>
    "tpu.trace_stop"() : () -> ()
    %cst_41 = arith.constant 0.176776692 : f32
    %80 = vector.broadcast %cst_41 : f32 to vector<8x8xf32>
    %81 = arith.mulf %79, %80 : vector<8x8xf32>
    %82 = vector.broadcast %5 : vector<1x8xf32> to vector<8x8xf32>
    %83 = arith.addf %81, %82 : vector<8x8xf32>
    %cst_42 = arith.constant dense<0xFF800000> : vector<8xf32>
    %84 = vector.multi_reduction <maximumf>, %83, %cst_42 [1] : vector<8x8xf32> to vector<8xf32>
    %85 = vector.shape_cast %84 : vector<8xf32> to vector<8x1xf32>
    %86 = vector.broadcast %85 : vector<8x1xf32> to vector<8x8xf32>
    %87 = arith.subf %83, %86 : vector<8x8xf32>
    %88 = math.exp %87 : vector<8x8xf32>
    %cst_43 = arith.constant dense<0.000000e+00> : vector<8xf32>
    %89 = vector.multi_reduction <add>, %88, %cst_43 [1] : vector<8x8xf32> to vector<8xf32>
    %90 = vector.shape_cast %89 : vector<8xf32> to vector<8x1xf32>
    %91 = tpu.reciprocal %90 {approx = true} : vector<8x1xf32> -> vector<8x1xf32>
    %92 = vector.broadcast %91 : vector<8x1xf32> to vector<8x8xf32>
    %93 = arith.mulf %88, %92 : vector<8x8xf32>
    %c0_44 = arith.constant 0 : index
    %c0_45 = arith.constant 0 : index
    %c0_46 = arith.constant 0 : index
    %c0_47 = arith.constant 0 : index
    %c0_48 = arith.constant 0 : index
    %94 = vector.load %arg26[%c0_44, %c0_45, %c0_46, %c0_47, %c0_48] : memref<2x1x4x8x8xf32, #tpu.memory_space<vmem>>, vector<1x1x1x8x8xf32>
    %95 = vector.shape_cast %94 : vector<1x1x1x8x8xf32> to vector<8x8xf32>
    %96 = vector.shape_cast %93 : vector<8x8xf32> to vector<1x1x1x8x8xf32>
    tpu.vector_store %arg26[%c0_44, %c0_45, %c0_46, %c0_47, %c0_48], %96 {strides = array<i32>} : memref<2x1x4x8x8xf32, #tpu.memory_space<vmem>>, vector<1x1x1x8x8xf32>,
    %97 = arith.truncf %93 : vector<8x8xf32> to vector<8x8xbf16>
    %cst_49 = arith.constant dense<0.000000e+00> : vector<8x32xf32>
    %98 = tpu.matmul %97, %78, %cst_49 {dimension_numbers = #tpu.dot_dimension_numbers<[1], [0], [0], [1], [0, 0, 1, 1], [], []>} : vector<8x8xbf16>, vector<8x32xbf16>, vector<8x32xf32> -> vector<8x32xf32>
    %c0_50 = arith.constant 0 : index
    %c0_51 = arith.constant 0 : index
    %99 = vector.load %arg27[%c0_50, %c0_51] : memref<8x128xf32, #tpu.memory_space<vmem>>, vector<8x32xf32>
    tpu.vector_store %arg27[%c0_50, %c0_51], %98 {strides = array<i32>} : memref<8x128xf32, #tpu.memory_space<vmem>>, vector<8x32xf32>,
    %100 = vector.extract_strided_slice %72 {offsets = [0, 32], sizes = [8, 32], strides = [1, 1]} : vector<8x384xf32> to vector<8x32xf32>
    %101 = arith.truncf %100 : vector<8x32xf32> to vector<8x32xbf16>
    %102 = vector.extract_strided_slice %72 {offsets = [0, 160], sizes = [8, 32], strides = [1, 1]} : vector<8x384xf32> to vector<8x32xf32>
    %103 = arith.truncf %102 : vector<8x32xf32> to vector<8x32xbf16>
    %104 = vector.extract_strided_slice %72 {offsets = [0, 288], sizes = [8, 32], strides = [1, 1]} : vector<8x384xf32> to vector<8x32xf32>
    %105 = arith.truncf %104 : vector<8x32xf32> to vector<8x32xbf16>
    "tpu.trace_start"() <{level = 10 : i32, message = "qd,kd->qk"}> : () -> ()
    %cst_52 = arith.constant dense<0.000000e+00> : vector<8x8xf32>
    %106 = tpu.matmul %101, %103, %cst_52 {dimension_numbers = #tpu.dot_dimension_numbers<[1], [1], [0], [0], [0, 0, 1, 0], [], []>} : vector<8x32xbf16>, vector<8x32xbf16>, vector<8x8xf32> -> vector<8x8xf32>
    "tpu.trace_stop"() : () -> ()
    %cst_53 = arith.constant 0.176776692 : f32
    %107 = vector.broadcast %cst_53 : f32 to vector<8x8xf32>
    %108 = arith.mulf %106, %107 : vector<8x8xf32>
    %109 = vector.broadcast %5 : vector<1x8xf32> to vector<8x8xf32>
    %110 = arith.addf %108, %109 : vector<8x8xf32>
    %cst_54 = arith.constant dense<0xFF800000> : vector<8xf32>
    %111 = vector.multi_reduction <maximumf>, %110, %cst_54 [1] : vector<8x8xf32> to vector<8xf32>
    %112 = vector.shape_cast %111 : vector<8xf32> to vector<8x1xf32>
    %113 = vector.broadcast %112 : vector<8x1xf32> to vector<8x8xf32>
    %114 = arith.subf %110, %113 : vector<8x8xf32>
    %115 = math.exp %114 : vector<8x8xf32>
    %cst_55 = arith.constant dense<0.000000e+00> : vector<8xf32>
    %116 = vector.multi_reduction <add>, %115, %cst_55 [1] : vector<8x8xf32> to vector<8xf32>
    %117 = vector.shape_cast %116 : vector<8xf32> to vector<8x1xf32>
    %118 = tpu.reciprocal %117 {approx = true} : vector<8x1xf32> -> vector<8x1xf32>
    %119 = vector.broadcast %118 : vector<8x1xf32> to vector<8x8xf32>
    %120 = arith.mulf %115, %119 : vector<8x8xf32>
    %c0_56 = arith.constant 0 : index
    %c0_57 = arith.constant 0 : index
    %c1 = arith.constant 1 : index
    %c0_58 = arith.constant 0 : index
    %c0_59 = arith.constant 0 : index
    %121 = vector.load %arg26[%c0_56, %c0_57, %c1, %c0_58, %c0_59] : memref<2x1x4x8x8xf32, #tpu.memory_space<vmem>>, vector<1x1x1x8x8xf32>
    %122 = vector.shape_cast %121 : vector<1x1x1x8x8xf32> to vector<8x8xf32>
    %123 = vector.shape_cast %120 : vector<8x8xf32> to vector<1x1x1x8x8xf32>
    tpu.vector_store %arg26[%c0_56, %c0_57, %c1, %c0_58, %c0_59], %123 {strides = array<i32>} : memref<2x1x4x8x8xf32, #tpu.memory_space<vmem>>, vector<1x1x1x8x8xf32>,
    %124 = arith.truncf %120 : vector<8x8xf32> to vector<8x8xbf16>
    %cst_60 = arith.constant dense<0.000000e+00> : vector<8x32xf32>
    %125 = tpu.matmul %124, %105, %cst_60 {dimension_numbers = #tpu.dot_dimension_numbers<[1], [0], [0], [1], [0, 0, 1, 1], [], []>} : vector<8x8xbf16>, vector<8x32xbf16>, vector<8x32xf32> -> vector<8x32xf32>
    %c0_61 = arith.constant 0 : index
    %c32 = arith.constant 32 : index
    %126 = vector.load %arg27[%c0_61, %c32] : memref<8x128xf32, #tpu.memory_space<vmem>>, vector<8x32xf32>
    tpu.vector_store %arg27[%c0_61, %c32], %125 {strides = array<i32>} : memref<8x128xf32, #tpu.memory_space<vmem>>, vector<8x32xf32>,
    %127 = vector.extract_strided_slice %72 {offsets = [0, 64], sizes = [8, 32], strides = [1, 1]} : vector<8x384xf32> to vector<8x32xf32>
    %128 = arith.truncf %127 : vector<8x32xf32> to vector<8x32xbf16>
    %129 = vector.extract_strided_slice %72 {offsets = [0, 192], sizes = [8, 32], strides = [1, 1]} : vector<8x384xf32> to vector<8x32xf32>
    %130 = arith.truncf %129 : vector<8x32xf32> to vector<8x32xbf16>
    %131 = vector.extract_strided_slice %72 {offsets = [0, 320], sizes = [8, 32], strides = [1, 1]} : vector<8x384xf32> to vector<8x32xf32>
    %132 = arith.truncf %131 : vector<8x32xf32> to vector<8x32xbf16>
    "tpu.trace_start"() <{level = 10 : i32, message = "qd,kd->qk"}> : () -> ()
    %cst_62 = arith.constant dense<0.000000e+00> : vector<8x8xf32>
    %133 = tpu.matmul %128, %130, %cst_62 {dimension_numbers = #tpu.dot_dimension_numbers<[1], [1], [0], [0], [0, 0, 1, 0], [], []>} : vector<8x32xbf16>, vector<8x32xbf16>, vector<8x8xf32> -> vector<8x8xf32>
    "tpu.trace_stop"() : () -> ()
    %cst_63 = arith.constant 0.176776692 : f32
    %134 = vector.broadcast %cst_63 : f32 to vector<8x8xf32>
    %135 = arith.mulf %133, %134 : vector<8x8xf32>
    %136 = vector.broadcast %5 : vector<1x8xf32> to vector<8x8xf32>
    %137 = arith.addf %135, %136 : vector<8x8xf32>
    %cst_64 = arith.constant dense<0xFF800000> : vector<8xf32>
    %138 = vector.multi_reduction <maximumf>, %137, %cst_64 [1] : vector<8x8xf32> to vector<8xf32>
    %139 = vector.shape_cast %138 : vector<8xf32> to vector<8x1xf32>
    %140 = vector.broadcast %139 : vector<8x1xf32> to vector<8x8xf32>
    %141 = arith.subf %137, %140 : vector<8x8xf32>
    %142 = math.exp %141 : vector<8x8xf32>
    %cst_65 = arith.constant dense<0.000000e+00> : vector<8xf32>
    %143 = vector.multi_reduction <add>, %142, %cst_65 [1] : vector<8x8xf32> to vector<8xf32>
    %144 = vector.shape_cast %143 : vector<8xf32> to vector<8x1xf32>
    %145 = tpu.reciprocal %144 {approx = true} : vector<8x1xf32> -> vector<8x1xf32>
    %146 = vector.broadcast %145 : vector<8x1xf32> to vector<8x8xf32>
    %147 = arith.mulf %142, %146 : vector<8x8xf32>
    %c0_66 = arith.constant 0 : index
    %c0_67 = arith.constant 0 : index
    %c2 = arith.constant 2 : index
    %c0_68 = arith.constant 0 : index
    %c0_69 = arith.constant 0 : index
    %148 = vector.load %arg26[%c0_66, %c0_67, %c2, %c0_68, %c0_69] : memref<2x1x4x8x8xf32, #tpu.memory_space<vmem>>, vector<1x1x1x8x8xf32>
    %149 = vector.shape_cast %148 : vector<1x1x1x8x8xf32> to vector<8x8xf32>
    %150 = vector.shape_cast %147 : vector<8x8xf32> to vector<1x1x1x8x8xf32>
    tpu.vector_store %arg26[%c0_66, %c0_67, %c2, %c0_68, %c0_69], %150 {strides = array<i32>} : memref<2x1x4x8x8xf32, #tpu.memory_space<vmem>>, vector<1x1x1x8x8xf32>,
    %151 = arith.truncf %147 : vector<8x8xf32> to vector<8x8xbf16>
    %cst_70 = arith.constant dense<0.000000e+00> : vector<8x32xf32>
    %152 = tpu.matmul %151, %132, %cst_70 {dimension_numbers = #tpu.dot_dimension_numbers<[1], [0], [0], [1], [0, 0, 1, 1], [], []>} : vector<8x8xbf16>, vector<8x32xbf16>, vector<8x32xf32> -> vector<8x32xf32>
    %c0_71 = arith.constant 0 : index
    %c64 = arith.constant 64 : index
    %153 = vector.load %arg27[%c0_71, %c64] : memref<8x128xf32, #tpu.memory_space<vmem>>, vector<8x32xf32>
    tpu.vector_store %arg27[%c0_71, %c64], %152 {strides = array<i32>} : memref<8x128xf32, #tpu.memory_space<vmem>>, vector<8x32xf32>,
    %154 = vector.extract_strided_slice %72 {offsets = [0, 96], sizes = [8, 32], strides = [1, 1]} : vector<8x384xf32> to vector<8x32xf32>
    %155 = arith.truncf %154 : vector<8x32xf32> to vector<8x32xbf16>
    %156 = vector.extract_strided_slice %72 {offsets = [0, 224], sizes = [8, 32], strides = [1, 1]} : vector<8x384xf32> to vector<8x32xf32>
    %157 = arith.truncf %156 : vector<8x32xf32> to vector<8x32xbf16>
    %158 = vector.extract_strided_slice %72 {offsets = [0, 352], sizes = [8, 32], strides = [1, 1]} : vector<8x384xf32> to vector<8x32xf32>
    %159 = arith.truncf %158 : vector<8x32xf32> to vector<8x32xbf16>
    "tpu.trace_start"() <{level = 10 : i32, message = "qd,kd->qk"}> : () -> ()
    %cst_72 = arith.constant dense<0.000000e+00> : vector<8x8xf32>
    %160 = tpu.matmul %155, %157, %cst_72 {dimension_numbers = #tpu.dot_dimension_numbers<[1], [1], [0], [0], [0, 0, 1, 0], [], []>} : vector<8x32xbf16>, vector<8x32xbf16>, vector<8x8xf32> -> vector<8x8xf32>
    "tpu.trace_stop"() : () -> ()
    %cst_73 = arith.constant 0.176776692 : f32
    %161 = vector.broadcast %cst_73 : f32 to vector<8x8xf32>
    %162 = arith.mulf %160, %161 : vector<8x8xf32>
    %163 = vector.broadcast %5 : vector<1x8xf32> to vector<8x8xf32>
    %164 = arith.addf %162, %163 : vector<8x8xf32>
    %cst_74 = arith.constant dense<0xFF800000> : vector<8xf32>
    %165 = vector.multi_reduction <maximumf>, %164, %cst_74 [1] : vector<8x8xf32> to vector<8xf32>
    %166 = vector.shape_cast %165 : vector<8xf32> to vector<8x1xf32>
    %167 = vector.broadcast %166 : vector<8x1xf32> to vector<8x8xf32>
    %168 = arith.subf %164, %167 : vector<8x8xf32>
    %169 = math.exp %168 : vector<8x8xf32>
    %cst_75 = arith.constant dense<0.000000e+00> : vector<8xf32>
    %170 = vector.multi_reduction <add>, %169, %cst_75 [1] : vector<8x8xf32> to vector<8xf32>
    %171 = vector.shape_cast %170 : vector<8xf32> to vector<8x1xf32>
    %172 = tpu.reciprocal %171 {approx = true} : vector<8x1xf32> -> vector<8x1xf32>
    %173 = vector.broadcast %172 : vector<8x1xf32> to vector<8x8xf32>
    %174 = arith.mulf %169, %173 : vector<8x8xf32>
    %c0_76 = arith.constant 0 : index
    %c0_77 = arith.constant 0 : index
    %c3 = arith.constant 3 : index
    %c0_78 = arith.constant 0 : index
    %c0_79 = arith.constant 0 : index
    %175 = vector.load %arg26[%c0_76, %c0_77, %c3, %c0_78, %c0_79] : memref<2x1x4x8x8xf32, #tpu.memory_space<vmem>>, vector<1x1x1x8x8xf32>
    %176 = vector.shape_cast %175 : vector<1x1x1x8x8xf32> to vector<8x8xf32>
    %177 = vector.shape_cast %174 : vector<8x8xf32> to vector<1x1x1x8x8xf32>
    tpu.vector_store %arg26[%c0_76, %c0_77, %c3, %c0_78, %c0_79], %177 {strides = array<i32>} : memref<2x1x4x8x8xf32, #tpu.memory_space<vmem>>, vector<1x1x1x8x8xf32>,
    %178 = arith.truncf %174 : vector<8x8xf32> to vector<8x8xbf16>
    %cst_80 = arith.constant dense<0.000000e+00> : vector<8x32xf32>
    %179 = tpu.matmul %178, %159, %cst_80 {dimension_numbers = #tpu.dot_dimension_numbers<[1], [0], [0], [1], [0, 0, 1, 1], [], []>} : vector<8x8xbf16>, vector<8x32xbf16>, vector<8x32xf32> -> vector<8x32xf32>
    %c0_81 = arith.constant 0 : index
    %c96 = arith.constant 96 : index
    %180 = vector.load %arg27[%c0_81, %c96] : memref<8x128xf32, #tpu.memory_space<vmem>>, vector<8x32xf32>
    tpu.vector_store %arg27[%c0_81, %c96], %179 {strides = array<i32>} : memref<8x128xf32, #tpu.memory_space<vmem>>, vector<8x32xf32>,
    %c0_82 = arith.constant 0 : index
    %c0_83 = arith.constant 0 : index
    %181 = vector.load %arg27[%c0_82, %c0_83] : memref<8x128xf32, #tpu.memory_space<vmem>>, vector<8x128xf32>
    %182 = arith.truncf %181 : vector<8x128xf32> to vector<8x128xbf16>
    %c0_84 = arith.constant 0 : index
    %c0_85 = arith.constant 0 : index
    %c0_86 = arith.constant 0 : index
    %183 = vector.load %arg13[%c0_84, %c0_85, %c0_86] : memref<2x128x128xbf16, #tpu.memory_space<vmem>>, vector<1x128x128xbf16>
    %184 = vector.shape_cast %183 : vector<1x128x128xbf16> to vector<128x128xbf16>
    %cst_87 = arith.constant dense<0.000000e+00> : vector<8x128xf32>
    %185 = tpu.matmul %182, %184, %cst_87 {dimension_numbers = #tpu.dot_dimension_numbers<[1], [0], [0], [1], [0, 0, 1, 1], [], []>} : vector<8x128xbf16>, vector<128x128xbf16>, vector<8x128xf32> -> vector<8x128xf32>
    %c0_88 = arith.constant 0 : index
    %c0_89 = arith.constant 0 : index
    %c0_90 = arith.constant 0 : index
    %186 = vector.load %arg14[%c0_88, %c0_89, %c0_90] : memref<2x1x128xf32, #tpu.memory_space<vmem>>, vector<1x1x128xf32>
    %187 = vector.shape_cast %186 : vector<1x1x128xf32> to vector<1x128xf32>
    %188 = vector.broadcast %187 : vector<1x128xf32> to vector<8x128xf32>
    %189 = arith.addf %185, %188 : vector<8x128xf32>
    %190 = arith.addf %189, %64 : vector<8x128xf32>
    %c0_91 = arith.constant 0 : index
    %c0_92 = arith.constant 0 : index
    %c0_93 = arith.constant 0 : index
    %191 = vector.load %arg15[%c0_91, %c0_92, %c0_93] : memref<2x1x128xf32, #tpu.memory_space<vmem>>, vector<1x1x128xf32>
    %192 = vector.shape_cast %191 : vector<1x1x128xf32> to vector<1x128xf32>
    %c0_94 = arith.constant 0 : index
    %c0_95 = arith.constant 0 : index
    %c0_96 = arith.constant 0 : index
    %193 = vector.load %arg16[%c0_94, %c0_95, %c0_96] : memref<2x1x128xf32, #tpu.memory_space<vmem>>, vector<1x1x128xf32>
    %194 = vector.shape_cast %193 : vector<1x1x128xf32> to vector<1x128xf32>
    %cst_97 = arith.constant dense<0.000000e+00> : vector<8xf32>
    %195 = vector.multi_reduction <add>, %190, %cst_97 [1] : vector<8x128xf32> to vector<8xf32>
    %196 = vector.shape_cast %195 : vector<8xf32> to vector<8x1xf32>
    %cst_98 = arith.constant 1.280000e+02 : f32
    %197 = vector.broadcast %cst_98 : f32 to vector<8x1xf32>
    %198 = arith.divf %196, %197 : vector<8x1xf32>
    %199 = vector.broadcast %198 : vector<8x1xf32> to vector<8x128xf32>
    %200 = arith.subf %190, %199 : vector<8x128xf32>
    %201 = arith.mulf %200, %200 : vector<8x128xf32>
    %cst_99 = arith.constant dense<0.000000e+00> : vector<8xf32>
    %202 = vector.multi_reduction <add>, %201, %cst_99 [1] : vector<8x128xf32> to vector<8xf32>
    %203 = vector.shape_cast %202 : vector<8xf32> to vector<8x1xf32>
    %cst_100 = arith.constant 1.280000e+02 : f32
    %204 = vector.broadcast %cst_100 : f32 to vector<8x1xf32>
    %205 = arith.divf %203, %204 : vector<8x1xf32>
    %206 = vector.broadcast %198 : vector<8x1xf32> to vector<8x128xf32>
    %207 = arith.subf %190, %206 : vector<8x128xf32>
    %cst_101 = arith.constant 9.99999974E-6 : f32
    %208 = vector.broadcast %cst_101 : f32 to vector<8x1xf32>
    %209 = arith.addf %205, %208 : vector<8x1xf32>
    %210 = math.rsqrt %209 : vector<8x1xf32>
    %211 = vector.broadcast %210 : vector<8x1xf32> to vector<8x128xf32>
    %212 = arith.mulf %207, %211 : vector<8x128xf32>
    %213 = vector.broadcast %192 : vector<1x128xf32> to vector<8x128xf32>
    %214 = arith.mulf %212, %213 : vector<8x128xf32>
    %215 = vector.broadcast %194 : vector<1x128xf32> to vector<8x128xf32>
    %216 = arith.addf %214, %215 : vector<8x128xf32>
    %217 = vector.broadcast %3 : vector<8x1xf32> to vector<8x128xf32>
    %218 = arith.mulf %216, %217 : vector<8x128xf32>
    %219 = arith.truncf %218 : vector<8x128xf32> to vector<8x128xbf16>
    %c0_102 = arith.constant 0 : index
    %c0_103 = arith.constant 0 : index
    %c0_104 = arith.constant 0 : index
    %220 = vector.load %arg17[%c0_102, %c0_103, %c0_104] : memref<2x128x256xbf16, #tpu.memory_space<vmem>>, vector<1x128x256xbf16>
    %221 = vector.shape_cast %220 : vector<1x128x256xbf16> to vector<128x256xbf16>
    %cst_105 = arith.constant dense<0.000000e+00> : vector<8x256xf32>
    %222 = tpu.matmul %219, %221, %cst_105 {dimension_numbers = #tpu.dot_dimension_numbers<[1], [0], [0], [1], [0, 0, 1, 1], [], []>} : vector<8x128xbf16>, vector<128x256xbf16>, vector<8x256xf32> -> vector<8x256xf32>
    %c0_106 = arith.constant 0 : index
    %c0_107 = arith.constant 0 : index
    %c0_108 = arith.constant 0 : index
    %223 = vector.load %arg18[%c0_106, %c0_107, %c0_108] : memref<2x1x256xf32, #tpu.memory_space<vmem>>, vector<1x1x256xf32>
    %224 = vector.shape_cast %223 : vector<1x1x256xf32> to vector<1x256xf32>
    %225 = vector.broadcast %224 : vector<1x256xf32> to vector<8x256xf32>
    %226 = arith.addf %222, %225 : vector<8x256xf32>
    %cst_109 = arith.constant 0.000000e+00 : f32
    %227 = vector.broadcast %cst_109 : f32 to vector<8x256xf32>
    %228 = arith.maximumf %226, %227 : vector<8x256xf32>
    %229 = arith.truncf %228 : vector<8x256xf32> to vector<8x256xbf16>
    %c0_110 = arith.constant 0 : index
    %c0_111 = arith.constant 0 : index
    %c0_112 = arith.constant 0 : index
    %230 = vector.load %arg19[%c0_110, %c0_111, %c0_112] : memref<2x256x128xbf16, #tpu.memory_space<vmem>>, vector<1x256x128xbf16>
    %231 = vector.shape_cast %230 : vector<1x256x128xbf16> to vector<256x128xbf16>
    %cst_113 = arith.constant dense<0.000000e+00> : vector<8x128xf32>
    %232 = tpu.matmul %229, %231, %cst_113 {dimension_numbers = #tpu.dot_dimension_numbers<[1], [0], [0], [1], [0, 0, 1, 1], [], []>} : vector<8x256xbf16>, vector<256x128xbf16>, vector<8x128xf32> -> vector<8x128xf32>
    %c0_114 = arith.constant 0 : index
    %c0_115 = arith.constant 0 : index
    %c0_116 = arith.constant 0 : index
    %233 = vector.load %arg20[%c0_114, %c0_115, %c0_116] : memref<2x1x128xf32, #tpu.memory_space<vmem>>, vector<1x1x128xf32>
    %234 = vector.shape_cast %233 : vector<1x1x128xf32> to vector<1x128xf32>
    %235 = vector.broadcast %234 : vector<1x128xf32> to vector<8x128xf32>
    %236 = arith.addf %232, %235 : vector<8x128xf32>
    %237 = arith.addf %236, %218 : vector<8x128xf32>
    %c0_117 = arith.constant 0 : index
    %c0_118 = arith.constant 0 : index
    %c0_119 = arith.constant 0 : index
    %238 = vector.load %arg21[%c0_117, %c0_118, %c0_119] : memref<2x1x128xf32, #tpu.memory_space<vmem>>, vector<1x1x128xf32>
    %239 = vector.shape_cast %238 : vector<1x1x128xf32> to vector<1x128xf32>
    %c0_120 = arith.constant 0 : index
    %c0_121 = arith.constant 0 : index
    %c0_122 = arith.constant 0 : index
    %240 = vector.load %arg22[%c0_120, %c0_121, %c0_122] : memref<2x1x128xf32, #tpu.memory_space<vmem>>, vector<1x1x128xf32>
    %241 = vector.shape_cast %240 : vector<1x1x128xf32> to vector<1x128xf32>
    %cst_123 = arith.constant dense<0.000000e+00> : vector<8xf32>
    %242 = vector.multi_reduction <add>, %237, %cst_123 [1] : vector<8x128xf32> to vector<8xf32>
    %243 = vector.shape_cast %242 : vector<8xf32> to vector<8x1xf32>
    %cst_124 = arith.constant 1.280000e+02 : f32
    %244 = vector.broadcast %cst_124 : f32 to vector<8x1xf32>
    %245 = arith.divf %243, %244 : vector<8x1xf32>
    %246 = vector.broadcast %245 : vector<8x1xf32> to vector<8x128xf32>
    %247 = arith.subf %237, %246 : vector<8x128xf32>
    %248 = arith.mulf %247, %247 : vector<8x128xf32>
    %cst_125 = arith.constant dense<0.000000e+00> : vector<8xf32>
    %249 = vector.multi_reduction <add>, %248, %cst_125 [1] : vector<8x128xf32> to vector<8xf32>
    %250 = vector.shape_cast %249 : vector<8xf32> to vector<8x1xf32>
    %cst_126 = arith.constant 1.280000e+02 : f32
    %251 = vector.broadcast %cst_126 : f32 to vector<8x1xf32>
    %252 = arith.divf %250, %251 : vector<8x1xf32>
    %253 = vector.broadcast %245 : vector<8x1xf32> to vector<8x128xf32>
    %254 = arith.subf %237, %253 : vector<8x128xf32>
    %cst_127 = arith.constant 9.99999974E-6 : f32
    %255 = vector.broadcast %cst_127 : f32 to vector<8x1xf32>
    %256 = arith.addf %252, %255 : vector<8x1xf32>
    %257 = math.rsqrt %256 : vector<8x1xf32>
    %258 = vector.broadcast %257 : vector<8x1xf32> to vector<8x128xf32>
    %259 = arith.mulf %254, %258 : vector<8x128xf32>
    %260 = vector.broadcast %239 : vector<1x128xf32> to vector<8x128xf32>
    %261 = arith.mulf %259, %260 : vector<8x128xf32>
    %262 = vector.broadcast %241 : vector<1x128xf32> to vector<8x128xf32>
    %263 = arith.addf %261, %262 : vector<8x128xf32>
    %264 = vector.broadcast %3 : vector<8x1xf32> to vector<8x128xf32>
    %265 = arith.mulf %263, %264 : vector<8x128xf32>
    %266 = arith.truncf %265 : vector<8x128xf32> to vector<8x128xbf16>
    %c1_128 = arith.constant 1 : index
    %c0_129 = arith.constant 0 : index
    %c0_130 = arith.constant 0 : index
    %267 = vector.load %arg11[%c1_128, %c0_129, %c0_130] : memref<2x128x384xbf16, #tpu.memory_space<vmem>>, vector<1x128x384xbf16>
    %268 = vector.shape_cast %267 : vector<1x128x384xbf16> to vector<128x384xbf16>
    %cst_131 = arith.constant dense<0.000000e+00> : vector<8x384xf32>
    %269 = tpu.matmul %266, %268, %cst_131 {dimension_numbers = #tpu.dot_dimension_numbers<[1], [0], [0], [1], [0, 0, 1, 1], [], []>} : vector<8x128xbf16>, vector<128x384xbf16>, vector<8x384xf32> -> vector<8x384xf32>
    %c1_132 = arith.constant 1 : index
    %c0_133 = arith.constant 0 : index
    %c0_134 = arith.constant 0 : index
    %270 = vector.load %arg12[%c1_132, %c0_133, %c0_134] : memref<2x1x384xf32, #tpu.memory_space<vmem>>, vector<1x1x384xf32>
    %271 = vector.shape_cast %270 : vector<1x1x384xf32> to vector<1x384xf32>
    %272 = vector.broadcast %271 : vector<1x384xf32> to vector<8x384xf32>
    %273 = arith.addf %269, %272 : vector<8x384xf32>
    %274 = vector.extract_strided_slice %273 {offsets = [0, 0], sizes = [8, 32], strides = [1, 1]} : vector<8x384xf32> to vector<8x32xf32>
    %275 = arith.truncf %274 : vector<8x32xf32> to vector<8x32xbf16>
    %276 = vector.extract_strided_slice %273 {offsets = [0, 128], sizes = [8, 32], strides = [1, 1]} : vector<8x384xf32> to vector<8x32xf32>
    %277 = arith.truncf %276 : vector<8x32xf32> to vector<8x32xbf16>
    %278 = vector.extract_strided_slice %273 {offsets = [0, 256], sizes = [8, 32], strides = [1, 1]} : vector<8x384xf32> to vector<8x32xf32>
    %279 = arith.truncf %278 : vector<8x32xf32> to vector<8x32xbf16>
    "tpu.trace_start"() <{level = 10 : i32, message = "qd,kd->qk"}> : () -> ()
    %cst_135 = arith.constant dense<0.000000e+00> : vector<8x8xf32>
    %280 = tpu.matmul %275, %277, %cst_135 {dimension_numbers = #tpu.dot_dimension_numbers<[1], [1], [0], [0], [0, 0, 1, 0], [], []>} : vector<8x32xbf16>, vector<8x32xbf16>, vector<8x8xf32> -> vector<8x8xf32>
    "tpu.trace_stop"() : () -> ()
    %cst_136 = arith.constant 0.176776692 : f32
    %281 = vector.broadcast %cst_136 : f32 to vector<8x8xf32>
    %282 = arith.mulf %280, %281 : vector<8x8xf32>
    %283 = vector.broadcast %5 : vector<1x8xf32> to vector<8x8xf32>
    %284 = arith.addf %282, %283 : vector<8x8xf32>
    %cst_137 = arith.constant dense<0xFF800000> : vector<8xf32>
    %285 = vector.multi_reduction <maximumf>, %284, %cst_137 [1] : vector<8x8xf32> to vector<8xf32>
    %286 = vector.shape_cast %285 : vector<8xf32> to vector<8x1xf32>
    %287 = vector.broadcast %286 : vector<8x1xf32> to vector<8x8xf32>
    %288 = arith.subf %284, %287 : vector<8x8xf32>
    %289 = math.exp %288 : vector<8x8xf32>
    %cst_138 = arith.constant dense<0.000000e+00> : vector<8xf32>
    %290 = vector.multi_reduction <add>, %289, %cst_138 [1] : vector<8x8xf32> to vector<8xf32>
    %291 = vector.shape_cast %290 : vector<8xf32> to vector<8x1xf32>
    %292 = tpu.reciprocal %291 {approx = true} : vector<8x1xf32> -> vector<8x1xf32>
    %293 = vector.broadcast %292 : vector<8x1xf32> to vector<8x8xf32>
    %294 = arith.mulf %289, %293 : vector<8x8xf32>
    %c1_139 = arith.constant 1 : index
    %c0_140 = arith.constant 0 : index
    %c0_141 = arith.constant 0 : index
    %c0_142 = arith.constant 0 : index
    %c0_143 = arith.constant 0 : index
    %295 = vector.load %arg26[%c1_139, %c0_140, %c0_141, %c0_142, %c0_143] : memref<2x1x4x8x8xf32, #tpu.memory_space<vmem>>, vector<1x1x1x8x8xf32>
    %296 = vector.shape_cast %295 : vector<1x1x1x8x8xf32> to vector<8x8xf32>
    %297 = vector.shape_cast %294 : vector<8x8xf32> to vector<1x1x1x8x8xf32>
    tpu.vector_store %arg26[%c1_139, %c0_140, %c0_141, %c0_142, %c0_143], %297 {strides = array<i32>} : memref<2x1x4x8x8xf32, #tpu.memory_space<vmem>>, vector<1x1x1x8x8xf32>,
    %298 = arith.truncf %294 : vector<8x8xf32> to vector<8x8xbf16>
    %cst_144 = arith.constant dense<0.000000e+00> : vector<8x32xf32>
    %299 = tpu.matmul %298, %279, %cst_144 {dimension_numbers = #tpu.dot_dimension_numbers<[1], [0], [0], [1], [0, 0, 1, 1], [], []>} : vector<8x8xbf16>, vector<8x32xbf16>, vector<8x32xf32> -> vector<8x32xf32>
    %c0_145 = arith.constant 0 : index
    %c0_146 = arith.constant 0 : index
    %300 = vector.load %arg27[%c0_145, %c0_146] : memref<8x128xf32, #tpu.memory_space<vmem>>, vector<8x32xf32>
    tpu.vector_store %arg27[%c0_145, %c0_146], %299 {strides = array<i32>} : memref<8x128xf32, #tpu.memory_space<vmem>>, vector<8x32xf32>,
    %301 = vector.extract_strided_slice %273 {offsets = [0, 32], sizes = [8, 32], strides = [1, 1]} : vector<8x384xf32> to vector<8x32xf32>
    %302 = arith.truncf %301 : vector<8x32xf32> to vector<8x32xbf16>
    %303 = vector.extract_strided_slice %273 {offsets = [0, 160], sizes = [8, 32], strides = [1, 1]} : vector<8x384xf32> to vector<8x32xf32>
    %304 = arith.truncf %303 : vector<8x32xf32> to vector<8x32xbf16>
    %305 = vector.extract_strided_slice %273 {offsets = [0, 288], sizes = [8, 32], strides = [1, 1]} : vector<8x384xf32> to vector<8x32xf32>
    %306 = arith.truncf %305 : vector<8x32xf32> to vector<8x32xbf16>
    "tpu.trace_start"() <{level = 10 : i32, message = "qd,kd->qk"}> : () -> ()
    %cst_147 = arith.constant dense<0.000000e+00> : vector<8x8xf32>
    %307 = tpu.matmul %302, %304, %cst_147 {dimension_numbers = #tpu.dot_dimension_numbers<[1], [1], [0], [0], [0, 0, 1, 0], [], []>} : vector<8x32xbf16>, vector<8x32xbf16>, vector<8x8xf32> -> vector<8x8xf32>
    "tpu.trace_stop"() : () -> ()
    %cst_148 = arith.constant 0.176776692 : f32
    %308 = vector.broadcast %cst_148 : f32 to vector<8x8xf32>
    %309 = arith.mulf %307, %308 : vector<8x8xf32>
    %310 = vector.broadcast %5 : vector<1x8xf32> to vector<8x8xf32>
    %311 = arith.addf %309, %310 : vector<8x8xf32>
    %cst_149 = arith.constant dense<0xFF800000> : vector<8xf32>
    %312 = vector.multi_reduction <maximumf>, %311, %cst_149 [1] : vector<8x8xf32> to vector<8xf32>
    %313 = vector.shape_cast %312 : vector<8xf32> to vector<8x1xf32>
    %314 = vector.broadcast %313 : vector<8x1xf32> to vector<8x8xf32>
    %315 = arith.subf %311, %314 : vector<8x8xf32>
    %316 = math.exp %315 : vector<8x8xf32>
    %cst_150 = arith.constant dense<0.000000e+00> : vector<8xf32>
    %317 = vector.multi_reduction <add>, %316, %cst_150 [1] : vector<8x8xf32> to vector<8xf32>
    %318 = vector.shape_cast %317 : vector<8xf32> to vector<8x1xf32>
    %319 = tpu.reciprocal %318 {approx = true} : vector<8x1xf32> -> vector<8x1xf32>
    %320 = vector.broadcast %319 : vector<8x1xf32> to vector<8x8xf32>
    %321 = arith.mulf %316, %320 : vector<8x8xf32>
    %c1_151 = arith.constant 1 : index
    %c0_152 = arith.constant 0 : index
    %c1_153 = arith.constant 1 : index
    %c0_154 = arith.constant 0 : index
    %c0_155 = arith.constant 0 : index
    %322 = vector.load %arg26[%c1_151, %c0_152, %c1_153, %c0_154, %c0_155] : memref<2x1x4x8x8xf32, #tpu.memory_space<vmem>>, vector<1x1x1x8x8xf32>
    %323 = vector.shape_cast %322 : vector<1x1x1x8x8xf32> to vector<8x8xf32>
    %324 = vector.shape_cast %321 : vector<8x8xf32> to vector<1x1x1x8x8xf32>
    tpu.vector_store %arg26[%c1_151, %c0_152, %c1_153, %c0_154, %c0_155], %324 {strides = array<i32>} : memref<2x1x4x8x8xf32, #tpu.memory_space<vmem>>, vector<1x1x1x8x8xf32>,
    %325 = arith.truncf %321 : vector<8x8xf32> to vector<8x8xbf16>
    %cst_156 = arith.constant dense<0.000000e+00> : vector<8x32xf32>
    %326 = tpu.matmul %325, %306, %cst_156 {dimension_numbers = #tpu.dot_dimension_numbers<[1], [0], [0], [1], [0, 0, 1, 1], [], []>} : vector<8x8xbf16>, vector<8x32xbf16>, vector<8x32xf32> -> vector<8x32xf32>
    %c0_157 = arith.constant 0 : index
    %c32_158 = arith.constant 32 : index
    %327 = vector.load %arg27[%c0_157, %c32_158] : memref<8x128xf32, #tpu.memory_space<vmem>>, vector<8x32xf32>
    tpu.vector_store %arg27[%c0_157, %c32_158], %326 {strides = array<i32>} : memref<8x128xf32, #tpu.memory_space<vmem>>, vector<8x32xf32>,
    %328 = vector.extract_strided_slice %273 {offsets = [0, 64], sizes = [8, 32], strides = [1, 1]} : vector<8x384xf32> to vector<8x32xf32>
    %329 = arith.truncf %328 : vector<8x32xf32> to vector<8x32xbf16>
    %330 = vector.extract_strided_slice %273 {offsets = [0, 192], sizes = [8, 32], strides = [1, 1]} : vector<8x384xf32> to vector<8x32xf32>
    %331 = arith.truncf %330 : vector<8x32xf32> to vector<8x32xbf16>
    %332 = vector.extract_strided_slice %273 {offsets = [0, 320], sizes = [8, 32], strides = [1, 1]} : vector<8x384xf32> to vector<8x32xf32>
    %333 = arith.truncf %332 : vector<8x32xf32> to vector<8x32xbf16>
    "tpu.trace_start"() <{level = 10 : i32, message = "qd,kd->qk"}> : () -> ()
    %cst_159 = arith.constant dense<0.000000e+00> : vector<8x8xf32>
    %334 = tpu.matmul %329, %331, %cst_159 {dimension_numbers = #tpu.dot_dimension_numbers<[1], [1], [0], [0], [0, 0, 1, 0], [], []>} : vector<8x32xbf16>, vector<8x32xbf16>, vector<8x8xf32> -> vector<8x8xf32>
    "tpu.trace_stop"() : () -> ()
    %cst_160 = arith.constant 0.176776692 : f32
    %335 = vector.broadcast %cst_160 : f32 to vector<8x8xf32>
    %336 = arith.mulf %334, %335 : vector<8x8xf32>
    %337 = vector.broadcast %5 : vector<1x8xf32> to vector<8x8xf32>
    %338 = arith.addf %336, %337 : vector<8x8xf32>
    %cst_161 = arith.constant dense<0xFF800000> : vector<8xf32>
    %339 = vector.multi_reduction <maximumf>, %338, %cst_161 [1] : vector<8x8xf32> to vector<8xf32>
    %340 = vector.shape_cast %339 : vector<8xf32> to vector<8x1xf32>
    %341 = vector.broadcast %340 : vector<8x1xf32> to vector<8x8xf32>
    %342 = arith.subf %338, %341 : vector<8x8xf32>
    %343 = math.exp %342 : vector<8x8xf32>
    %cst_162 = arith.constant dense<0.000000e+00> : vector<8xf32>
    %344 = vector.multi_reduction <add>, %343, %cst_162 [1] : vector<8x8xf32> to vector<8xf32>
    %345 = vector.shape_cast %344 : vector<8xf32> to vector<8x1xf32>
    %346 = tpu.reciprocal %345 {approx = true} : vector<8x1xf32> -> vector<8x1xf32>
    %347 = vector.broadcast %346 : vector<8x1xf32> to vector<8x8xf32>
    %348 = arith.mulf %343, %347 : vector<8x8xf32>
    %c1_163 = arith.constant 1 : index
    %c0_164 = arith.constant 0 : index
    %c2_165 = arith.constant 2 : index
    %c0_166 = arith.constant 0 : index
    %c0_167 = arith.constant 0 : index
    %349 = vector.load %arg26[%c1_163, %c0_164, %c2_165, %c0_166, %c0_167] : memref<2x1x4x8x8xf32, #tpu.memory_space<vmem>>, vector<1x1x1x8x8xf32>
    %350 = vector.shape_cast %349 : vector<1x1x1x8x8xf32> to vector<8x8xf32>
    %351 = vector.shape_cast %348 : vector<8x8xf32> to vector<1x1x1x8x8xf32>
    tpu.vector_store %arg26[%c1_163, %c0_164, %c2_165, %c0_166, %c0_167], %351 {strides = array<i32>} : memref<2x1x4x8x8xf32, #tpu.memory_space<vmem>>, vector<1x1x1x8x8xf32>,
    %352 = arith.truncf %348 : vector<8x8xf32> to vector<8x8xbf16>
    %cst_168 = arith.constant dense<0.000000e+00> : vector<8x32xf32>
    %353 = tpu.matmul %352, %333, %cst_168 {dimension_numbers = #tpu.dot_dimension_numbers<[1], [0], [0], [1], [0, 0, 1, 1], [], []>} : vector<8x8xbf16>, vector<8x32xbf16>, vector<8x32xf32> -> vector<8x32xf32>
    %c0_169 = arith.constant 0 : index
    %c64_170 = arith.constant 64 : index
    %354 = vector.load %arg27[%c0_169, %c64_170] : memref<8x128xf32, #tpu.memory_space<vmem>>, vector<8x32xf32>
    tpu.vector_store %arg27[%c0_169, %c64_170], %353 {strides = array<i32>} : memref<8x128xf32, #tpu.memory_space<vmem>>, vector<8x32xf32>,
    %355 = vector.extract_strided_slice %273 {offsets = [0, 96], sizes = [8, 32], strides = [1, 1]} : vector<8x384xf32> to vector<8x32xf32>
    %356 = arith.truncf %355 : vector<8x32xf32> to vector<8x32xbf16>
    %357 = vector.extract_strided_slice %273 {offsets = [0, 224], sizes = [8, 32], strides = [1, 1]} : vector<8x384xf32> to vector<8x32xf32>
    %358 = arith.truncf %357 : vector<8x32xf32> to vector<8x32xbf16>
    %359 = vector.extract_strided_slice %273 {offsets = [0, 352], sizes = [8, 32], strides = [1, 1]} : vector<8x384xf32> to vector<8x32xf32>
    %360 = arith.truncf %359 : vector<8x32xf32> to vector<8x32xbf16>
    "tpu.trace_start"() <{level = 10 : i32, message = "qd,kd->qk"}> : () -> ()
    %cst_171 = arith.constant dense<0.000000e+00> : vector<8x8xf32>
    %361 = tpu.matmul %356, %358, %cst_171 {dimension_numbers = #tpu.dot_dimension_numbers<[1], [1], [0], [0], [0, 0, 1, 0], [], []>} : vector<8x32xbf16>, vector<8x32xbf16>, vector<8x8xf32> -> vector<8x8xf32>
    "tpu.trace_stop"() : () -> ()
    %cst_172 = arith.constant 0.176776692 : f32
    %362 = vector.broadcast %cst_172 : f32 to vector<8x8xf32>
    %363 = arith.mulf %361, %362 : vector<8x8xf32>
    %364 = vector.broadcast %5 : vector<1x8xf32> to vector<8x8xf32>
    %365 = arith.addf %363, %364 : vector<8x8xf32>
    %cst_173 = arith.constant dense<0xFF800000> : vector<8xf32>
    %366 = vector.multi_reduction <maximumf>, %365, %cst_173 [1] : vector<8x8xf32> to vector<8xf32>
    %367 = vector.shape_cast %366 : vector<8xf32> to vector<8x1xf32>
    %368 = vector.broadcast %367 : vector<8x1xf32> to vector<8x8xf32>
    %369 = arith.subf %365, %368 : vector<8x8xf32>
    %370 = math.exp %369 : vector<8x8xf32>
    %cst_174 = arith.constant dense<0.000000e+00> : vector<8xf32>
    %371 = vector.multi_reduction <add>, %370, %cst_174 [1] : vector<8x8xf32> to vector<8xf32>
    %372 = vector.shape_cast %371 : vector<8xf32> to vector<8x1xf32>
    %373 = tpu.reciprocal %372 {approx = true} : vector<8x1xf32> -> vector<8x1xf32>
    %374 = vector.broadcast %373 : vector<8x1xf32> to vector<8x8xf32>
    %375 = arith.mulf %370, %374 : vector<8x8xf32>
    %c1_175 = arith.constant 1 : index
    %c0_176 = arith.constant 0 : index
    %c3_177 = arith.constant 3 : index
    %c0_178 = arith.constant 0 : index
    %c0_179 = arith.constant 0 : index
    %376 = vector.load %arg26[%c1_175, %c0_176, %c3_177, %c0_178, %c0_179] : memref<2x1x4x8x8xf32, #tpu.memory_space<vmem>>, vector<1x1x1x8x8xf32>
    %377 = vector.shape_cast %376 : vector<1x1x1x8x8xf32> to vector<8x8xf32>
    %378 = vector.shape_cast %375 : vector<8x8xf32> to vector<1x1x1x8x8xf32>
    tpu.vector_store %arg26[%c1_175, %c0_176, %c3_177, %c0_178, %c0_179], %378 {strides = array<i32>} : memref<2x1x4x8x8xf32, #tpu.memory_space<vmem>>, vector<1x1x1x8x8xf32>,
    %379 = arith.truncf %375 : vector<8x8xf32> to vector<8x8xbf16>
    %cst_180 = arith.constant dense<0.000000e+00> : vector<8x32xf32>
    %380 = tpu.matmul %379, %360, %cst_180 {dimension_numbers = #tpu.dot_dimension_numbers<[1], [0], [0], [1], [0, 0, 1, 1], [], []>} : vector<8x8xbf16>, vector<8x32xbf16>, vector<8x32xf32> -> vector<8x32xf32>
    %c0_181 = arith.constant 0 : index
    %c96_182 = arith.constant 96 : index
    %381 = vector.load %arg27[%c0_181, %c96_182] : memref<8x128xf32, #tpu.memory_space<vmem>>, vector<8x32xf32>
    tpu.vector_store %arg27[%c0_181, %c96_182], %380 {strides = array<i32>} : memref<8x128xf32, #tpu.memory_space<vmem>>, vector<8x32xf32>,
    %c0_183 = arith.constant 0 : index
    %c0_184 = arith.constant 0 : index
    %382 = vector.load %arg27[%c0_183, %c0_184] : memref<8x128xf32, #tpu.memory_space<vmem>>, vector<8x128xf32>
    %383 = arith.truncf %382 : vector<8x128xf32> to vector<8x128xbf16>
    %c1_185 = arith.constant 1 : index
    %c0_186 = arith.constant 0 : index
    %c0_187 = arith.constant 0 : index
    %384 = vector.load %arg13[%c1_185, %c0_186, %c0_187] : memref<2x128x128xbf16, #tpu.memory_space<vmem>>, vector<1x128x128xbf16>
    %385 = vector.shape_cast %384 : vector<1x128x128xbf16> to vector<128x128xbf16>
    %cst_188 = arith.constant dense<0.000000e+00> : vector<8x128xf32>
    %386 = tpu.matmul %383, %385, %cst_188 {dimension_numbers = #tpu.dot_dimension_numbers<[1], [0], [0], [1], [0, 0, 1, 1], [], []>} : vector<8x128xbf16>, vector<128x128xbf16>, vector<8x128xf32> -> vector<8x128xf32>
    %c1_189 = arith.constant 1 : index
    %c0_190 = arith.constant 0 : index
    %c0_191 = arith.constant 0 : index
    %387 = vector.load %arg14[%c1_189, %c0_190, %c0_191] : memref<2x1x128xf32, #tpu.memory_space<vmem>>, vector<1x1x128xf32>
    %388 = vector.shape_cast %387 : vector<1x1x128xf32> to vector<1x128xf32>
    %389 = vector.broadcast %388 : vector<1x128xf32> to vector<8x128xf32>
    %390 = arith.addf %386, %389 : vector<8x128xf32>
    %391 = arith.addf %390, %265 : vector<8x128xf32>
    %c1_192 = arith.constant 1 : index
    %c0_193 = arith.constant 0 : index
    %c0_194 = arith.constant 0 : index
    %392 = vector.load %arg15[%c1_192, %c0_193, %c0_194] : memref<2x1x128xf32, #tpu.memory_space<vmem>>, vector<1x1x128xf32>
    %393 = vector.shape_cast %392 : vector<1x1x128xf32> to vector<1x128xf32>
    %c1_195 = arith.constant 1 : index
    %c0_196 = arith.constant 0 : index
    %c0_197 = arith.constant 0 : index
    %394 = vector.load %arg16[%c1_195, %c0_196, %c0_197] : memref<2x1x128xf32, #tpu.memory_space<vmem>>, vector<1x1x128xf32>
    %395 = vector.shape_cast %394 : vector<1x1x128xf32> to vector<1x128xf32>
    %cst_198 = arith.constant dense<0.000000e+00> : vector<8xf32>
    %396 = vector.multi_reduction <add>, %391, %cst_198 [1] : vector<8x128xf32> to vector<8xf32>
    %397 = vector.shape_cast %396 : vector<8xf32> to vector<8x1xf32>
    %cst_199 = arith.constant 1.280000e+02 : f32
    %398 = vector.broadcast %cst_199 : f32 to vector<8x1xf32>
    %399 = arith.divf %397, %398 : vector<8x1xf32>
    %400 = vector.broadcast %399 : vector<8x1xf32> to vector<8x128xf32>
    %401 = arith.subf %391, %400 : vector<8x128xf32>
    %402 = arith.mulf %401, %401 : vector<8x128xf32>
    %cst_200 = arith.constant dense<0.000000e+00> : vector<8xf32>
    %403 = vector.multi_reduction <add>, %402, %cst_200 [1] : vector<8x128xf32> to vector<8xf32>
    %404 = vector.shape_cast %403 : vector<8xf32> to vector<8x1xf32>
    %cst_201 = arith.constant 1.280000e+02 : f32
    %405 = vector.broadcast %cst_201 : f32 to vector<8x1xf32>
    %406 = arith.divf %404, %405 : vector<8x1xf32>
    %407 = vector.broadcast %399 : vector<8x1xf32> to vector<8x128xf32>
    %408 = arith.subf %391, %407 : vector<8x128xf32>
    %cst_202 = arith.constant 9.99999974E-6 : f32
    %409 = vector.broadcast %cst_202 : f32 to vector<8x1xf32>
    %410 = arith.addf %406, %409 : vector<8x1xf32>
    %411 = math.rsqrt %410 : vector<8x1xf32>
    %412 = vector.broadcast %411 : vector<8x1xf32> to vector<8x128xf32>
    %413 = arith.mulf %408, %412 : vector<8x128xf32>
    %414 = vector.broadcast %393 : vector<1x128xf32> to vector<8x128xf32>
    %415 = arith.mulf %413, %414 : vector<8x128xf32>
    %416 = vector.broadcast %395 : vector<1x128xf32> to vector<8x128xf32>
    %417 = arith.addf %415, %416 : vector<8x128xf32>
    %418 = vector.broadcast %3 : vector<8x1xf32> to vector<8x128xf32>
    %419 = arith.mulf %417, %418 : vector<8x128xf32>
    %420 = arith.truncf %419 : vector<8x128xf32> to vector<8x128xbf16>
    %c1_203 = arith.constant 1 : index
    %c0_204 = arith.constant 0 : index
    %c0_205 = arith.constant 0 : index
    %421 = vector.load %arg17[%c1_203, %c0_204, %c0_205] : memref<2x128x256xbf16, #tpu.memory_space<vmem>>, vector<1x128x256xbf16>
    %422 = vector.shape_cast %421 : vector<1x128x256xbf16> to vector<128x256xbf16>
    %cst_206 = arith.constant dense<0.000000e+00> : vector<8x256xf32>
    %423 = tpu.matmul %420, %422, %cst_206 {dimension_numbers = #tpu.dot_dimension_numbers<[1], [0], [0], [1], [0, 0, 1, 1], [], []>} : vector<8x128xbf16>, vector<128x256xbf16>, vector<8x256xf32> -> vector<8x256xf32>
    %c1_207 = arith.constant 1 : index
    %c0_208 = arith.constant 0 : index
    %c0_209 = arith.constant 0 : index
    %424 = vector.load %arg18[%c1_207, %c0_208, %c0_209] : memref<2x1x256xf32, #tpu.memory_space<vmem>>, vector<1x1x256xf32>
    %425 = vector.shape_cast %424 : vector<1x1x256xf32> to vector<1x256xf32>
    %426 = vector.broadcast %425 : vector<1x256xf32> to vector<8x256xf32>
    %427 = arith.addf %423, %426 : vector<8x256xf32>
    %cst_210 = arith.constant 0.000000e+00 : f32
    %428 = vector.broadcast %cst_210 : f32 to vector<8x256xf32>
    %429 = arith.maximumf %427, %428 : vector<8x256xf32>
    %430 = arith.truncf %429 : vector<8x256xf32> to vector<8x256xbf16>
    %c1_211 = arith.constant 1 : index
    %c0_212 = arith.constant 0 : index
    %c0_213 = arith.constant 0 : index
    %431 = vector.load %arg19[%c1_211, %c0_212, %c0_213] : memref<2x256x128xbf16, #tpu.memory_space<vmem>>, vector<1x256x128xbf16>
    %432 = vector.shape_cast %431 : vector<1x256x128xbf16> to vector<256x128xbf16>
    %cst_214 = arith.constant dense<0.000000e+00> : vector<8x128xf32>
    %433 = tpu.matmul %430, %432, %cst_214 {dimension_numbers = #tpu.dot_dimension_numbers<[1], [0], [0], [1], [0, 0, 1, 1], [], []>} : vector<8x256xbf16>, vector<256x128xbf16>, vector<8x128xf32> -> vector<8x128xf32>
    %c1_215 = arith.constant 1 : index
    %c0_216 = arith.constant 0 : index
    %c0_217 = arith.constant 0 : index
    %434 = vector.load %arg20[%c1_215, %c0_216, %c0_217] : memref<2x1x128xf32, #tpu.memory_space<vmem>>, vector<1x1x128xf32>
    %435 = vector.shape_cast %434 : vector<1x1x128xf32> to vector<1x128xf32>
    %436 = vector.broadcast %435 : vector<1x128xf32> to vector<8x128xf32>
    %437 = arith.addf %433, %436 : vector<8x128xf32>
    %438 = arith.addf %437, %419 : vector<8x128xf32>
    %c1_218 = arith.constant 1 : index
    %c0_219 = arith.constant 0 : index
    %c0_220 = arith.constant 0 : index
    %439 = vector.load %arg21[%c1_218, %c0_219, %c0_220] : memref<2x1x128xf32, #tpu.memory_space<vmem>>, vector<1x1x128xf32>
    %440 = vector.shape_cast %439 : vector<1x1x128xf32> to vector<1x128xf32>
    %c1_221 = arith.constant 1 : index
    %c0_222 = arith.constant 0 : index
    %c0_223 = arith.constant 0 : index
    %441 = vector.load %arg22[%c1_221, %c0_222, %c0_223] : memref<2x1x128xf32, #tpu.memory_space<vmem>>, vector<1x1x128xf32>
    %442 = vector.shape_cast %441 : vector<1x1x128xf32> to vector<1x128xf32>
    %cst_224 = arith.constant dense<0.000000e+00> : vector<8xf32>
    %443 = vector.multi_reduction <add>, %438, %cst_224 [1] : vector<8x128xf32> to vector<8xf32>
    %444 = vector.shape_cast %443 : vector<8xf32> to vector<8x1xf32>
    %cst_225 = arith.constant 1.280000e+02 : f32
    %445 = vector.broadcast %cst_225 : f32 to vector<8x1xf32>
    %446 = arith.divf %444, %445 : vector<8x1xf32>
    %447 = vector.broadcast %446 : vector<8x1xf32> to vector<8x128xf32>
    %448 = arith.subf %438, %447 : vector<8x128xf32>
    %449 = arith.mulf %448, %448 : vector<8x128xf32>
    %cst_226 = arith.constant dense<0.000000e+00> : vector<8xf32>
    %450 = vector.multi_reduction <add>, %449, %cst_226 [1] : vector<8x128xf32> to vector<8xf32>
    %451 = vector.shape_cast %450 : vector<8xf32> to vector<8x1xf32>
    %cst_227 = arith.constant 1.280000e+02 : f32
    %452 = vector.broadcast %cst_227 : f32 to vector<8x1xf32>
    %453 = arith.divf %451, %452 : vector<8x1xf32>
    %454 = vector.broadcast %446 : vector<8x1xf32> to vector<8x128xf32>
    %455 = arith.subf %438, %454 : vector<8x128xf32>
    %cst_228 = arith.constant 9.99999974E-6 : f32
    %456 = vector.broadcast %cst_228 : f32 to vector<8x1xf32>
    %457 = arith.addf %453, %456 : vector<8x1xf32>
    %458 = math.rsqrt %457 : vector<8x1xf32>
    %459 = vector.broadcast %458 : vector<8x1xf32> to vector<8x128xf32>
    %460 = arith.mulf %455, %459 : vector<8x128xf32>
    %461 = vector.broadcast %440 : vector<1x128xf32> to vector<8x128xf32>
    %462 = arith.mulf %460, %461 : vector<8x128xf32>
    %463 = vector.broadcast %442 : vector<1x128xf32> to vector<8x128xf32>
    %464 = arith.addf %462, %463 : vector<8x128xf32>
    %465 = vector.broadcast %3 : vector<8x1xf32> to vector<8x128xf32>
    %466 = arith.mulf %464, %465 : vector<8x128xf32>
    %cst_229 = arith.constant dense<0xFF800000> : vector<128xf32>
    %467 = vector.multi_reduction <maximumf>, %466, %cst_229 [0] : vector<8x128xf32> to vector<128xf32>
    %468 = vector.shape_cast %467 : vector<128xf32> to vector<1x128xf32>
    %469 = arith.truncf %468 : vector<1x128xf32> to vector<1x128xbf16>
    %c0_230 = arith.constant 0 : index
    %c0_231 = arith.constant 0 : index
    %470 = vector.load %arg23[%c0_230, %c0_231] : memref<128x128xbf16, #tpu.memory_space<vmem>>, vector<128x128xbf16>
    %cst_232 = arith.constant dense<0.000000e+00> : vector<1x128xf32>
    %471 = tpu.matmul %469, %470, %cst_232 {dimension_numbers = #tpu.dot_dimension_numbers<[1], [0], [0], [1], [0, 0, 1, 1], [], []>} : vector<1x128xbf16>, vector<128x128xbf16>, vector<1x128xf32> -> vector<1x128xf32>
    %c0_233 = arith.constant 0 : index
    %c0_234 = arith.constant 0 : index
    %472 = vector.load %arg24[%c0_233, %c0_234] : memref<1x128xf32, #tpu.memory_space<vmem>>, vector<1x128xf32>
    %473 = arith.addf %471, %472 : vector<1x128xf32>
    %cst_235 = arith.constant dense<0xFF800000> : vector<1xf32>
    %474 = vector.multi_reduction <maximumf>, %473, %cst_235 [1] : vector<1x128xf32> to vector<1xf32>
    %475 = vector.shape_cast %474 : vector<1xf32> to vector<1x1xf32>
    %476 = vector.broadcast %475 : vector<1x1xf32> to vector<1x128xf32>
    %477 = arith.subf %473, %476 : vector<1x128xf32>
    %478 = math.exp %477 : vector<1x128xf32>
    %cst_236 = arith.constant dense<0.000000e+00> : vector<1xf32>
    %479 = vector.multi_reduction <add>, %478, %cst_236 [1] : vector<1x128xf32> to vector<1xf32>
    %480 = vector.shape_cast %479 : vector<1xf32> to vector<1x1xf32>
    %481 = math.log %480 : vector<1x1xf32>
    %482 = arith.addf %481, %475 : vector<1x1xf32>
    %483 = vector.broadcast %482 : vector<1x1xf32> to vector<1x128xf32>
    %484 = arith.subf %473, %483 : vector<1x128xf32>
    %c0_237 = arith.constant 0 : index
    %c0_238 = arith.constant 0 : index
    %c0_239 = arith.constant 0 : index
    %485 = vector.load %arg25[%c0_237, %c0_238, %c0_239] : memref<1x1x128xf32, #tpu.memory_space<vmem>>, vector<1x1x128xf32>
    %486 = vector.shape_cast %485 : vector<1x1x128xf32> to vector<1x128xf32>
    %487 = vector.shape_cast %484 : vector<1x128xf32> to vector<1x1x128xf32>
    tpu.vector_store %arg25[%c0_237, %c0_238, %c0_239], %487 {strides = array<i32>} : memref<1x1x128xf32, #tpu.memory_space<vmem>>, vector<1x1x128xf32>,
    return
  }
  func.func @transform_0(%arg0: i32) -> (i32, i32, i32) {
    %c0_i32 = arith.constant 0 : i32
    %c0_i32_0 = arith.constant 0 : i32
    %c0_i32_1 = arith.constant 0 : i32
    return %arg0, %c0_i32, %c0_i32_0 : i32, i32, i32
  }
  func.func @transform_1(%arg0: i32) -> (i32, i32, i32) {
    %c0_i32 = arith.constant 0 : i32
    %c0_i32_0 = arith.constant 0 : i32
    %c0_i32_1 = arith.constant 0 : i32
    return %arg0, %c0_i32, %c0_i32_0 : i32, i32, i32
  }
  func.func @transform_2(%arg0: i32) -> (i32, i32, i32) {
    %c0_i32 = arith.constant 0 : i32
    %c0_i32_0 = arith.constant 0 : i32
    %c0_i32_1 = arith.constant 0 : i32
    return %arg0, %c0_i32, %c0_i32_0 : i32, i32, i32
  }
  func.func @transform_3(%arg0: i32) -> (i32, i32, i32) {
    %c0_i32 = arith.constant 0 : i32
    %c0_i32_0 = arith.constant 0 : i32
    %c0_i32_1 = arith.constant 0 : i32
    return %arg0, %c0_i32, %c0_i32_0 : i32, i32, i32
  }
  func.func @transform_4(%arg0: i32) -> (i32, i32) {
    %c0_i32 = arith.constant 0 : i32
    %c0_i32_0 = arith.constant 0 : i32
    %c0_i32_1 = arith.constant 0 : i32
    return %c0_i32, %c0_i32_0 : i32, i32
  }
  func.func @transform_5(%arg0: i32) -> (i32, i32) {
    %c0_i32 = arith.constant 0 : i32
    %c0_i32_0 = arith.constant 0 : i32
    %c0_i32_1 = arith.constant 0 : i32
    return %c0_i32, %c0_i32_0 : i32, i32
  }
  func.func @transform_6(%arg0: i32) -> (i32, i32) {
    %c0_i32 = arith.constant 0 : i32
    %c0_i32_0 = arith.constant 0 : i32
    %c0_i32_1 = arith.constant 0 : i32
    return %c0_i32, %c0_i32_0 : i32, i32
  }
  func.func @transform_7(%arg0: i32) -> (i32, i32) {
    %c0_i32 = arith.constant 0 : i32
    %c0_i32_0 = arith.constant 0 : i32
    %c0_i32_1 = arith.constant 0 : i32
    return %c0_i32, %c0_i32_0 : i32, i32
  }
  func.func @transform_8(%arg0: i32) -> (i32, i32) {
    %c0_i32 = arith.constant 0 : i32
    %c0_i32_0 = arith.constant 0 : i32
    %c0_i32_1 = arith.constant 0 : i32
    return %c0_i32, %c0_i32_0 : i32, i32
  }
  func.func @transform_9(%arg0: i32) -> (i32, i32) {
    %c0_i32 = arith.constant 0 : i32
    %c0_i32_0 = arith.constant 0 : i32
    %c0_i32_1 = arith.constant 0 : i32
    return %c0_i32, %c0_i32_0 : i32, i32
  }
  func.func @transform_10(%arg0: i32) -> (i32, i32, i32) {
    %c0_i32 = arith.constant 0 : i32
    %c0_i32_0 = arith.constant 0 : i32
    %c0_i32_1 = arith.constant 0 : i32
    %c0_i32_2 = arith.constant 0 : i32
    return %c0_i32, %c0_i32_0, %c0_i32_1 : i32, i32, i32
  }
  func.func @transform_11(%arg0: i32) -> (i32, i32, i32) {
    %c0_i32 = arith.constant 0 : i32
    %c0_i32_0 = arith.constant 0 : i32
    %c0_i32_1 = arith.constant 0 : i32
    %c0_i32_2 = arith.constant 0 : i32
    return %c0_i32, %c0_i32_0, %c0_i32_1 : i32, i32, i32
  }
  func.func @transform_12(%arg0: i32) -> (i32, i32, i32) {
    %c0_i32 = arith.constant 0 : i32
    %c0_i32_0 = arith.constant 0 : i32
    %c0_i32_1 = arith.constant 0 : i32
    %c0_i32_2 = arith.constant 0 : i32
    return %c0_i32, %c0_i32_0, %c0_i32_1 : i32, i32, i32
  }
  func.func @transform_13(%arg0: i32) -> (i32, i32, i32) {
    %c0_i32 = arith.constant 0 : i32
    %c0_i32_0 = arith.constant 0 : i32
    %c0_i32_1 = arith.constant 0 : i32
    %c0_i32_2 = arith.constant 0 : i32
    return %c0_i32, %c0_i32_0, %c0_i32_1 : i32, i32, i32
  }
  func.func @transform_14(%arg0: i32) -> (i32, i32, i32) {
    %c0_i32 = arith.constant 0 : i32
    %c0_i32_0 = arith.constant 0 : i32
    %c0_i32_1 = arith.constant 0 : i32
    %c0_i32_2 = arith.constant 0 : i32
    return %c0_i32, %c0_i32_0, %c0_i32_1 : i32, i32, i32
  }
  func.func @transform_15(%arg0: i32) -> (i32, i32, i32) {
    %c0_i32 = arith.constant 0 : i32
    %c0_i32_0 = arith.constant 0 : i32
    %c0_i32_1 = arith.constant 0 : i32
    %c0_i32_2 = arith.constant 0 : i32
    return %c0_i32, %c0_i32_0, %c0_i32_1 : i32, i32, i32
  }
  func.func @transform_16(%arg0: i32) -> (i32, i32, i32) {
    %c0_i32 = arith.constant 0 : i32
    %c0_i32_0 = arith.constant 0 : i32
    %c0_i32_1 = arith.constant 0 : i32
    %c0_i32_2 = arith.constant 0 : i32
    return %c0_i32, %c0_i32_0, %c0_i32_1 : i32, i32, i32
  }
  func.func @transform_17(%arg0: i32) -> (i32, i32, i32) {
    %c0_i32 = arith.constant 0 : i32
    %c0_i32_0 = arith.constant 0 : i32
    %c0_i32_1 = arith.constant 0 : i32
    %c0_i32_2 = arith.constant 0 : i32
    return %c0_i32, %c0_i32_0, %c0_i32_1 : i32, i32, i32
  }
  func.func @transform_18(%arg0: i32) -> (i32, i32, i32) {
    %c0_i32 = arith.constant 0 : i32
    %c0_i32_0 = arith.constant 0 : i32
    %c0_i32_1 = arith.constant 0 : i32
    %c0_i32_2 = arith.constant 0 : i32
    return %c0_i32, %c0_i32_0, %c0_i32_1 : i32, i32, i32
  }
  func.func @transform_19(%arg0: i32) -> (i32, i32, i32) {
    %c0_i32 = arith.constant 0 : i32
    %c0_i32_0 = arith.constant 0 : i32
    %c0_i32_1 = arith.constant 0 : i32
    %c0_i32_2 = arith.constant 0 : i32
    return %c0_i32, %c0_i32_0, %c0_i32_1 : i32, i32, i32
  }
  func.func @transform_20(%arg0: i32) -> (i32, i32, i32) {
    %c0_i32 = arith.constant 0 : i32
    %c0_i32_0 = arith.constant 0 : i32
    %c0_i32_1 = arith.constant 0 : i32
    %c0_i32_2 = arith.constant 0 : i32
    return %c0_i32, %c0_i32_0, %c0_i32_1 : i32, i32, i32
  }
  func.func @transform_21(%arg0: i32) -> (i32, i32, i32) {
    %c0_i32 = arith.constant 0 : i32
    %c0_i32_0 = arith.constant 0 : i32
    %c0_i32_1 = arith.constant 0 : i32
    %c0_i32_2 = arith.constant 0 : i32
    return %c0_i32, %c0_i32_0, %c0_i32_1 : i32, i32, i32
  }
  func.func @transform_22(%arg0: i32) -> (i32, i32) {
    %c0_i32 = arith.constant 0 : i32
    %c0_i32_0 = arith.constant 0 : i32
    %c0_i32_1 = arith.constant 0 : i32
    return %c0_i32, %c0_i32_0 : i32, i32
  }
  func.func @transform_23(%arg0: i32) -> (i32, i32) {
    %c0_i32 = arith.constant 0 : i32
    %c0_i32_0 = arith.constant 0 : i32
    %c0_i32_1 = arith.constant 0 : i32
    return %c0_i32, %c0_i32_0 : i32, i32
  }
  func.func @transform_24(%arg0: i32) -> (i32, i32, i32) {
    %c0_i32 = arith.constant 0 : i32
    %c0_i32_0 = arith.constant 0 : i32
    %c0_i32_1 = arith.constant 0 : i32
    return %arg0, %c0_i32, %c0_i32_0 : i32, i32, i32
  }
  func.func @transform_25(%arg0: i32) -> (i32, i32, i32, i32, i32) {
    %c0_i32 = arith.constant 0 : i32
    %c0_i32_0 = arith.constant 0 : i32
    %c0_i32_1 = arith.constant 0 : i32
    %c0_i32_2 = arith.constant 0 : i32
    %c0_i32_3 = arith.constant 0 : i32
    return %c0_i32, %arg0, %c0_i32_0, %c0_i32_1, %c0_i32_2 : i32, i32, i32, i32, i32
  }
}

</mosaic_0001>

<bundles_post_ra>
// kernel: crop_type_classifier_forward.1
= control target key start
LH: loop header
LB: loop body
LE: loop exit
PB: predicated region body
PF: predicated region fallthrough
CT: control target
= control target key end

     0   :  { %s5718_s0 = inlined_call_operand.vmem [shape: f32[2,8,4], index: 0, kind: input, shape index: {}]   ;;  %s5719_s1 = inlined_call_operand.vmem [shape: f32[2,8,1], index: 1, kind: input, shape index: {}]   ;;  %s5720_s2 = inlined_call_operand.vmem [shape: f32[2,1,8], index: 2, kind: input, shape index: {}]   ;;  %s5721_s3 = inlined_call_operand.vmem [shape: f32[2,8,128], index: 3, kind: input, shape index: {}]   ;;  %s5722_s4 = inlined_call_operand.vmem [shape: f32[1,4], index: 4, kind: input, shape index: {}]   ;;  %s5723_s5 = inlined_call_operand.vmem [shape: f32[1,4], index: 5, kind: input, shape index: {}]   ;;  %s5724_s6 = inlined_call_operand.vmem [shape: bf16[4,128], index: 6, kind: input, shape index: {}]   ;;  %s5725_s7 = inlined_call_operand.vmem [shape: f32[1,128], index: 7, kind: input, shape index: {}]   ;;  %s5726_s8 = inlined_call_operand.vmem [shape: f32[1,128], index: 8, kind: input, shape index: {}]   ;;  %s5727_s9 = inlined_call_operand.vmem [shape: f32[1,128], index: 9, kind: input, shape index: {}]   ;;  %s5728_s10 = inlined_call_operand.vmem [shape: bf16[2,128,384], index: 10, kind: input, shape index: {}]   ;;  %s5729_s11 = inlined_call_operand.vmem [shape: f32[2,1,384], index: 11, kind: input, shape index: {}]   ;;  %s5730_s12 = inlined_call_operand.vmem [shape: bf16[2,128,128], index: 12, kind: input, shape index: {}]   ;;  %s5731_s13 = inlined_call_operand.vmem [shape: f32[2,1,128], index: 13, kind: input, shape index: {}]   ;;  %s5732_s14 = inlined_call_operand.vmem [shape: f32[2,1,128], index: 14, kind: input, shape index: {}]   ;;  %s5733_s15 = inlined_call_operand.vmem [shape: f32[2,1,128], index: 15, kind: input, shape index: {}]   ;;  %s5734_s16 = inlined_call_operand.vmem [shape: bf16[2,128,256], index: 16, kind: input, shape index: {}]   ;;  %s5735_s17 = inlined_call_operand.vmem [shape: f32[2,1,256], index: 17, kind: input, shape index: {}]   ;;  %s5736_s18 = inlined_call_operand.vmem [shape: bf16[2,256,128], index: 18, kind: input, shape index: {}]   ;;  %s5737_s19 = inlined_call_operand.vmem [shape: f32[2,1,128], index: 19, kind: input, shape index: {}]   ;;  %s5738_s20 = inlined_call_operand.vmem [shape: f32[2,1,128], index: 20, kind: input, shape index: {}]   ;;  %s5739_s21 = inlined_call_operand.vmem [shape: f32[2,1,128], index: 21, kind: input, shape index: {}]   ;;  %s5740_s22 = inlined_call_operand.vmem [shape: bf16[128,128], index: 22, kind: input, shape index: {}]   ;;  %s5741_s23 = inlined_call_operand.vmem [shape: f32[1,128], index: 23, kind: input, shape index: {}]   ;;  %s5742_s24 = inlined_call_operand.hbm [shape: f32[2,1,128], index: 24, kind: output, shape index: {0}]   ;;  %s5743_s25 = inlined_call_operand.vmem [shape: f32[2,2,4,8,8], index: 25, kind: output, shape index: {1}]  }
   0x1   :  { %5753 = sst [smem:[#allocation13_spill]] %s5718_s0 }
   0x2   :  { %5754 = sst [smem:[#allocation14_spill]] %s5719_s1 }
   0x3   :  { %5755 = sst [smem:[#allocation15_spill]] %s5720_s2 }
   0x4   :  { %5756 = sst [smem:[#allocation16_spill]] %s5721_s3 }
   0x5   :  { %5757 = sst [smem:[#allocation17_spill]] %s5722_s4 }
   0x6   :  { %5758 = sst [smem:[#allocation18_spill]] %s5723_s5 }
   0x7   :  { %5759 = sst [smem:[#allocation19_spill]] %s5724_s6 }
   0x8   :  { %5760 = sst [smem:[#allocation20_spill]] %s5725_s7 }
   0x9   :  { %5761 = sst [smem:[#allocation21_spill]] %s5726_s8 }
   0xa   :  { %5762 = sst [smem:[#allocation22_spill]] %s5727_s9 }
   0xb   :  { %5763 = sst [smem:[#allocation23_spill]] %s5728_s10 }
   0xc   :  { %5764 = sst [smem:[#allocation24_spill]] %s5742_s24 }
   0xd   :  { %5765 = sst [smem:[#allocation25_spill]] %s5743_s25 }
   0xe   :  { %31 = vsyncpa [#allocation4], 0 }
   0xf   :  { %33 = vsyncpa [#allocation4 + $0x1], 0  ;;  %s4837_s29 = smov 0   ;;  %s4839_s2 = smov 0  }
  0x10   :  { %s4841_s6 = smov 0   ;;  %s4843_s30 = smov 0  }
  0x11 LB: > { %5766 = sst [smem:[#allocation7_spill]] %s4686_s29  ;;  %s4858_s7 = sadd.s32 4294967295, %s4698_s30   ;;  %s4698_s30 = sphi %s4843_s30, %s5792_s30   ;;  %s4694_s6 = sphi %s4841_s6, %s5797_s6   ;;  %s4690_s2 = sphi %s4839_s2, %s5796_s2   ;;  %s4686_s29 = sphi %s4837_s29, %s5795_s29  }
  0x12   : > { %5767 = sst [smem:[#allocation8_spill]] %s4694_s6  ;;  %s3752_s3 = sadd.s32 4294967294, %s4698_s30  }
  0x13   : > { %5768 = sst [smem:[#allocation9_spill]] %s4698_s30  ;;  %s4862_s26 = sadd.s32 1, %s4698_s30  }
  0x14   : > { %5769 = sst [smem:[#allocation10_spill]] %s4862_s26  ;;  %s570_s1 = sadd.s32 1, %s4694_s6 }
  0x15   : > { %s567_s8 = ssub.s32 %s4698_s30, %s4862_s26  ;;  %p580_p0 = scmp.ne.s32.totalorder %s4694_s6, %s4690_s2 }
  0x16   : > { %p568_p1 = scmp.eq.s32.totalorder %s567_s8, 0  ;;  %p581_p2 = scmp.eq.s32.totalorder %s4858_s7, 1 }
  0x17   : > { %p586_p3 = scmp.ne.s32.totalorder %s4690_s2, %s4686_s29  ;;  %p587_p4 = scmp.eq.s32.totalorder %s3752_s3, 1 }
  0x18   : > { %s4873_s27 = scalar_select %p568_p1, %s4694_s6, %s570_s1  }
  0x19   : > { %p4875_p5 = por %p581_p2, %p580_p0  ;;  %p4879_p6 = por %p587_p4, %p586_p3 }
  0x1a   : > { %5770 = sst [smem:[#allocation11_spill]] %s4873_s27  ;;  %p3755_p7 = scmp.ge.s32.totalorder %s4698_s30, 1 }
  0x1b   : > { %s5772_s28 = scalar_select %p4879_p6, 1, 0 }
  0x1c   : > { %p718_p8 = scmp.lt.s32.totalorder %s4698_s30, 3 }
  0x1d   : > { %5773 = sst [smem:[#allocation12_spill]] %s5772_s28 }
  0x1e   : > { %p719_p9 = pnand %p3755_p7, %p718_p8 }
  0x1f   : > { %p799_p10 = scmp.lt.s32.totalorder (!%p719_p9), %s4858_s7, 1  ;;  %vm821_vm0 = vcmask (!%p719_p9), 31744   ;;  %s5774_s1 = sld [smem:[#allocation13_spill]] (!%p719_p9)  ;;  %vm862_vm1 = vcmask (!%p719_p9), 1041408   ;;  %v4700_v8 = vmov (!%p719_p9), 0.0   ;;  %vm4701_vm2 = vmmov (!%p719_p9), 0  }
  0x20   : > { %722 = sbr.rel (%p719_p9) target bundleno = 6906 (0x1afa), region = 116  ;;  %s5775_s26 = sld [smem:[#allocation19_spill]] (!%p719_p9)  ;;  %4172 = vmatprep.subr.bf16.mxu0 (!%p719_p9), %v4700_v8  ;;  %4174 = vmatprep.mubr.msk.bf16.mxu0 (!%p719_p9), %vm4701_vm2, %v4700_v8  ;;  %v4702_v28 = vmov (!%p719_p9), 0   ;;  %vm1275_vm3 = vcmask (!%p719_p9), 1043456   ;;  %vm1203_vm4 = vcmask (!%p719_p9), 261120   ;;  %vm1258_vm5 = vcmask (!%p719_p9), 64512  }
  0x21   : > { %s5778_s29 = sld [smem:[#allocation20_spill]] (!%p719_p9)  ;;  %s5780_s10 = sld [smem:[#allocation23_spill]] (!%p719_p9)  ;;  %4419 = vset.pattern.permute.xlu0 (!%p719_p9), %v4702_v28  ;;  %1151 = vmatprep.mubr.bf16.mxu1 (!%p719_p9), %v4702_v28  ;;  %vm1441_vm6 = vcmask (!%p719_p9), 523520   ;;  %vm1561_vm7 = vcmask (!%p719_p9), 785920   ;;  %vm1681_vm8 = vcmask (!%p719_p9), 1048320   ;;  %vm3538_vm9 = vcmask (!%p719_p9), 1040384  }
  0x22   : > { %s5783_s25 = sld [smem:[#allocation16_spill]] (!%p719_p9)  ;;  %s4703_s0 = smov (!%p719_p9), 96  }
  0x23   : > { %s4704_s6 = smov (!%p719_p9), 64   ;;  %s4706_s24 = smov (!%p719_p9), [#allocation3]  }
  0x26   : > { %v851_v7 = vld [vmem:[%s5775_s26] sm:$0x3] (!%p719_p9)  ;;  %s5776_s26 = sld [smem:[#allocation17_spill]] (!%p719_p9) }
  0x27   : > { %s4887_s9 = scalar_select %p799_p10, %s4858_s7, 1  ;;  %v864_v9 = vsel %vm862_vm1, %v851_v7, 0  ;;  %v3762_v20 = vld [vmem:[%s5778_s29] ss:$0 sm:$0xff]  ;;  %v4420_v26 = vld [vmem:[%s5780_s10 + $0x4] ss:$12 sps:$4 sm:$0xff]  }
  0x28   : > { %4173 = vmatpush3.bf16.msra.mxu0 %v864_v9  ;;  %v4422_v27 = vld [vmem:[%s5780_s10] ss:$12 sps:$4 sm:$0xff]   ;;  %v4423_v30 = vld [vmem:[%s5780_s10 + $0x8] ss:$12 sps:$4 sm:$0xff]   ;;  %1119 = vmatprep.subr.bf16.mxu1 %v4420_v26  ;;  %v4426_v36 = vld [vmem:[%s5780_s10 + $0x18] ss:$12 sps:$4 sm:$0xff]  }
  0x29   : > { %s4890_s5 = sshll.u32 %s4887_s9, 3  ;;  %4178 = vmatprep.subr.bf16.mxu0 %v4700_v8  ;;  %v4424_v31 = vld [vmem:[%s5780_s10 + $0x1c] ss:$12 sps:$4 sm:$0xff]   ;;  %1120 = vmatpush1.bf16.msra.mxu1 %v4422_v27  ;;  %v4427_v37 = vld [vmem:[%s5780_s10 + $0x20] ss:$12 sps:$4 sm:$0xff]   ;;  %s5782_s29 = sld [smem:[#allocation22_spill]] }
  0x2a   : > { %s802_s8 = scalar_lea.vmem %s5774_s1, %s4890_s5  ;;  %s5777_s1 = sld [smem:[#allocation18_spill]]  ;;  %1121 = vmatprep.subr.bf16.mxu1 %v4424_v31  ;;  %v4428_v38 = vld [vmem:[%s5780_s10 + $0x34] ss:$12 sps:$4 sm:$0xff]   ;;  %v4430_v39 = vld [vmem:[%s5780_s10 + $0x30] ss:$12 sps:$4 sm:$0xff]  }
  0x2b   : > { %v815_v0 = vld [vmem:[%s802_s8] sm:$0xff]  ;;  %v4432_v41 = vld [vmem:[%s5780_s10 + $0x4c] ss:$12 sps:$4 sm:$0xff]   ;;  %v4434_v42 = vld [vmem:[%s5780_s10 + $0x48] ss:$12 sps:$4 sm:$0xff]   ;;  %s813_s30 = scalar_lea.vmem %s5783_s25, %s4890_s5 }
  0x2c   : > { %v822_v1 = vsel %vm821_vm0, %v815_v0, 0.0  ;;  %v3760_v14 = vld [vmem:[%s5776_s26] ss:$0 sm:$0xff]  ;;  %s5779_s26 = sld [smem:[#allocation14_spill]]  ;;  %v4431_v40 = vld [vmem:[%s5780_s10 + $0x38] ss:$12 sps:$4 sm:$0xff]  }
  0x2d   : > { %823 = vadd.xlane.f32.xlu0 %v822_v1  ;;  %1122 = vmatpush1.bf16.msra.mxu1 %v4426_v36  ;;  %v4435_v43 = vld [vmem:[%s5780_s10 + $0x50] ss:$12 sps:$4 sm:$0xff]   ;;  %v4438_v45 = vld [vmem:[%s5780_s10 + $0x60] ss:$12 sps:$4 sm:$0xff]   ;;  %v4439_v46 = vld [vmem:[%s5780_s10 + $0x68] ss:$12 sps:$4 sm:$0xff]  }
  0x2e   : > { %1123 = vmatprep.subr.bf16.mxu1 %v4428_v38  ;;  %v4436_v44 = vld [vmem:[%s5780_s10 + $0x64] ss:$12 sps:$4 sm:$0xff]   ;;  %v4440_v47 = vld [vmem:[%s5780_s10 + $0x7c] ss:$12 sps:$4 sm:$0xff]   ;;  %v4443_v49 = vld [vmem:[%s5780_s10 + $0x80] ss:$12 sps:$4 sm:$0xff]  }
  0x2f   : > { %v4442_v48 = vld [vmem:[%s5780_s10 + $0x78] ss:$12 sps:$4 sm:$0xff]   ;;  %v4444_v50 = vld [vmem:[%s5780_s10 + $0x94] ss:$12 sps:$4 sm:$0xff]   ;;  %v4446_v51 = vld [vmem:[%s5780_s10 + $0x90] ss:$12 sps:$4 sm:$0xff]  }
  0x30   : > { %v3761_v16 = vld [vmem:[%s5777_s1] ss:$0 sm:$0xff]  ;;  %v4447_v52 = vld [vmem:[%s5780_s10 + $0x98] ss:$12 sps:$4 sm:$0xff]   ;;  %v4450_v54 = vld [vmem:[%s5780_s10 + $0xa8] ss:$12 sps:$4 sm:$0xff]  }
  0x31   : > { %1124 = vmatpush1.bf16.msra.mxu1 %v4430_v39  ;;  %v4448_v53 = vld [vmem:[%s5780_s10 + $0xac] ss:$12 sps:$4 sm:$0xff]   ;;  %v4451_v55 = vld [vmem:[%s5780_s10 + $0xb0] ss:$12 sps:$4 sm:$0xff]   ;;  %v3765_v62 = vld [vmem:[%s5782_s29] ss:$0 sm:$0xff] }
  0x32   : > { %s806_s27 = scalar_lea.vmem %s5779_s26, %s4890_s5  ;;  %1125 = vmatprep.subr.bf16.mxu1 %v4432_v41  ;;  %s5751_s26 = smov 32  }
  0x33   : > { %v816_v29 = vld [vmem:[%s806_s27] sm:$0xff]  ;;  %s5781_s27 = sld [smem:[#allocation21_spill]]  ;;  %s5784_s1 = sld [smem:[#allocation15_spill]] }
  0x35   : > { %1126 = vmatpush1.bf16.msra.mxu1 %v4434_v42 }
  0x36   : > { %1127 = vmatprep.subr.bf16.mxu1 %v4436_v44 }
  0x39   : > { %1128 = vmatpush1.bf16.msra.mxu1 %v4438_v45  ;;  %v3764_v60 = vld [vmem:[%s5781_s27] ss:$0 sm:$0xff]  ;;  %s809_s29 = scalar_lea.vmem %s5784_s1, %s4887_s9  ;;  %s5095_s9 = sand.u32 1, %s4690_s2  }
  0x3a   : > { %1129 = vmatprep.subr.bf16.mxu1 %v4440_v47  ;;  %v5076_v42 = vld [vmem:[%s809_s29] ss:$0 sm:$0xff]  ;;  %s3756_s28 = sshll.u32 %s5095_s9, 6  ;;  %s5786_s29 = sld [smem:[#allocation24_spill]] }
  0x3b   : > { %s5100_s8 = scalar_lea.vmem [#allocation5], %s3756_s28  ;;  %s4640_s27 = sshll.u32 %s4706_s24, 4  ;;  %s4641_s27 = int_to_ptr.vmem [resolvable:$false] %s4640_s27 }
  0x3d   : > { %1130 = vmatpush1.bf16.msra.mxu1 %v4442_v48 }
  0x3e   : > { %1131 = vmatprep.subr.bf16.mxu1 %v4444_v50 }
  0x40   : > { %s5787_s28 = smov %s5786_s29 }
  0x41   : > { %1132 = vmatpush1.bf16.msra.mxu1 %v4446_v51 }
  0x42   : > { %1133 = vmatprep.subr.bf16.mxu1 %v4448_v53 }
  0x45   : > { %1134 = vmatpush1.bf16.msra.mxu1 %v4450_v54 }
  0x46   : > { %4198 = vmatprep.subr.bf16.mxu1 %v4700_v8 }
  0xba   : > { %v824_v2 = vpop.xlane.xlu0 %823 }
  0xbb   : > { %v826_v3 = vmul.f32 0.25, %v824_v2  ;;  %v818_v2 = vld [vmem:[%s813_s30] sm:$0xff]  ;;  %s3554_s30 = scalar_lea.sflag [#allocation4], %s5095_s9 }
  0xbd   : > { %v827_v4 = vsub.f32 %v815_v0, %v826_v3 }
  0xbf   : > { %v828_v5 = vmul.f32 %v827_v4, %v827_v4 }
  0xc1   : > { %v829_v6 = vsel %vm821_vm0, %v828_v5, 0.0 }
  0xc2   : > { %830 = vadd.xlane.f32.xlu0 %v829_v6  ;;  %v976_v6 = vlaneseq }
  0xc4   : > { %v5025_v7 = vshrl.u32 %v976_v6, 7 }
  0xc6   : > { %v986_v9 = vsub.s32 2, %v5025_v7 }
  0xd8   : > { %936 = vperm.xlu0 %4419, %v816_v29  }
 0x14f   : > { %v831_v10 = vpop.xlane.xlu0 %830 }
 0x150   : > { %v832_v11 = vmul.f32 0.25, %v831_v10  ;;  %v974_v10 = vld [vmem:[%s5729_s11] sm:$0x7] }
 0x152   : > { %v833_v12 = vadd.f32 1e-05, %v832_v11  ;;  %v5032_v11 = vsub.s32 1, %v5025_v7 }
 0x154   : > { %4588 = vrsqrt.f32 %v833_v12  ;;  %v5035_v12 = vsub.s32 0, %v5025_v7 }
 0x157   : > { %v5014_v0 = vpop.permute.xlu0 %936 }
 0x15e   : > { %v4589_v13 = vpop.eup %4588 }
 0x15f   : > { %v835_v15 = vmul.f32 %v4589_v13, %v827_v4  ;;  %v987_v13 = vrot.slane %v974_v10, %v986_v9 }
 0x161   : > { %v842_v17 = vmul.f32 %v3760_v14, %v835_v15  ;;  %v983_v14 = vrot.slane %v974_v10, %v5032_v11  ;;  %v979_v15 = vrot.slane %v974_v10, %v5035_v12 }
 0x163   : > { %v849_v18 = vadd.f32 %v3761_v16, %v842_v17 }
 0x165   : > { %v850_v19 = vpack.c.bf16 %v849_v18, %v849_v18 }
 0x167   : > { %4175 = vmatmul.mubr.msk.bf16.vlgmr.msra.gmra.mrb[0].mxu0 %vm821_vm0, %v850_v19 }
 0x168   : > { %4194 = vmatprep.mubr.msk.bf16.mxu0 %vm4701_vm2, %v4700_v8  ;;  %4179 = vmatpush3.bf16.msra.mxu0 %v4423_v30 }
 0x169   : > { %4180 = vmatprep.subr.bf16.mxu0 %v4700_v8 }
 0x16c   : > { %4181 = vmatpush3.bf16.msra.mxu0 %v4427_v37 }
 0x16d   : > { %4182 = vmatprep.subr.bf16.mxu0 %v4700_v8 }
 0x170   : > { %4183 = vmatpush3.bf16.msra.mxu0 %v4431_v40 }
 0x171   : > { %4184 = vmatprep.subr.bf16.mxu0 %v4700_v8 }
 0x174   : > { %4185 = vmatpush3.bf16.msra.mxu0 %v4435_v43 }
 0x175   : > { %4186 = vmatprep.subr.bf16.mxu0 %v4700_v8 }
 0x178   : > { %4187 = vmatpush3.bf16.msra.mxu0 %v4439_v46 }
 0x179   : > { %4188 = vmatprep.subr.bf16.mxu0 %v4700_v8 }
 0x17c   : > { %4189 = vmatpush3.bf16.msra.mxu0 %v4443_v49 }
 0x17d   : > { %4190 = vmatprep.subr.bf16.mxu0 %v4700_v8 }
 0x180   : > { %4191 = vmatpush3.bf16.msra.mxu0 %v4447_v52 }
 0x181   : > { %4192 = vmatprep.subr.bf16.mxu0 %v4700_v8 }
 0x184   : > { %4193 = vmatpush3.bf16.msra.mxu0 %v4451_v55 }
 0x185   : > { %4204 = vmatprep.subr.bf16.mxu0 %v4700_v8 }
 0x23a   : > { %v900_v21 = vpop.f32.mrb[0].mxu0 }
 0x23b   : > { %v901_v22 = vadd.f32 %v3762_v20, %v900_v21  ;;  %v4176_v23 = vpop.f32.mrb[1].mxu0 }
 0x23c   : > { %v903_v24 = vpop.f32.mrb[2].mxu0 }
 0x23d   : > { %908 = vadd.xlane.f32.xlu1 %v901_v22  ;;  %v4177_v25 = vpop.f32.mrb[3].mxu0 }
 0x2ca   : > { %v909_v32 = vpop.xlane.xlu1 %908 }
 0x2cb   : > { %v911_v33 = vmul.f32 0.0078125, %v909_v32 }
 0x2cd   : > { %v912_v34 = vsub.f32 %v901_v22, %v911_v33 }
 0x2cf   : > { %v913_v35 = vmul.f32 %v912_v34, %v912_v34 }
 0x2d1   : > { %914 = vadd.xlane.f32.xlu1 %v913_v35 }
 0x35e   : > { %v915_v56 = vpop.xlane.xlu1 %914 }
 0x35f   : > { %v916_v57 = vmul.f32 0.0078125, %v915_v56 }
 0x361   : > { %v917_v58 = vadd.f32 1e-05, %v916_v57 }
 0x363   : > { %4590 = vrsqrt.f32 %v917_v58 }
 0x36d   : > { %v4591_v59 = vpop.eup %4590 }
 0x36e   : > { %v919_v61 = vmul.f32 %v4591_v59, %v912_v34 }
 0x370   : > { %v926_v63 = vmul.f32 %v3764_v60, %v919_v61 }
 0x372   : > { %v933_v1 = vadd.f32 %v3765_v62, %v926_v63 }
 0x374   : > { %v939_v3 = vmul.f32 %v5014_v0, %v933_v1 }
 0x376   : > { %v5017_v4 = vadd.f32 %v939_v3, %v818_v2 }
 0x378   : > { %v941_v5 = vpack.c.bf16 %v5017_v4, %v5017_v4 }
 0x37a   : > { %1152 = vmatmul.mubr.bf16.vlgmr.msra.gmra.mrb[0].mxu1 %v941_v5  ;;  %4195 = vmatmul.mubr.bf16.vlgmr.msra.gmra.mrb[4].mxu0 %v941_v5 }
 0x37b   : > { %4200 = vmatprep.mubr.msk.bf16.mxu1 %vm4701_vm2, %v4700_v8  ;;  %4206 = vmatprep.mubr.msk.bf16.mxu0 %vm4701_vm2, %v4700_v8 }
 0x44d   : > { %v1153_v16 = vpop.f32.mrb[0].mxu1  ;;  %v1194_v17 = vpop.f32.mrb[4].mxu0 }
 0x44e   : > { %v1195_v18 = vadd.f32 %v1194_v17, %v987_v13  ;;  %v1155_v19 = vpop.f32.mrb[1].mxu1  ;;  %v4196_v20 = vpop.f32.mrb[5].mxu0  ;;  %v1154_v27 = vadd.f32 %v1153_v16, %v979_v15 }
 0x44f   : > { %v1156_v21 = vadd.f32 %v1155_v19, %v983_v14  ;;  %v1157_v22 = vpop.f32.mrb[2].mxu1  ;;  %v1197_v23 = vpop.f32.mrb[6].mxu0 }
 0x450   : > { %v5041_v24 = vpack.c.bf16 %v1195_v18, %v1195_v18  ;;  %v1158_v25 = vpop.f32.mrb[3].mxu1  ;;  %v4197_v26 = vpop.f32.mrb[7].mxu0  ;;  %v1200_v32 = vpack.c.bf16 %v1154_v27, %v1154_v27 }
 0x451   : > { %v1201_v29 = vpack.c.bf16 %v1156_v21, %v1156_v21 }
 0x452   : > { %v1277_v30 = vsel %vm1275_vm3, %v5041_v24, 0 }
 0x453   : > { %4205 = vmatpush3.bf16.msra.mxu0 %v1277_v30  ;;  %1324 = vrot.lane.b32.xlu1 %v1201_v29, %s4703_s0  ;;  %v1208_v31 = vsel %vm1203_vm4, %v1201_v29, 0 }
 0x454   : > { %4199 = vmatpush3.bf16.xpose.msra.mxu1 %v1208_v31  ;;  %4216 = vmatprep.subr.bf16.mxu0 %v4700_v8 }
 0x455   : > { %4210 = vmatprep.subr.bf16.mxu1 %v4700_v8 }
 0x457   : > { %1321 = vrot.lane.b32.xlu1 %v1200_v32, %s4703_s0 }
 0x45b   : > { %1445 = vrot.lane.b32.xlu1 %v1201_v29, %s4704_s6  ;;  %4201 = vmatmul.mubr.msk.bf16.vlgmr.msra.gmra.mrb[4].mxu1 %vm1203_vm4, %v1200_v32 }
 0x45c   : > { %4212 = vmatprep.mubr.msk.bf16.mxu1 %vm4701_vm2, %v4700_v8 }
 0x45f   : > { %1443 = vrot.lane.b32.xlu1 %v1200_v32, %s4704_s6 }
 0x463   : > { %1565 = vrot.lane.b32.xlu1 %v1201_v29, %s5751_s26 }
 0x467   : > { %1563 = vrot.lane.b32.xlu1 %v1200_v32, %s5751_s26 }
 0x4c5   : > { %v1325_v33 = vpop.permute.xlu1 %1324 }
 0x4c6   : > { %v1330_v34 = vsel %vm1203_vm4, %v1325_v33, 0 }
 0x4c7   : > { %4211 = vmatpush3.bf16.xpose.msra.mxu1 %v1330_v34 }
 0x4c8   : > { %4222 = vmatprep.subr.bf16.mxu1 %v4700_v8 }
 0x4c9   : > { %v1322_v35 = vpop.permute.xlu1 %1321 }
 0x4cd   : > { %v1446_v36 = vpop.permute.xlu1 %1445 }
 0x4ce   : > { %v1451_v37 = vsel %vm1203_vm4, %v1446_v36, 0  ;;  %4213 = vmatmul.mubr.msk.bf16.vlgmr.msra.gmra.mrb[8].mxu1 %vm1203_vm4, %v1322_v35 }
 0x4cf   : > { %4223 = vmatpush3.bf16.xpose.msra.mxu1 %v1451_v37  ;;  %4224 = vmatprep.mubr.msk.bf16.mxu1 %vm4701_vm2, %v4700_v8 }
 0x4d0   : > { %4234 = vmatprep.subr.bf16.mxu1 %v4700_v8 }
 0x4d1   : > { %v1444_v38 = vpop.permute.xlu1 %1443 }
 0x4d5   : > { %v1566_v39 = vpop.permute.xlu1 %1565 }
 0x4d6   : > { %v1571_v40 = vsel %vm1203_vm4, %v1566_v39, 0  ;;  %4225 = vmatmul.mubr.msk.bf16.vlgmr.msra.gmra.mrb[12].mxu1 %vm1203_vm4, %v1444_v38 }
 0x4d7   : > { %4235 = vmatpush3.bf16.xpose.msra.mxu1 %v1571_v40  ;;  %4236 = vmatprep.mubr.msk.bf16.mxu1 %vm4701_vm2, %v4700_v8 }
 0x4d8   : > { %4246 = vmatprep.subr.bf16.mxu1 %v4700_v8 }
 0x4d9   : > { %v1564_v41 = vpop.permute.xlu1 %1563 }
 0x4de   : > { %4237 = vmatmul.mubr.msk.bf16.vlgmr.msra.gmra.mrb[16].mxu1 %vm1203_vm4, %v1564_v41 }
 0x4df   : > { %4262 = vmatprep.mubr.msk.bf16.mxu1 %vm4701_vm2, %v4700_v8 }
 0x52e   : > { %v1244_v43 = vpop.f32.mrb[4].mxu1 }
 0x52f   : > { %v1250_v44 = vmul.f32 0.17677669, %v1244_v43  ;;  %v4202_v45 = vpop.f32.mrb[5].mxu1 }
 0x530   : > { %v1247_v46 = vpop.f32.mrb[6].mxu1 }
 0x531   : > { %v4203_v47 = vpop.f32.mrb[7].mxu1  ;;  %v1257_v48 = vadd.f32 %v5076_v42, %v1250_v44 }
 0x533   : > { %v1259_v49 = vsel %vm1258_vm5, %v1257_v48, -inf }
 0x534   : > { %1260 = vmax.xlane.f32.xlu1 %v1259_v49 }
 0x5a1   : > { %v1366_v50 = vpop.f32.mrb[8].mxu1 }
 0x5a2   : > { %v1372_v51 = vmul.f32 0.17677669, %v1366_v50  ;;  %v4214_v52 = vpop.f32.mrb[9].mxu1 }
 0x5a3   : > { %v1369_v53 = vpop.f32.mrb[10].mxu1 }
 0x5a4   : > { %v4215_v54 = vpop.f32.mrb[11].mxu1  ;;  %v1373_v55 = vadd.f32 %v5076_v42, %v1372_v51 }
 0x5a6   : > { %v1374_v56 = vsel %vm1258_vm5, %v1373_v55, -inf }
 0x5a7   : > { %1375 = vmax.xlane.f32.xlu0 %v1374_v56 }
 0x5a9   : > { %v1487_v57 = vpop.f32.mrb[12].mxu1 }
 0x5aa   : > { %v1493_v58 = vmul.f32 0.17677669, %v1487_v57  ;;  %v4226_v59 = vpop.f32.mrb[13].mxu1 }
 0x5ab   : > { %v1490_v60 = vpop.f32.mrb[14].mxu1 }
 0x5ac   : > { %v4227_v61 = vpop.f32.mrb[15].mxu1  ;;  %v1494_v62 = vadd.f32 %v5076_v42, %v1493_v58 }
 0x5ae   : > { %v1495_v63 = vsel %vm1258_vm5, %v1494_v62, -inf }
 0x5af   : > { %1496 = vmax.xlane.f32.xlu1 %v1495_v63  ;;  %v4453_v63 = vld [vmem:[%s5730_s12 + $0x8] sm:$0xff]  }
 0x5b1   : > { %v1607_v1 = vpop.f32.mrb[16].mxu1 }
 0x5b2   : > { %v1613_v2 = vmul.f32 0.17677669, %v1607_v1  ;;  %v4238_v3 = vpop.f32.mrb[17].mxu1  ;;  %v4454_v1 = vld [vmem:[%s5730_s12 + $0x10] sm:$0xff]  }
 0x5b3   : > { %v1610_v5 = vpop.f32.mrb[18].mxu1  ;;  %v4456_v3 = vld [vmem:[%s5730_s12 + $0x20] sm:$0xff]  }
 0x5b4   : > { %v4239_v6 = vpop.f32.mrb[19].mxu1  ;;  %v1614_v10 = vadd.f32 %v5076_v42, %v1613_v2  ;;  %v4455_v2 = vld [vmem:[%s5730_s12 + $0x18] sm:$0xff]  }
 0x5b6   : > { %v1615_v13 = vsel %vm1258_vm5, %v1614_v10, -inf }
 0x5b7   : > { %1616 = vmax.xlane.f32.xlu0 %v1615_v13 }
 0x5c1   : > { %v1261_v14 = vpop.xlane.xlu1 %1260 }
 0x5c2   : > { %v1262_v15 = vsub.f32 %v1257_v48, %v1261_v14 }
 0x5c4   : > { %v1263_v16 = vmul.f32 1.442695, %v1262_v15  ;;  %v4458_v15 = vld [vmem:[%s5730_s12 + $0x30] sm:$0xff]  }
 0x5c6   : > { %4592 = vpow2.f32 %v1263_v16 }
 0x5d0   : > { %v4593_v17 = vpop.eup %4592 }
 0x5d1   : > { %v1265_v18 = vsel %vm1258_vm5, %v4593_v17, 0.0 }
 0x5d2   : > { %1266 = vadd.xlane.f32.xlu1 %v1265_v18 }
 0x5e3   : > { %1389 = vrot.lane.b32.xlu1 %v5041_v24, %s4703_s0 }
 0x634   : > { %v1376_v19 = vpop.xlane.xlu0 %1375 }
 0x635   : > { %v1377_v20 = vsub.f32 %v1373_v55, %v1376_v19 }
 0x637   : > { %v1378_v21 = vmul.f32 1.442695, %v1377_v20 }
 0x639   : > { %4594 = vpow2.f32 %v1378_v21 }
 0x63c   : > { %v1497_v22 = vpop.xlane.xlu1 %1496 }
 0x63d   : > { %v1498_v23 = vsub.f32 %v1494_v62, %v1497_v22  ;;  %v4452_v62 = vld [vmem:[%s5730_s12] sm:$0xff]  }
 0x63e   : > { %4247 = vmatpush3.bf16.msra.mxu1 %v4452_v62  ;;  %v4488_v62 = vld [vmem:[%s5736_s18 + $0x50] sm:$0xff]  }
 0x63f   : > { %v1499_v25 = vmul.f32 1.442695, %v1498_v23  ;;  %4248 = vmatprep.subr.bf16.mxu1 %v4700_v8 }
 0x641   : > { %4596 = vpow2.f32 %v1499_v25 }
 0x642   : > { %4249 = vmatpush3.bf16.msra.mxu1 %v4453_v63  ;;  %v4489_v63 = vld [vmem:[%s5736_s18 + $0x10] sm:$0xff]  }
 0x643   : > { %v4595_v26 = vpop.eup %4594  ;;  %4250 = vmatprep.subr.bf16.mxu1 %v4700_v8 }
 0x644   : > { %v1617_v27 = vpop.xlane.xlu0 %1616  ;;  %v1380_v29 = vsel %vm1258_vm5, %v4595_v26, 0.0 }
 0x645   : > { %v1618_v30 = vsub.f32 %v1614_v10, %v1617_v27  ;;  %1381 = vadd.xlane.f32.xlu0 %v1380_v29  ;;  %v4457_v10 = vld [vmem:[%s5730_s12 + $0x28] sm:$0xff]  }
 0x646   : > { %4251 = vmatpush3.bf16.msra.mxu1 %v4454_v1  ;;  %v4490_v1 = vld [vmem:[%s5736_s18 + $0x58] sm:$0xff]  }
 0x647   : > { %v1619_v31 = vmul.f32 1.442695, %v1618_v30  ;;  %4252 = vmatprep.subr.bf16.mxu1 %v4700_v8 }
 0x649   : > { %4598 = vpow2.f32 %v1619_v31 }
 0x64a   : > { %4253 = vmatpush3.bf16.msra.mxu1 %v4455_v2  ;;  %v4491_v2 = vld [vmem:[%s5736_s18 + $0x18] sm:$0xff]  }
 0x64b   : > { %v4597_v32 = vpop.eup %4596  ;;  %4254 = vmatprep.subr.bf16.mxu1 %v4700_v8 }
 0x64c   : > { %v1501_v33 = vsel %vm1258_vm5, %v4597_v32, 0.0 }
 0x64d   : > { %1502 = vadd.xlane.f32.xlu1 %v1501_v33 }
 0x64e   : > { %4255 = vmatpush3.bf16.msra.mxu1 %v4456_v3  ;;  %v4492_v3 = vld [vmem:[%s5736_s18 + $0x60] sm:$0xff]  }
 0x64f   : > { %4256 = vmatprep.subr.bf16.mxu1 %v4700_v8 }
 0x652   : > { %4257 = vmatpush3.bf16.msra.mxu1 %v4457_v10  ;;  %v4495_v10 = vld [vmem:[%s5736_s18 + $0x28] sm:$0xff]  }
 0x653   : > { %v4599_v34 = vpop.eup %4598  ;;  %4258 = vmatprep.subr.bf16.mxu1 %v4700_v8 }
 0x654   : > { %v1621_v35 = vsel %vm1258_vm5, %v4599_v34, 0.0 }
 0x655   : > { %1622 = vadd.xlane.f32.xlu0 %v1621_v35 }
 0x656   : > { %4259 = vmatpush3.bf16.msra.mxu1 %v4458_v15 }
 0x657   : > { %4260 = vmatprep.subr.bf16.mxu1 %v4700_v8 }
 0x65e   : > { %1629 = vrot.lane.b32.xlu1 %v5041_v24, %s5751_s26 }
 0x65f   : > { %v1267_v36 = vpop.xlane.xlu1 %1266 }
 0x660   : > { %4600 = vrcp.f32 %v1267_v36 }
 0x663   : > { %v1390_v39 = vpop.permute.xlu1 %1389 }
 0x664   : > { %v1395_v41 = vsel %vm1275_vm3, %v1390_v39, 0  ;;  %v4460_v39 = vld [vmem:[%s5734_s16] ss:$8 sps:$4 sm:$0xff]  }
 0x66a   : > { %v4601_v37 = vpop.eup %4600 }
 0x66b   : > { %v1269_v38 = vmul.f32 %v4601_v37, %v4593_v17  ;;  %1509 = vrot.lane.b32.xlu0 %v5041_v24, %s4704_s6  ;;  %v4459_v17 = vld [vmem:[%s5730_s12 + $0x38] sm:$0xff]  }
 0x66c   : > { %4261 = vmatpush3.bf16.msra.mxu1 %v4459_v17  ;;  %v3811_v17 = vld [vmem:[%s5732_s14] ss:$0 sm:$0xff] }
 0x66d   : > { %v1271_v40 = vpack.c.bf16 %v1269_v38, %v1269_v38  ;;  %1270 = vst.msk [vmem:[%s5100_s8] sm:$0xff] %vm1258_vm5, %v1269_v38 }
 0x66f   : > { %4207 = vmatmul.mubr.msk.bf16.vlgmr.msra.gmra.mrb[8].mxu0 %vm1258_vm5, %v1271_v40  ;;  %v4462_v40 = vld [vmem:[%s5734_s16 + $0x4] ss:$8 sps:$4 sm:$0xff]  }
 0x670   : > { %4217 = vmatpush3.bf16.msra.mxu0 %v1395_v41  ;;  %4218 = vmatprep.mubr.msk.bf16.mxu0 %vm4701_vm2, %v4700_v8  ;;  %v4465_v41 = vld [vmem:[%s5734_s16 + $0x14] ss:$8 sps:$4 sm:$0xff]  }
 0x671   : > { %4228 = vmatprep.subr.bf16.mxu0 %v4700_v8 }
 0x6d2   : > { %v1382_v43 = vpop.xlane.xlu0 %1381 }
 0x6d3   : > { %4602 = vrcp.f32 %v1382_v43  ;;  %v4463_v43 = vld [vmem:[%s5734_s16 + $0x10] ss:$8 sps:$4 sm:$0xff]  }
 0x6da   : > { %v1503_v24 = vpop.xlane.xlu1 %1502 }
 0x6db   : > { %4604 = vrcp.f32 %v1503_v24 }
 0x6dd   : > { %v4603_v44 = vpop.eup %4602 }
 0x6de   : > { %v1384_v45 = vmul.f32 %v4603_v44, %v4595_v26  ;;  %v1630_v52 = vpop.permute.xlu1 %1629 }
 0x6df   : > { %v1635_v54 = vsel %vm1275_vm3, %v1630_v52, 0  ;;  %v4477_v52 = vld [vmem:[%s5734_s16 + $0x54] ss:$8 sps:$4 sm:$0xff]  }
 0x6e0   : > { %v1387_v46 = vpack.c.bf16 %v1384_v45, %v1384_v45  ;;  %3794 = vst.msk [vmem:[%s5100_s8 + $0x8] sm:$0xff] %vm1258_vm5, %v1384_v45 }
 0x6e2   : > { %4219 = vmatmul.mubr.msk.bf16.vlgmr.msra.gmra.mrb[12].mxu0 %vm1258_vm5, %v1387_v46  ;;  %v1623_v47 = vpop.xlane.xlu0 %1622  ;;  %v4468_v46 = vld [vmem:[%s5734_s16 + $0x24] ss:$8 sps:$4 sm:$0xff]  }
 0x6e3   : > { %4606 = vrcp.f32 %v1623_v47  ;;  %4230 = vmatprep.mubr.msk.bf16.mxu0 %vm4701_vm2, %v4700_v8  ;;  %v4466_v47 = vld [vmem:[%s5734_s16 + $0x20] ss:$8 sps:$4 sm:$0xff]  }
 0x6e5   : > { %v4605_v48 = vpop.eup %4604 }
 0x6e6   : > { %v1505_v49 = vmul.f32 %v4605_v48, %v4597_v32  ;;  %v1510_v50 = vpop.permute.xlu0 %1509  ;;  %v3802_v32 = vld [vmem:[%s5731_s13] ss:$0 sm:$0xff]  ;;  %v4471_v48 = vld [vmem:[%s5734_s16 + $0x34] ss:$8 sps:$4 sm:$0xff]  }
 0x6e7   : > { %v1515_v51 = vsel %vm1275_vm3, %v1510_v50, 0  ;;  %v4474_v50 = vld [vmem:[%s5734_s16 + $0x44] ss:$8 sps:$4 sm:$0xff]  }
 0x6e8   : > { %4229 = vmatpush3.bf16.msra.mxu0 %v1515_v51  ;;  %v1508_v53 = vpack.c.bf16 %v1505_v49, %v1505_v49  ;;  %3797 = vst.msk [vmem:[%s5100_s8 + $0x10] sm:$0xff] %vm1258_vm5, %v1505_v49  ;;  %v4469_v49 = vld [vmem:[%s5734_s16 + $0x30] ss:$8 sps:$4 sm:$0xff]   ;;  %v4472_v51 = vld [vmem:[%s5734_s16 + $0x40] ss:$8 sps:$4 sm:$0xff]  }
 0x6e9   : > { %4240 = vmatprep.subr.bf16.mxu0 %v4700_v8 }
 0x6eb   : > { %4231 = vmatmul.mubr.msk.bf16.vlgmr.msra.gmra.mrb[16].mxu0 %vm1258_vm5, %v1508_v53  ;;  %v4475_v53 = vld [vmem:[%s5734_s16 + $0x50] ss:$8 sps:$4 sm:$0xff]  }
 0x6ec   : > { %4241 = vmatpush3.bf16.msra.mxu0 %v1635_v54  ;;  %4242 = vmatprep.mubr.msk.bf16.mxu0 %vm4701_vm2, %v4700_v8  ;;  %v4478_v54 = vld [vmem:[%s5734_s16 + $0x60] ss:$8 sps:$4 sm:$0xff]  }
 0x6ed   : > { %v4607_v55 = vpop.eup %4606  ;;  %1934 = vmatprep.subr.bf16.mxu0 %v4462_v40 }
 0x6ee   : > { %v1625_v56 = vmul.f32 %v4607_v55, %v4599_v34  ;;  %v4480_v55 = vld [vmem:[%s5734_s16 + $0x64] ss:$8 sps:$4 sm:$0xff]  }
 0x6f0   : > { %v1628_v57 = vpack.c.bf16 %v1625_v56, %v1625_v56  ;;  %3800 = vst.msk [vmem:[%s5100_s8 + $0x18] sm:$0xff] %vm1258_vm5, %v1625_v56  ;;  %v4483_v56 = vld [vmem:[%s5734_s16 + $0x74] ss:$8 sps:$4 sm:$0xff]  }
 0x6f3   : > { %4243 = vmatmul.mubr.msk.bf16.vlgmr.msra.gmra.mrb[20].mxu0 %vm1258_vm5, %v1628_v57  ;;  %v4481_v57 = vld [vmem:[%s5734_s16 + $0x70] ss:$8 sps:$4 sm:$0xff]  }
 0x6f4   : > { %1966 = vmatprep.mubr.bf16.mxu0 %v4702_v28  ;;  %1935 = vmatpush1.bf16.msra.mxu0 %v4460_v39 }
 0x6f5   : > { %1936 = vmatprep.subr.bf16.mxu0 %v4465_v41 }
 0x6f8   : > { %1937 = vmatpush1.bf16.msra.mxu0 %v4463_v43 }
 0x6f9   : > { %1938 = vmatprep.subr.bf16.mxu0 %v4468_v46 }
 0x6fc   : > { %1939 = vmatpush1.bf16.msra.mxu0 %v4466_v47 }
 0x6fd   : > { %1940 = vmatprep.subr.bf16.mxu0 %v4471_v48 }
 0x700   : > { %1941 = vmatpush1.bf16.msra.mxu0 %v4469_v49 }
 0x701   : > { %1942 = vmatprep.subr.bf16.mxu0 %v4474_v50  ;;  %v4500_v50 = vld [vmem:[%s5780_s10 + $0xc0] ss:$12 sps:$4 sm:$0xff]  }
 0x704   : > { %1943 = vmatpush1.bf16.msra.mxu0 %v4472_v51  ;;  %v4502_v51 = vld [vmem:[%s5780_s10 + $0xc4] ss:$12 sps:$4 sm:$0xff]  }
 0x705   : > { %1944 = vmatprep.subr.bf16.mxu0 %v4477_v52  ;;  %v4503_v52 = vld [vmem:[%s5780_s10 + $0xc8] ss:$12 sps:$4 sm:$0xff]  }
 0x708   : > { %1945 = vmatpush1.bf16.msra.mxu0 %v4475_v53  ;;  %v4506_v53 = vld [vmem:[%s5780_s10 + $0xdc] ss:$12 sps:$4 sm:$0xff]  }
 0x709   : > { %1946 = vmatprep.subr.bf16.mxu0 %v4480_v55  ;;  %v4504_v55 = vld [vmem:[%s5780_s10 + $0xd8] ss:$12 sps:$4 sm:$0xff]  }
 0x70c   : > { %1947 = vmatpush1.bf16.msra.mxu0 %v4478_v54  ;;  %v4507_v54 = vld [vmem:[%s5780_s10 + $0xe0] ss:$12 sps:$4 sm:$0xff]  }
 0x70d   : > { %1948 = vmatprep.subr.bf16.mxu0 %v4483_v56 }
 0x710   : > { %1949 = vmatpush1.bf16.msra.mxu0 %v4481_v57 }
 0x711   : > { %2363 = vmatprep.subr.bf16.mxu0 %v4502_v51 }
 0x742   : > { %v1313_v58 = vpop.f32.mrb[8].mxu0 }
 0x743   : > { %1319 = vst.msk [vmem:[#allocation2] sm:$0xff] %vm1203_vm4, %v1313_v58  ;;  %v4208_v59 = vpop.f32.mrb[9].mxu0  ;;  %v4484_v58 = vld [vmem:[%s5736_s18 + $0x40] sm:$0xff]  }
 0x744   : > { %v1316_v60 = vpop.f32.mrb[10].mxu0  ;;  %v4485_v59 = vld [vmem:[%s5736_s18] sm:$0xff]   ;;  %4085 = vmatprep.subr.bf16.mxu1 %v4484_v58 }
 0x745   : > { %v4209_v61 = vpop.f32.mrb[11].mxu0  ;;  %v4486_v60 = vld [vmem:[%s5736_s18 + $0x48] sm:$0xff]  }
 0x746   : > { %v4487_v61 = vld [vmem:[%s5736_s18 + $0x8] sm:$0xff]  }
 0x7b5   : > { %v1431_v5 = vpop.f32.mrb[12].mxu0 }
 0x7b6   : > { %1438 = vrot.lane.b32.xlu1 %v1431_v5, %s5751_s26  ;;  %v4220_v6 = vpop.f32.mrb[13].mxu0  ;;  %v4493_v5 = vld [vmem:[%s5736_s18 + $0x20] sm:$0xff]   ;;  %s5785_s26 = smov 32  }
 0x7b7   : > { %v1434_v13 = vpop.f32.mrb[14].mxu0  ;;  %v4494_v6 = vld [vmem:[%s5736_s18 + $0x68] sm:$0xff]  }
 0x7b8   : > { %v4221_v14 = vpop.f32.mrb[15].mxu0 }
 0x7be   : > { %v1551_v16 = vpop.f32.mrb[16].mxu0 }
 0x7bf   : > { %1558 = vrot.lane.b32.xlu0 %v1551_v16, %s4704_s6  ;;  %v4232_v18 = vpop.f32.mrb[17].mxu0 }
 0x7c0   : > { %v1554_v19 = vpop.f32.mrb[18].mxu0 }
 0x7c1   : > { %v4233_v20 = vpop.f32.mrb[19].mxu0  ;;  %v3812_v19 = vld [vmem:[%s5733_s15] ss:$0 sm:$0xff] }
 0x7c6   : > { %v1671_v21 = vpop.f32.mrb[20].mxu0 }
 0x7c7   : > { %1678 = vrot.lane.b32.xlu1 %v1671_v21, %s4703_s0  ;;  %v4244_v22 = vpop.f32.mrb[21].mxu0 }
 0x7c8   : > { %v1674_v23 = vpop.f32.mrb[22].mxu0 }
 0x7c9   : > { %v4245_v25 = vpop.f32.mrb[23].mxu0 }
 0x7ca   : > { %v4496_v25 = vld [vmem:[%s5736_s18 + $0x70] sm:$0xff]  }
 0x828   : > { %v1439_v26 = vpop.permute.xlu1 %1438 }
 0x829   : > { %1442 = vst.msk [vmem:[#allocation2] sm:$0xff] %vm1441_vm6, %v1439_v26  ;;  %v4497_v26 = vld [vmem:[%s5736_s18 + $0x30] sm:$0xff]  }
 0x831   : > { %v1559_v27 = vpop.permute.xlu0 %1558 }
 0x832   : > { %1562 = vst.msk [vmem:[#allocation2] sm:$0xff] %vm1561_vm7, %v1559_v27  ;;  %v4498_v27 = vld [vmem:[%s5736_s18 + $0x78] sm:$0xff]  }
 0x839   : > { %v1679_v29 = vpop.permute.xlu1 %1678 }
 0x83a   : > { %1682 = vst.msk [vmem:[#allocation2] sm:$0xff] %vm1681_vm8, %v1679_v29  ;;  %v4499_v29 = vld [vmem:[%s5736_s18 + $0x38] sm:$0xff]  }
 0x841   : > { %v1683_v30 = vld [vmem:[#allocation2] sm:$0xff] }
 0x842   : > { %v1684_v31 = vpack.c.bf16 %v1683_v30, %v1683_v30  ;;  %v1842_v30 = vld [vmem:[%s5735_s17] sm:$0x3] }
 0x844   : > { %4263 = vmatmul.mubr.bf16.vlgmr.msra.gmra.mrb[20].mxu1 %v1684_v31  ;;  %v1847_v31 = vrot.slane %v1842_v30, %v5035_v12 }
 0x845   : > { %4086 = vmatpush3.bf16.msra.mxu1 %v4485_v59 }
 0x846   : > { %4087 = vmatprep.subr.bf16.mxu1 %v4486_v60  ;;  %v4510_v60 = vld [vmem:[%s5780_s10 + $0xf4] ss:$12 sps:$4 sm:$0xff]  }
 0x849   : > { %4088 = vmatpush3.bf16.msra.mxu1 %v4487_v61  ;;  %v4508_v61 = vld [vmem:[%s5780_s10 + $0xf0] ss:$12 sps:$4 sm:$0xff]  }
 0x84a   : > { %4089 = vmatprep.subr.bf16.mxu1 %v4488_v62  ;;  %v4511_v62 = vld [vmem:[%s5780_s10 + $0xf8] ss:$12 sps:$4 sm:$0xff]  }
 0x84d   : > { %4090 = vmatpush3.bf16.msra.mxu1 %v4489_v63  ;;  %v4514_v63 = vld [vmem:[%s5780_s10 + $0x10c] ss:$12 sps:$4 sm:$0xff]  }
 0x84e   : > { %4091 = vmatprep.subr.bf16.mxu1 %v4490_v1  ;;  %v4512_v1 = vld [vmem:[%s5780_s10 + $0x108] ss:$12 sps:$4 sm:$0xff]  }
 0x851   : > { %4092 = vmatpush3.bf16.msra.mxu1 %v4491_v2  ;;  %v4515_v2 = vld [vmem:[%s5780_s10 + $0x110] ss:$12 sps:$4 sm:$0xff]  }
 0x852   : > { %4093 = vmatprep.subr.bf16.mxu1 %v4492_v3  ;;  %v4518_v3 = vld [vmem:[%s5780_s10 + $0x124] ss:$12 sps:$4 sm:$0xff]  }
 0x855   : > { %4094 = vmatpush3.bf16.msra.mxu1 %v4493_v5  ;;  %v4516_v5 = vld [vmem:[%s5780_s10 + $0x120] ss:$12 sps:$4 sm:$0xff]  }
 0x856   : > { %4095 = vmatprep.subr.bf16.mxu1 %v4494_v6  ;;  %v4519_v6 = vld [vmem:[%s5780_s10 + $0x128] ss:$12 sps:$4 sm:$0xff]  }
 0x859   : > { %4096 = vmatpush3.bf16.msra.mxu1 %v4495_v10  ;;  %v4522_v10 = vld [vmem:[%s5780_s10 + $0x13c] ss:$12 sps:$4 sm:$0xff]  }
 0x85a   : > { %4097 = vmatprep.subr.bf16.mxu1 %v4496_v25 }
 0x85d   : > { %4098 = vmatpush3.bf16.msra.mxu1 %v4497_v26  ;;  %v3846_v26 = vld [vmem:[%s5738_s20] ss:$0 sm:$0xff] }
 0x85e   : > { %4099 = vmatprep.subr.bf16.mxu1 %v4498_v27 }
 0x861   : > { %4100 = vmatpush3.bf16.msra.mxu1 %v4499_v29  ;;  %v3847_v29 = vld [vmem:[%s5739_s21] ss:$0 sm:$0xff] }
 0x862   : > { %4266 = vmatprep.subr.bf16.mxu1 %v4700_v8 }
 0x917   : > { %v1790_v33 = vpop.f32.mrb[20].mxu1 }
 0x918   : > { %v1791_v34 = vadd.f32 %v3802_v32, %v1790_v33  ;;  %v4264_v35 = vpop.f32.mrb[21].mxu1  ;;  %v1851_v32 = vrot.slane %v1842_v30, %v5032_v11 }
 0x919   : > { %v1793_v36 = vpop.f32.mrb[22].mxu1 }
 0x91a   : > { %v4265_v37 = vpop.f32.mrb[23].mxu1  ;;  %v1796_v38 = vadd.f32 %v1791_v34, %v5017_v4 }
 0x91c   : > { %1799 = vadd.xlane.f32.xlu0 %v1796_v38 }
 0x9a9   : > { %v1800_v4 = vpop.xlane.xlu0 %1799 }
 0x9aa   : > { %v1801_v24 = vmul.f32 0.0078125, %v1800_v4 }
 0x9ac   : > { %v1802_v44 = vsub.f32 %v1796_v38, %v1801_v24  ;;  %v3829_v24 = vld [vmem:[%s5737_s19] ss:$0 sm:$0xff] }
 0x9ae   : > { %v1803_v45 = vmul.f32 %v1802_v44, %v1802_v44 }
 0x9b0   : > { %1804 = vadd.xlane.f32.xlu1 %v1803_v45 }
 0xa3d   : > { %v1805_v13 = vpop.xlane.xlu1 %1804 }
 0xa3e   : > { %v1806_v14 = vmul.f32 0.0078125, %v1805_v13  ;;  %v4520_v13 = vld [vmem:[%s5780_s10 + $0x138] ss:$12 sps:$4 sm:$0xff]  }
 0xa40   : > { %v1807_v15 = vadd.f32 1e-05, %v1806_v14  ;;  %v4523_v14 = vld [vmem:[%s5780_s10 + $0x140] ss:$12 sps:$4 sm:$0xff]  }
 0xa42   : > { %4608 = vrsqrt.f32 %v1807_v15  ;;  %v4524_v15 = vld [vmem:[%s5780_s10 + $0x150] ss:$12 sps:$4 sm:$0xff]  }
 0xa4c   : > { %v4609_v16 = vpop.eup %4608 }
 0xa4d   : > { %v1809_v18 = vmul.f32 %v4609_v16, %v1802_v44  ;;  %v4526_v16 = vld [vmem:[%s5780_s10 + $0x154] ss:$12 sps:$4 sm:$0xff]  }
 0xa4f   : > { %v1816_v20 = vmul.f32 %v3811_v17, %v1809_v18  ;;  %v4527_v17 = vld [vmem:[%s5780_s10 + $0x158] ss:$12 sps:$4 sm:$0xff]  }
 0xa50   : > { %v4530_v18 = vld [vmem:[%s5780_s10 + $0x16c] ss:$12 sps:$4 sm:$0xff]  }
 0xa51   : > { %v1823_v21 = vadd.f32 %v3812_v19, %v1816_v20  ;;  %v4528_v19 = vld [vmem:[%s5780_s10 + $0x168] ss:$12 sps:$4 sm:$0xff]   ;;  %v4531_v20 = vld [vmem:[%s5780_s10 + $0x170] ss:$12 sps:$4 sm:$0xff]   ;;  %s4642_s10 = scalar_lea.vmem %s4641_s27, 32 }
 0xa53   : > { %v1824_v22 = vmul.f32 %v1823_v21, %v5014_v0 }
 0xa55   : > { %v1825_v23 = vpack.c.bf16 %v1824_v22, %v1824_v22 }
 0xa57   : > { %1967 = vmatmul.mubr.bf16.vlgmr.msra.gmra.mrb[24].mxu0 %v1825_v23 }
 0xa58   : > { %2395 = vmatprep.mubr.bf16.mxu0 %v4702_v28  ;;  %2364 = vmatpush1.bf16.msra.mxu0 %v4500_v50 }
 0xa59   : > { %2365 = vmatprep.subr.bf16.mxu0 %v4506_v53 }
 0xa5c   : > { %2366 = vmatpush1.bf16.msra.mxu0 %v4504_v55 }
 0xa5d   : > { %2367 = vmatprep.subr.bf16.mxu0 %v4510_v60 }
 0xa60   : > { %2368 = vmatpush1.bf16.msra.mxu0 %v4508_v61 }
 0xa61   : > { %2369 = vmatprep.subr.bf16.mxu0 %v4514_v63 }
 0xa64   : > { %2370 = vmatpush1.bf16.msra.mxu0 %v4512_v1 }
 0xa65   : > { %2371 = vmatprep.subr.bf16.mxu0 %v4518_v3 }
 0xa68   : > { %2372 = vmatpush1.bf16.msra.mxu0 %v4516_v5 }
 0xa69   : > { %2373 = vmatprep.subr.bf16.mxu0 %v4522_v10 }
 0xa6c   : > { %2374 = vmatpush1.bf16.msra.mxu0 %v4520_v13 }
 0xa6d   : > { %2375 = vmatprep.subr.bf16.mxu0 %v4526_v16 }
 0xa70   : > { %2376 = vmatpush1.bf16.msra.mxu0 %v4524_v15 }
 0xa71   : > { %2377 = vmatprep.subr.bf16.mxu0 %v4530_v18 }
 0xa74   : > { %2378 = vmatpush1.bf16.msra.mxu0 %v4528_v19 }
 0xa75   : > { %4286 = vmatprep.subr.bf16.mxu0 %v4700_v8 }
 0xb2a   : > { %v1968_v33 = vpop.f32.mrb[24].mxu0 }
 0xb2b   : > { %v1969_v34 = vadd.f32 %v1968_v33, %v1847_v31  ;;  %v1970_v35 = vpop.f32.mrb[25].mxu0 }
 0xb2c   : > { %v1971_v36 = vadd.f32 %v1970_v35, %v1851_v32  ;;  %v1972_v37 = vpop.f32.mrb[26].mxu0 }
 0xb2d   : > { %v1975_v38 = vmax.f32 %v1969_v34, 0.0  ;;  %v1973_v39 = vpop.f32.mrb[27].mxu0  ;;  %v3880_v34 = vld [vmem:[%s5729_s11 + $0x3] sm:$0x7] }
 0xb2e   : > { %v1976_v40 = vmax.f32 %v1971_v36, 0.0  ;;  %v2227_v35 = vrot.slane %v3880_v34, %v5032_v11 }
 0xb2f   : > { %v1977_v43 = vpack.c.bf16 %v1975_v38, %v1975_v38 }
 0xb30   : > { %v1978_v41 = vpack.c.bf16 %v1976_v40, %v1976_v40  ;;  %v2231_v40 = vrot.slane %v3880_v34, %v986_v9 }
 0xb32   : > { %2146 = vmatprep.mubr.bf16.mxu1 %v1978_v41 }
 0xb33   : > { %2147 = vmatmul.mubr.bf16.vlgmr.msra.gmra.mrb[24].mxu1 %v1977_v43 }
 0xb34   : > { %4282 = vmatprep.mubr.msk.bf16.mxu1 %vm4701_vm2, %v4700_v8  ;;  %4267 = vmatpush3.bf16.msra.mxu1 %v4503_v52 }
 0xb35   : > { %4268 = vmatprep.subr.bf16.mxu1 %v4700_v8 }
 0xb38   : > { %4269 = vmatpush3.bf16.msra.mxu1 %v4507_v54 }
 0xb39   : > { %4270 = vmatprep.subr.bf16.mxu1 %v4700_v8 }
 0xb3c   : > { %4271 = vmatpush3.bf16.msra.mxu1 %v4511_v62 }
 0xb3d   : > { %4272 = vmatprep.subr.bf16.mxu1 %v4700_v8 }
 0xb40   : > { %4273 = vmatpush3.bf16.msra.mxu1 %v4515_v2 }
 0xb41   : > { %4274 = vmatprep.subr.bf16.mxu1 %v4700_v8 }
 0xb44   : > { %4275 = vmatpush3.bf16.msra.mxu1 %v4519_v6 }
 0xb45   : > { %4276 = vmatprep.subr.bf16.mxu1 %v4700_v8 }
 0xb48   : > { %4277 = vmatpush3.bf16.msra.mxu1 %v4523_v14 }
 0xb49   : > { %4278 = vmatprep.subr.bf16.mxu1 %v4700_v8 }
 0xb4c   : > { %4279 = vmatpush3.bf16.msra.mxu1 %v4527_v17 }
 0xb4d   : > { %4280 = vmatprep.subr.bf16.mxu1 %v4700_v8 }
 0xb50   : > { %4281 = vmatpush3.bf16.msra.mxu1 %v4531_v20 }
 0xb51   : > { %4310 = vmatprep.subr.bf16.mxu1 %v4700_v8 }
 0xc06   : > { %v4101_v4 = vpop.f32.mrb[24].mxu1 }
 0xc07   : > { %v4102_v44 = vpop.f32.mrb[25].mxu1 }
 0xc08   : > { %v4103_v45 = vadd.f32 %v4102_v44, %v4101_v4  ;;  %v4104_v46 = vpop.f32.mrb[26].mxu1 }
 0xc09   : > { %v4105_v47 = vpop.f32.mrb[27].mxu1 }
 0xc0a   : > { %v2149_v48 = vadd.f32 %v4103_v45, %v3829_v24  ;;  %v2223_v45 = vrot.slane %v3880_v34, %v5035_v12 }
 0xc0c   : > { %v2154_v49 = vadd.f32 %v2149_v48, %v1824_v22 }
 0xc0e   : > { %2157 = vadd.xlane.f32.xlu0 %v2154_v49 }
 0xc9b   : > { %v2158_v56 = vpop.xlane.xlu0 %2157 }
 0xc9c   : > { %v2159_v57 = vmul.f32 0.0078125, %v2158_v56 }
 0xc9e   : > { %v2160_v58 = vsub.f32 %v2154_v49, %v2159_v57 }
 0xca0   : > { %v2161_v59 = vmul.f32 %v2160_v58, %v2160_v58 }
 0xca2   : > { %2162 = vadd.xlane.f32.xlu0 %v2161_v59 }
 0xd2f   : > { %v2163_v21 = vpop.xlane.xlu0 %2162 }
 0xd30   : > { %v2164_v22 = vmul.f32 0.0078125, %v2163_v21 }
 0xd32   : > { %v2165_v23 = vadd.f32 1e-05, %v2164_v22 }
 0xd34   : > { %4610 = vrsqrt.f32 %v2165_v23 }
 0xd3e   : > { %v4611_v25 = vpop.eup %4610 }
 0xd3f   : > { %v2167_v27 = vmul.f32 %v4611_v25, %v2160_v58 }
 0xd41   : > { %v2174_v30 = vmul.f32 %v3846_v26, %v2167_v27 }
 0xd43   : > { %v2181_v31 = vadd.f32 %v3847_v29, %v2174_v30 }
 0xd45   : > { %v5371_v32 = vmul.f32 %v2181_v31, %v5014_v0 }
 0xd47   : > { %v2183_v33 = vpack.c.bf16 %v5371_v32, %v5371_v32 }
 0xd49   : > { %2396 = vmatmul.mubr.bf16.vlgmr.msra.gmra.mrb[28].mxu0 %v2183_v33  ;;  %4283 = vmatmul.mubr.bf16.vlgmr.msra.gmra.mrb[28].mxu1 %v2183_v33 }
 0xd4a   : > { %4288 = vmatprep.mubr.msk.bf16.mxu0 %vm4701_vm2, %v4700_v8  ;;  %4312 = vmatprep.mubr.msk.bf16.mxu1 %vm4701_vm2, %v4700_v8 }
 0xe1c   : > { %v2397_v36 = vpop.f32.mrb[28].mxu0  ;;  %v2438_v37 = vpop.f32.mrb[28].mxu1 }
 0xe1d   : > { %v2399_v38 = vpop.f32.mrb[29].mxu0  ;;  %v4284_v39 = vpop.f32.mrb[29].mxu1  ;;  %v2439_v47 = vadd.f32 %v2438_v37, %v2231_v40  ;;  %v2398_v49 = vadd.f32 %v2397_v36, %v2223_v45 }
 0xe1e   : > { %v2400_v41 = vadd.f32 %v2399_v38, %v2227_v35  ;;  %v2401_v43 = vpop.f32.mrb[30].mxu0  ;;  %v2441_v4 = vpop.f32.mrb[30].mxu1 }
 0xe1f   : > { %v2402_v24 = vpop.f32.mrb[31].mxu0  ;;  %v4285_v44 = vpop.f32.mrb[31].mxu1  ;;  %v5388_v50 = vpack.c.bf16 %v2439_v47, %v2439_v47  ;;  %v2444_v51 = vpack.c.bf16 %v2398_v49, %v2398_v49 }
 0xe20   : > { %v2445_v46 = vpack.c.bf16 %v2400_v41, %v2400_v41 }
 0xe21   : > { %v2513_v7 = vsel %vm1275_vm3, %v5388_v50, 0 }
 0xe22   : > { %v2451_v48 = vsel %vm1203_vm4, %v2445_v46, 0 }
 0xe23   : > { %4287 = vmatpush3.bf16.xpose.msra.mxu0 %v2451_v48 }
 0xe24   : > { %4292 = vmatprep.subr.bf16.mxu0 %v4700_v8 }
 0xe2a   : > { %4289 = vmatmul.mubr.msk.bf16.vlgmr.msra.gmra.mrb[32].mxu0 %vm1203_vm4, %v2444_v51 }
 0xe2b   : > { %4293 = vmatpush3.bf16.msra.mxu0 %v2513_v7  ;;  %4294 = vmatprep.mubr.msk.bf16.mxu0 %vm4701_vm2, %v4700_v8 }
 0xe2c   : > { %4298 = vmatprep.subr.bf16.mxu0 %v4700_v8 }
 0xefd   : > { %v2487_v9 = vpop.f32.mrb[32].mxu0 }
 0xefe   : > { %v2493_v52 = vmul.f32 0.17677669, %v2487_v9  ;;  %v4290_v53 = vpop.f32.mrb[33].mxu0 }
 0xeff   : > { %v2490_v54 = vpop.f32.mrb[34].mxu0 }
 0xf00   : > { %v4291_v55 = vpop.f32.mrb[35].mxu0  ;;  %v2494_v56 = vadd.f32 %v5076_v42, %v2493_v52 }
 0xf02   : > { %v2495_v57 = vsel %vm1258_vm5, %v2494_v56, -inf }
 0xf03   : > { %2496 = vmax.xlane.f32.xlu1 %v2495_v57 }
 0xf14   : > { %2560 = vrot.lane.b32.xlu1 %v2445_v46, %s4703_s0 }
 0xf18   : > { %2680 = vrot.lane.b32.xlu1 %v2445_v46, %s4704_s6 }
 0xf1c   : > { %2678 = vrot.lane.b32.xlu1 %v2444_v51, %s4704_s6 }
 0xf20   : > { %2797 = vrot.lane.b32.xlu1 %v2444_v51, %s5785_s26 }
 0xf90   : > { %v2497_v58 = vpop.xlane.xlu1 %2496 }
 0xf91   : > { %v2498_v59 = vsub.f32 %v2494_v56, %v2497_v58 }
 0xf93   : > { %v2499_v60 = vmul.f32 1.442695, %v2498_v59 }
 0xf94   : > { %v2561_v61 = vpop.permute.xlu1 %2560 }
 0xf95   : > { %4612 = vpow2.f32 %v2499_v60  ;;  %v2566_v17 = vsel %vm1203_vm4, %v2561_v61, 0 }
 0xf98   : > { %v2681_v62 = vpop.permute.xlu1 %2680 }
 0xf99   : > { %v2686_v63 = vsel %vm1203_vm4, %v2681_v62, 0 }
 0xf9a   : > { %4311 = vmatpush3.bf16.xpose.msra.mxu1 %v2686_v63 }
 0xf9b   : > { %4322 = vmatprep.subr.bf16.mxu1 %v4700_v8 }
 0xf9c   : > { %v2679_v2 = vpop.permute.xlu1 %2678 }
 0xf9f   : > { %v4613_v1 = vpop.eup %4612 }
 0xfa0   : > { %v2501_v3 = vsel %vm1258_vm5, %v4613_v1, 0.0  ;;  %v2798_v18 = vpop.permute.xlu1 %2797 }
 0xfa1   : > { %2502 = vadd.xlane.f32.xlu0 %v2501_v3  ;;  %4313 = vmatmul.mubr.msk.bf16.vlgmr.msra.gmra.mrb[32].mxu1 %vm1203_vm4, %v2679_v2 }
 0xfa2   : > { %4324 = vmatprep.mubr.msk.bf16.mxu1 %vm4701_vm2, %v4700_v8 }
 0xfb7   : > { %2557 = vrot.lane.b32.xlu0 %v2444_v51, %s4703_s0 }
 0xfbb   : > { %2799 = vrot.lane.b32.xlu0 %v2445_v46, %s5785_s26 }
0x102e   : > { %v2503_v5 = vpop.xlane.xlu0 %2502 }
0x102f   : > { %4614 = vrcp.f32 %v2503_v5 }
0x1032   : > { %v2558_v6 = vpop.permute.xlu0 %2557 }
0x1036   : > { %v2800_v10 = vpop.permute.xlu0 %2799 }
0x1037   : > { %v2805_v13 = vsel %vm1203_vm4, %v2800_v10, 0 }
0x1038   : > { %4323 = vmatpush3.bf16.xpose.msra.mxu1 %v2805_v13 }
0x1039   : > { %v4615_v14 = vpop.eup %4614  ;;  %4334 = vmatprep.subr.bf16.mxu1 %v4700_v8 }
0x103a   : > { %v2505_v15 = vmul.f32 %v4615_v14, %v4613_v1 }
0x103c   : > { %v2508_v16 = vpack.c.bf16 %v2505_v15, %v2505_v15  ;;  %3906 = vst.msk [vmem:[%s5100_s8 + $0x20] sm:$0xff] %vm1258_vm5, %v2505_v15 }
0x103e   : > { %4295 = vmatmul.mubr.msk.bf16.vlgmr.msra.gmra.mrb[36].mxu0 %vm1258_vm5, %v2508_v16 }
0x103f   : > { %4299 = vmatpush3.bf16.xpose.msra.mxu0 %v2566_v17  ;;  %4325 = vmatmul.mubr.msk.bf16.vlgmr.msra.gmra.mrb[36].mxu1 %vm1203_vm4, %v2798_v18 }
0x1040   : > { %4300 = vmatprep.mubr.msk.bf16.mxu0 %vm4701_vm2, %v4700_v8  ;;  %4304 = vmatprep.subr.bf16.mxu0 %v4700_v8 }
0x1041   : > { %4350 = vmatprep.mubr.msk.bf16.mxu1 %vm4701_vm2, %v4700_v8 }
0x1046   : > { %4301 = vmatmul.mubr.msk.bf16.vlgmr.msra.gmra.mrb[40].mxu0 %vm1203_vm4, %v2558_v6 }
0x1047   : > { %4306 = vmatprep.mubr.msk.bf16.mxu0 %vm4701_vm2, %v4700_v8 }
0x1074   : > { %v2722_v19 = vpop.f32.mrb[32].mxu1 }
0x1075   : > { %v2728_v20 = vmul.f32 0.17677669, %v2722_v19  ;;  %v4314_v21 = vpop.f32.mrb[33].mxu1  ;;  %v4532_v19 = vld [vmem:[%s5730_s12 + $0x40] sm:$0xff]  }
0x1076   : > { %v2725_v22 = vpop.f32.mrb[34].mxu1  ;;  %4335 = vmatpush3.bf16.msra.mxu1 %v4532_v19  ;;  %v4534_v21 = vld [vmem:[%s5730_s12 + $0x50] sm:$0xff]   ;;  %v4572_v19 = vld [vmem:[%s5736_s18 + $0xe0] sm:$0xff]  }
0x1077   : > { %v4315_v23 = vpop.f32.mrb[35].mxu1  ;;  %v2729_v25 = vadd.f32 %v5076_v42, %v2728_v20  ;;  %v4533_v20 = vld [vmem:[%s5730_s12 + $0x48] sm:$0xff]   ;;  %4336 = vmatprep.subr.bf16.mxu1 %v4700_v8  ;;  %v4536_v22 = vld [vmem:[%s5730_s12 + $0x60] sm:$0xff]  }
0x1078   : > { %v4537_v23 = vld [vmem:[%s5730_s12 + $0x68] sm:$0xff]  }
0x1079   : > { %v2730_v26 = vsel %vm1258_vm5, %v2729_v25, -inf }
0x107a   : > { %2731 = vmax.xlane.f32.xlu1 %v2730_v26  ;;  %4337 = vmatpush3.bf16.msra.mxu1 %v4533_v20  ;;  %v4573_v20 = vld [vmem:[%s5736_s18 + $0xa0] sm:$0xff]  }
0x107b   : > { %4338 = vmatprep.subr.bf16.mxu1 %v4700_v8 }
0x107e   : > { %4339 = vmatpush3.bf16.msra.mxu1 %v4534_v21  ;;  %v4574_v21 = vld [vmem:[%s5736_s18 + $0xe8] sm:$0xff]  }
0x107f   : > { %4340 = vmatprep.subr.bf16.mxu1 %v4700_v8 }
0x1107   : > { %v2732_v27 = vpop.xlane.xlu1 %2731 }
0x1108   : > { %v2733_v29 = vsub.f32 %v2729_v25, %v2732_v27 }
0x110a   : > { %v2734_v30 = vmul.f32 1.442695, %v2733_v29 }
0x110c   : > { %4616 = vpow2.f32 %v2734_v30  ;;  %v4538_v30 = vld [vmem:[%s5730_s12 + $0x70] sm:$0xff]  }
0x1111   : > { %v2549_v31 = vpop.f32.mrb[36].mxu0 }
0x1112   : > { %2555 = vst.msk [vmem:[#allocation2] sm:$0xff] %vm1203_vm4, %v2549_v31  ;;  %v4296_v33 = vpop.f32.mrb[37].mxu0  ;;  %v2841_v34 = vpop.f32.mrb[36].mxu1  ;;  %v4539_v31 = vld [vmem:[%s5730_s12 + $0x78] sm:$0xff]  }
0x1113   : > { %v2552_v35 = vpop.f32.mrb[38].mxu0  ;;  %v4326_v36 = vpop.f32.mrb[37].mxu1  ;;  %v2847_v4 = vmul.f32 0.17677669, %v2841_v34 }
0x1114   : > { %v4297_v37 = vpop.f32.mrb[39].mxu0  ;;  %v2844_v38 = vpop.f32.mrb[38].mxu1 }
0x1115   : > { %v4327_v39 = vpop.f32.mrb[39].mxu1  ;;  %v2848_v49 = vadd.f32 %v5076_v42, %v2847_v4 }
0x1116   : > { %v4617_v40 = vpop.eup %4616 }
0x1117   : > { %v2736_v41 = vsel %vm1258_vm5, %v4617_v40, 0.0  ;;  %v2849_v51 = vsel %vm1258_vm5, %v2848_v49, -inf }
0x1118   : > { %2737 = vadd.xlane.f32.xlu1 %v2736_v41 }
0x1119   : > { %v2602_v43 = vpop.f32.mrb[40].mxu0 }
0x111a   : > { %v2608_v24 = vmul.f32 0.17677669, %v2602_v43  ;;  %v4302_v44 = vpop.f32.mrb[41].mxu0 }
0x111b   : > { %v2605_v45 = vpop.f32.mrb[42].mxu0 }
0x111c   : > { %v4303_v46 = vpop.f32.mrb[43].mxu0  ;;  %v2609_v47 = vadd.f32 %v5076_v42, %v2608_v24  ;;  %v3934_v45 = vld [vmem:[%s5731_s13 + $0x1] ss:$0 sm:$0xff] }
0x111e   : > { %v2610_v48 = vsel %vm1258_vm5, %v2609_v47, -inf }
0x111f   : > { %2611 = vmax.xlane.f32.xlu0 %v2610_v48 }
0x1123   : > { %2850 = vmax.xlane.f32.xlu0 %v2849_v51 }
0x1129   : > { %2625 = vrot.lane.b32.xlu1 %v5388_v50, %s4703_s0 }
0x112d   : > { %2863 = vrot.lane.b32.xlu1 %v5388_v50, %s5785_s26 }
0x11a5   : > { %v2738_v7 = vpop.xlane.xlu1 %2737 }
0x11a6   : > { %4618 = vrcp.f32 %v2738_v7 }
0x11a9   : > { %v2626_v9 = vpop.permute.xlu1 %2625 }
0x11aa   : > { %v2631_v52 = vsel %vm1275_vm3, %v2626_v9, 0  ;;  %v4540_v9 = vld [vmem:[%s5734_s16 + $0x80] ss:$8 sps:$4 sm:$0xff]  }
0x11ab   : > { %4305 = vmatpush3.bf16.msra.mxu0 %v2631_v52  ;;  %v4542_v52 = vld [vmem:[%s5734_s16 + $0x84] ss:$8 sps:$4 sm:$0xff]  }
0x11ac   : > { %v2612_v53 = vpop.xlane.xlu0 %2611  ;;  %4316 = vmatprep.subr.bf16.mxu0 %v4700_v8 }
0x11ad   : > { %v2613_v42 = vsub.f32 %v2609_v47, %v2612_v53  ;;  %v4545_v53 = vld [vmem:[%s5734_s16 + $0x94] ss:$8 sps:$4 sm:$0xff]  }
0x11af   : > { %v2614_v54 = vmul.f32 1.442695, %v2613_v42  ;;  %v4543_v42 = vld [vmem:[%s5734_s16 + $0x90] ss:$8 sps:$4 sm:$0xff]  }
0x11b0   : > { %v4619_v55 = vpop.eup %4618  ;;  %v2851_v56 = vpop.xlane.xlu0 %2850 }
0x11b1   : > { %v2740_v57 = vmul.f32 %v4619_v55, %v4617_v40  ;;  %4620 = vpow2.f32 %v2614_v54  ;;  %v2852_v58 = vsub.f32 %v2848_v49, %v2851_v56 }
0x11b3   : > { %v2853_v59 = vmul.f32 1.442695, %v2852_v58  ;;  %3912 = vst.msk [vmem:[%s5100_s8 + $0x30] sm:$0xff] %vm1258_vm5, %v2740_v57  ;;  %v2743_v16 = vpack.c.bf16 %v2740_v57, %v2740_v57  ;;  %v4548_v57 = vld [vmem:[%s5734_s16 + $0xa4] ss:$8 sps:$4 sm:$0xff]  }
0x11b4   : > { %v4546_v58 = vld [vmem:[%s5734_s16 + $0xa0] ss:$8 sps:$4 sm:$0xff]  }
0x11b5   : > { %4622 = vpow2.f32 %v2853_v59  ;;  %v4551_v59 = vld [vmem:[%s5734_s16 + $0xb4] ss:$8 sps:$4 sm:$0xff]  }
0x11bb   : > { %v4621_v60 = vpop.eup %4620 }
0x11bc   : > { %v2616_v61 = vsel %vm1258_vm5, %v4621_v60, 0.0 }
0x11bd   : > { %2617 = vadd.xlane.f32.xlu0 %v2616_v61  ;;  %v4554_v61 = vld [vmem:[%s5734_s16 + $0xc4] ss:$8 sps:$4 sm:$0xff]  }
0x11bf   : > { %v4623_v62 = vpop.eup %4622 }
0x11c0   : > { %v2855_v63 = vsel %vm1258_vm5, %v4623_v62, 0.0 }
0x11c1   : > { %2856 = vadd.xlane.f32.xlu0 %v2855_v63  ;;  %v4557_v63 = vld [vmem:[%s5734_s16 + $0xd4] ss:$8 sps:$4 sm:$0xff]  }
0x11d7   : > { %2744 = vrot.lane.b32.xlu0 %v5388_v50, %s4704_s6  ;;  %v2864_v50 = vpop.permute.xlu1 %2863 }
0x11d8   : > { %v2869_v17 = vsel %vm1275_vm3, %v2864_v50, 0  ;;  %v4568_v50 = vld [vmem:[%s5736_s18 + $0xd0] sm:$0xff]  }
0x124a   : > { %v2618_v1 = vpop.xlane.xlu0 %2617 }
0x124b   : > { %4624 = vrcp.f32 %v2618_v1  ;;  %v4555_v1 = vld [vmem:[%s5734_s16 + $0xd0] ss:$8 sps:$4 sm:$0xff]  }
0x124e   : > { %v2857_v2 = vpop.xlane.xlu0 %2856 }
0x124f   : > { %4626 = vrcp.f32 %v2857_v2  ;;  %v4558_v2 = vld [vmem:[%s5734_s16 + $0xe0] ss:$8 sps:$4 sm:$0xff]  }
0x1252   : > { %v2745_v6 = vpop.permute.xlu0 %2744 }
0x1253   : > { %v2750_v15 = vsel %vm1275_vm3, %v2745_v6, 0  ;;  %v4561_v6 = vld [vmem:[%s5734_s16 + $0xf0] ss:$8 sps:$4 sm:$0xff]  }
0x1255   : > { %v4625_v3 = vpop.eup %4624 }
0x1256   : > { %v2620_v5 = vmul.f32 %v4625_v3, %v4621_v60  ;;  %v4549_v60 = vld [vmem:[%s5734_s16 + $0xb0] ss:$8 sps:$4 sm:$0xff]   ;;  %v4560_v3 = vld [vmem:[%s5734_s16 + $0xe4] ss:$8 sps:$4 sm:$0xff]  }
0x1258   : > { %v2623_v10 = vpack.c.bf16 %v2620_v5, %v2620_v5  ;;  %3909 = vst.msk [vmem:[%s5100_s8 + $0x28] sm:$0xff] %vm1258_vm5, %v2620_v5  ;;  %v4563_v5 = vld [vmem:[%s5734_s16 + $0xf4] ss:$8 sps:$4 sm:$0xff]  }
0x1259   : > { %v4627_v13 = vpop.eup %4626 }
0x125a   : > { %v2859_v14 = vmul.f32 %v4627_v13, %v4623_v62  ;;  %4307 = vmatmul.mubr.msk.bf16.vlgmr.msra.gmra.mrb[44].mxu0 %vm1258_vm5, %v2623_v10  ;;  %v4552_v62 = vld [vmem:[%s5734_s16 + $0xc0] ss:$8 sps:$4 sm:$0xff]  }
0x125b   : > { %4317 = vmatpush3.bf16.msra.mxu0 %v2750_v15  ;;  %4318 = vmatprep.mubr.msk.bf16.mxu0 %vm4701_vm2, %v4700_v8  ;;  %v4564_v10 = vld [vmem:[%s5736_s18 + $0xc0] sm:$0xff]   ;;  %v4567_v15 = vld [vmem:[%s5736_s18 + $0x88] sm:$0xff]  }
0x125c   : > { %4328 = vmatprep.subr.bf16.mxu0 %v4700_v8  ;;  %3915 = vst.msk [vmem:[%s5100_s8 + $0x38] sm:$0xff] %vm1258_vm5, %v2859_v14  ;;  %v2862_v18 = vpack.c.bf16 %v2859_v14, %v2859_v14  ;;  %v4565_v13 = vld [vmem:[%s5736_s18 + $0x80] sm:$0xff]   ;;  %v4566_v14 = vld [vmem:[%s5736_s18 + $0xc8] sm:$0xff]  }
0x1262   : > { %4319 = vmatmul.mubr.msk.bf16.vlgmr.msra.gmra.mrb[48].mxu0 %vm1258_vm5, %v2743_v16  ;;  %v4569_v16 = vld [vmem:[%s5736_s18 + $0x90] sm:$0xff]  }
0x1263   : > { %4329 = vmatpush3.bf16.msra.mxu0 %v2869_v17  ;;  %4330 = vmatprep.mubr.msk.bf16.mxu0 %vm4701_vm2, %v4700_v8  ;;  %v4570_v17 = vld [vmem:[%s5736_s18 + $0xd8] sm:$0xff]  }
0x1264   : > { %3173 = vmatprep.subr.bf16.mxu0 %v4542_v52  ;;  %v4013_v52 = vld [vmem:[%s5737_s19 + $0x1] ss:$0 sm:$0xff] }
0x126a   : > { %4331 = vmatmul.mubr.msk.bf16.vlgmr.msra.gmra.mrb[52].mxu0 %vm1258_vm5, %v2862_v18  ;;  %v4571_v18 = vld [vmem:[%s5736_s18 + $0x98] sm:$0xff]  }
0x126b   : > { %3205 = vmatprep.mubr.bf16.mxu0 %v4702_v28  ;;  %v4535_v28 = vld [vmem:[%s5730_s12 + $0x58] sm:$0xff]   ;;  %3174 = vmatpush1.bf16.msra.mxu0 %v4540_v9 }
0x126c   : > { %4341 = vmatpush3.bf16.msra.mxu1 %v4535_v28  ;;  %3175 = vmatprep.subr.bf16.mxu0 %v4545_v53  ;;  %v4575_v28 = vld [vmem:[%s5736_s18 + $0xa8] sm:$0xff]  }
0x126d   : > { %4342 = vmatprep.subr.bf16.mxu1 %v4700_v8 }
0x126f   : > { %3176 = vmatpush1.bf16.msra.mxu0 %v4543_v42 }
0x1270   : > { %4343 = vmatpush3.bf16.msra.mxu1 %v4536_v22  ;;  %3177 = vmatprep.subr.bf16.mxu0 %v4548_v57 }
0x1271   : > { %4344 = vmatprep.subr.bf16.mxu1 %v4700_v8 }
0x1273   : > { %3178 = vmatpush1.bf16.msra.mxu0 %v4546_v58 }
0x1274   : > { %4345 = vmatpush3.bf16.msra.mxu1 %v4537_v23  ;;  %3179 = vmatprep.subr.bf16.mxu0 %v4551_v59  ;;  %v4580_v59 = vld [vmem:[%s5740_s22] sm:$0xff]  }
0x1275   : > { %4346 = vmatprep.subr.bf16.mxu1 %v4700_v8 }
0x1277   : > { %3180 = vmatpush1.bf16.msra.mxu0 %v4549_v60  ;;  %v4581_v60 = vld [vmem:[%s5740_s22 + $0x8] sm:$0xff]  }
0x1278   : > { %4347 = vmatpush3.bf16.msra.mxu1 %v4538_v30  ;;  %3181 = vmatprep.subr.bf16.mxu0 %v4554_v61  ;;  %v3946_v30 = vld [vmem:[%s5733_s15 + $0x1] ss:$0 sm:$0xff]  ;;  %v4582_v61 = vld [vmem:[%s5740_s22 + $0x10] sm:$0xff]  }
0x1279   : > { %4348 = vmatprep.subr.bf16.mxu1 %v4700_v8 }
0x127b   : > { %3182 = vmatpush1.bf16.msra.mxu0 %v4552_v62  ;;  %v4583_v62 = vld [vmem:[%s5740_s22 + $0x18] sm:$0xff]  }
0x127c   : > { %4349 = vmatpush3.bf16.msra.mxu1 %v4539_v31  ;;  %3183 = vmatprep.subr.bf16.mxu0 %v4557_v63  ;;  %v4584_v63 = vld [vmem:[%s5740_s22 + $0x20] sm:$0xff]  }
0x127d   : > { %4141 = vmatprep.subr.bf16.mxu1 %v4564_v10 }
0x127f   : > { %3184 = vmatpush1.bf16.msra.mxu0 %v4555_v1  ;;  %v4585_v1 = vld [vmem:[%s5740_s22 + $0x28] sm:$0xff]  }
0x1280   : > { %3185 = vmatprep.subr.bf16.mxu0 %v4560_v3  ;;  %v4587_v3 = vld [vmem:[%s5740_s22 + $0x38] sm:$0xff]  }
0x1283   : > { %3186 = vmatpush1.bf16.msra.mxu0 %v4558_v2  ;;  %v4586_v2 = vld [vmem:[%s5740_s22 + $0x30] sm:$0xff]  }
0x1284   : > { %3187 = vmatprep.subr.bf16.mxu0 %v4563_v5 }
0x1287   : > { %3188 = vmatpush1.bf16.msra.mxu0 %v4561_v6 }
0x1288   : > { %4354 = vmatprep.subr.bf16.mxu0 %v4700_v8 }
0x132d   : > { %v2667_v25 = vpop.f32.mrb[44].mxu0 }
0x132e   : > { %2674 = vrot.lane.b32.xlu1 %v2667_v25, %s5785_s26  ;;  %v4308_v26 = vpop.f32.mrb[45].mxu0  ;;  %s792_s26 = scalar_lea.vmem [#allocation3], %s5095_s9 }
0x132f   : > { %v2670_v27 = vpop.f32.mrb[46].mxu0 }
0x1330   : > { %v4309_v29 = vpop.f32.mrb[47].mxu0  ;;  %v3945_v27 = vld [vmem:[%s5732_s14 + $0x1] ss:$0 sm:$0xff] }
0x1335   : > { %v2786_v33 = vpop.f32.mrb[48].mxu0 }
0x1336   : > { %2793 = vrot.lane.b32.xlu0 %v2786_v33, %s4704_s6  ;;  %v4320_v34 = vpop.f32.mrb[49].mxu0  ;;  %s4043_s6 = sshll.u32 %s4858_s7, 4 }
0x1337   : > { %v2789_v35 = vpop.f32.mrb[50].mxu0  ;;  %s5661_s25 = scalar_lea.hbm %s5786_s29, %s4043_s6 }
0x1338   : > { %v4321_v36 = vpop.f32.mrb[51].mxu0 }
0x1339   : > { %v4576_v36 = vld [vmem:[%s5736_s18 + $0xf0] sm:$0xff]  }
0x133d   : > { %v2905_v37 = vpop.f32.mrb[52].mxu0 }
0x133e   : > { %2912 = vrot.lane.b32.xlu1 %v2905_v37, %s4703_s0  ;;  %v4332_v38 = vpop.f32.mrb[53].mxu0  ;;  %v4577_v37 = vld [vmem:[%s5736_s18 + $0xb0] sm:$0xff]   ;;  %s3570_s0 = sshll.u32 %s792_s26, 4  ;;  %s5663_s0 = int_to_ptr.vmem [resolvable:$true] %s3570_s0 }
0x133f   : > { %v2908_v39 = vpop.f32.mrb[54].mxu0  ;;  %v4578_v38 = vld [vmem:[%s5736_s18 + $0xf8] sm:$0xff]   ;;  %s4636_s5 = scalar_lea.vmem %s5663_s0, 16  ;;  %p4643_p0 = scmp.lt.s32.totalorder %s5663_s0, %s4641_s27 }
0x1340   : > { %v4333_v40 = vpop.f32.mrb[55].mxu0  ;;  %v4579_v39 = vld [vmem:[%s5736_s18 + $0xb8] sm:$0xff]   ;;  %p4637_p11 = scmp.ne.s32.totalorder %s5663_s0, %s4636_s5  ;;  %p4644_p1 = scmp.lt.s32.totalorder %s4642_s10, %s4636_s5 }
0x1341   : > { %v3963_v40 = vld [vmem:[%s5735_s17 + $0x2] sm:$0x3] }
0x1342   : > { %p4638_p12 = pnand %p4637_p11, %p4875_p5  ;;  %p4645_p2 = por %p4644_p1, %p4643_p0 }
0x1344   : > { %p4639_p13 = pneg %p4638_p12 }
0x1346   : > { %p4646_p3 = pnand %p4645_p2, %p4639_p13 }
0x13a0   : > { %v2675_v41 = vpop.permute.xlu1 %2674 }
0x13a1   : > { %2677 = vst.msk [vmem:[#allocation2] sm:$0xff] %vm1441_vm6, %v2675_v41  ;;  %v3086_v41 = vrot.slane %v3963_v40, %v5035_v12 }
0x13a8   : > { %v2794_v43 = vpop.permute.xlu0 %2793 }
0x13a9   : > { %2796 = vst.msk [vmem:[#allocation2] sm:$0xff] %vm1561_vm7, %v2794_v43  ;;  %v3090_v43 = vrot.slane %v3963_v40, %v5032_v11 }
0x13b0   : > { %v2913_v4 = vpop.permute.xlu1 %2912 }
0x13b1   : > { %2915 = vst.msk [vmem:[#allocation2] sm:$0xff] %vm1681_vm8, %v2913_v4 }
0x13b8   : > { %v2916_v24 = vld [vmem:[#allocation2] sm:$0xff] }
0x13b9   : > { %v2917_v44 = vpack.c.bf16 %v2916_v24, %v2916_v24 }
0x13bb   : > { %4351 = vmatmul.mubr.bf16.vlgmr.msra.gmra.mrb[40].mxu1 %v2917_v44 }
0x13bc   : > { %4142 = vmatpush3.bf16.msra.mxu1 %v4565_v13 }
0x13bd   : > { %4143 = vmatprep.subr.bf16.mxu1 %v4566_v14  ;;  %v4032_v14 = vld [vmem:[%s5738_s20 + $0x1] ss:$0 sm:$0xff] }
0x13c0   : > { %4144 = vmatpush3.bf16.msra.mxu1 %v4567_v15 }
0x13c1   : > { %4145 = vmatprep.subr.bf16.mxu1 %v4568_v50  ;;  %v4033_v50 = vld [vmem:[%s5739_s21 + $0x1] ss:$0 sm:$0xff] }
0x13c4   : > { %4146 = vmatpush3.bf16.msra.mxu1 %v4569_v16 }
0x13c5   : > { %4147 = vmatprep.subr.bf16.mxu1 %v4570_v17 }
0x13c8   : > { %4148 = vmatpush3.bf16.msra.mxu1 %v4571_v18 }
0x13c9   : > { %4149 = vmatprep.subr.bf16.mxu1 %v4572_v19 }
0x13cc   : > { %4150 = vmatpush3.bf16.msra.mxu1 %v4573_v20 }
0x13cd   : > { %4151 = vmatprep.subr.bf16.mxu1 %v4574_v21 }
0x13d0   : > { %4152 = vmatpush3.bf16.msra.mxu1 %v4575_v28 }
0x13d1   : > { %4153 = vmatprep.subr.bf16.mxu1 %v4576_v36 }
0x13d4   : > { %4154 = vmatpush3.bf16.msra.mxu1 %v4577_v37 }
0x13d5   : > { %4155 = vmatprep.subr.bf16.mxu1 %v4578_v38 }
0x13d8   : > { %4156 = vmatpush3.bf16.msra.mxu1 %v4579_v39 }
0x148e   : > { %v3025_v46 = vpop.f32.mrb[40].mxu1 }
0x148f   : > { %v3026_v47 = vadd.f32 %v3934_v45, %v3025_v46  ;;  %v4352_v48 = vpop.f32.mrb[41].mxu1 }
0x1490   : > { %v3028_v49 = vpop.f32.mrb[42].mxu1 }
0x1491   : > { %v4353_v51 = vpop.f32.mrb[43].mxu1  ;;  %v3031_v7 = vadd.f32 %v3026_v47, %v5371_v32 }
0x1493   : > { %3036 = vadd.xlane.f32.xlu0 %v3031_v7 }
0x1520   : > { %v3037_v32 = vpop.xlane.xlu0 %3036 }
0x1521   : > { %v3038_v54 = vmul.f32 0.0078125, %v3037_v32 }
0x1523   : > { %v3039_v55 = vsub.f32 %v3031_v7, %v3038_v54 }
0x1525   : > { %v3040_v56 = vmul.f32 %v3039_v55, %v3039_v55 }
0x1527   : > { %3041 = vadd.xlane.f32.xlu1 %v3040_v56 }
0x15b4   : > { %v3042_v22 = vpop.xlane.xlu1 %3041 }
0x15b5   : > { %v3043_v23 = vmul.f32 0.0078125, %v3042_v22 }
0x15b7   : > { %v3044_v25 = vadd.f32 1e-05, %v3043_v23 }
0x15b9   : > { %4628 = vrsqrt.f32 %v3044_v25  ;;  %v3449_v25 = vld [vmem:[%s5741_s23] sm:$0x1] }
0x15c3   : > { %v4629_v26 = vpop.eup %4628 }
0x15c4   : > { %v3046_v29 = vmul.f32 %v4629_v26, %v3039_v55 }
0x15c6   : > { %v3053_v31 = vmul.f32 %v3945_v27, %v3046_v29 }
0x15c8   : > { %v3060_v33 = vadd.f32 %v3946_v30, %v3053_v31 }
0x15ca   : > { %v3061_v34 = vmul.f32 %v3060_v33, %v5014_v0 }
0x15cc   : > { %v3062_v35 = vpack.c.bf16 %v3061_v34, %v3061_v34 }
0x15ce   : > { %3206 = vmatmul.mubr.bf16.vlgmr.msra.gmra.mrb[56].mxu0 %v3062_v35 }
0x15cf   : > { %4370 = vmatprep.mubr.msk.bf16.mxu0 %vm4701_vm2, %v4700_v8  ;;  %4355 = vmatpush3.bf16.msra.mxu0 %v4580_v59 }
0x15d0   : > { %4356 = vmatprep.subr.bf16.mxu0 %v4700_v8 }
0x15d3   : > { %4357 = vmatpush3.bf16.msra.mxu0 %v4581_v60 }
0x15d4   : > { %4358 = vmatprep.subr.bf16.mxu0 %v4700_v8 }
0x15d7   : > { %4359 = vmatpush3.bf16.msra.mxu0 %v4582_v61 }
0x15d8   : > { %4360 = vmatprep.subr.bf16.mxu0 %v4700_v8 }
0x15db   : > { %4361 = vmatpush3.bf16.msra.mxu0 %v4583_v62 }
0x15dc   : > { %4362 = vmatprep.subr.bf16.mxu0 %v4700_v8 }
0x15df   : > { %4363 = vmatpush3.bf16.msra.mxu0 %v4584_v63 }
0x15e0   : > { %4364 = vmatprep.subr.bf16.mxu0 %v4700_v8 }
0x15e3   : > { %4365 = vmatpush3.bf16.msra.mxu0 %v4585_v1 }
0x15e4   : > { %4366 = vmatprep.subr.bf16.mxu0 %v4700_v8 }
0x15e7   : > { %4367 = vmatpush3.bf16.msra.mxu0 %v4586_v2 }
0x15e8   : > { %4368 = vmatprep.subr.bf16.mxu0 %v4700_v8 }
0x15eb   : > { %4369 = vmatpush3.bf16.msra.mxu0 %v4587_v3 }
0x16a1   : > { %v3207_v4 = vpop.f32.mrb[56].mxu0 }
0x16a2   : > { %v3208_v24 = vadd.f32 %v3207_v4, %v3086_v41  ;;  %v3209_v44 = vpop.f32.mrb[57].mxu0 }
0x16a3   : > { %v3210_v45 = vadd.f32 %v3209_v44, %v3090_v43  ;;  %v3211_v46 = vpop.f32.mrb[58].mxu0 }
0x16a4   : > { %v3214_v47 = vmax.f32 %v3208_v24, 0.0  ;;  %v3212_v48 = vpop.f32.mrb[59].mxu0 }
0x16a5   : > { %v3215_v49 = vmax.f32 %v3210_v45, 0.0 }
0x16a6   : > { %v3216_v7 = vpack.c.bf16 %v3214_v47, %v3214_v47 }
0x16a7   : > { %v3217_v51 = vpack.c.bf16 %v3215_v49, %v3215_v49 }
0x16a9   : > { %3387 = vmatprep.mubr.bf16.mxu1 %v3217_v51 }
0x16aa   : > { %3388 = vmatmul.mubr.bf16.vlgmr.msra.gmra.mrb[44].mxu1 %v3216_v7 }
0x177d   : > { %v4157_v9 = vpop.f32.mrb[44].mxu1 }
0x177e   : > { %v4158_v12 = vpop.f32.mrb[45].mxu1 }
0x177f   : > { %v4159_v53 = vadd.f32 %v4158_v12, %v4157_v9  ;;  %v4160_v11 = vpop.f32.mrb[46].mxu1 }
0x1780   : > { %v4161_v42 = vpop.f32.mrb[47].mxu1 }
0x1781   : > { %v3390_v32 = vadd.f32 %v4159_v53, %v4013_v52 }
0x1783   : > { %v3395_v54 = vadd.f32 %v3390_v32, %v3061_v34 }
0x1785   : > { %3400 = vadd.xlane.f32.xlu0 %v3395_v54 }
0x1812   : > { %v3401_v55 = vpop.xlane.xlu0 %3400 }
0x1813   : > { %v3402_v56 = vmul.f32 0.0078125, %v3401_v55 }
0x1815   : > { %v3403_v57 = vsub.f32 %v3395_v54, %v3402_v56 }
0x1817   : > { %v3404_v58 = vmul.f32 %v3403_v57, %v3403_v57 }
0x1819   : > { %3405 = vadd.xlane.f32.xlu0 %v3404_v58 }
0x18a6   : > { %v3406_v5 = vpop.xlane.xlu0 %3405 }
0x18a7   : > { %v3407_v6 = vmul.f32 0.0078125, %v3406_v5 }
0x18a9   : > { %v3408_v10 = vadd.f32 1e-05, %v3407_v6 }
0x18ab   : > { %4630 = vrsqrt.f32 %v3408_v10 }
0x18b5   : > { %v4631_v13 = vpop.eup %4630 }
0x18b6   : > { %v3410_v15 = vmul.f32 %v4631_v13, %v3403_v57 }
0x18b8   : > { %v3417_v16 = vmul.f32 %v4032_v14, %v3410_v15 }
0x18ba   : > { %v3424_v17 = vadd.f32 %v4033_v50, %v3417_v16 }
0x18bc   : > { %v3425_v18 = vmul.f32 %v3424_v17, %v5014_v0 }
0x18be   : > { %v3426_v8 = vrot.slane %v3425_v18, 4 }
0x18c0   : > { %v3427_v19 = vmax.f32 %v3425_v18, %v3426_v8 }
0x18c2   : > { %v3428_v20 = vrot.slane %v3427_v19, 2 }
0x18c4   : > { %v3429_v21 = vmax.f32 %v3427_v19, %v3428_v20 }
0x18c6   : > { %v3430_v28 = vrot.slane %v3429_v21, 1 }
0x18c8   : > { %v3431_v22 = vmax.f32 %v3429_v21, %v3430_v28 }
0x18ca   : > { %v3432_v23 = vpack.c.bf16 %v3431_v22, %v3431_v22 }
0x18cc   : > { %4371 = vmatmul.mubr.bf16.vlgmr.msra.gmra.mrb[60].mxu0 %v3432_v23 }
0x199f   : > { %v3532_v26 = vpop.f32.mrb[60].mxu0 }
0x19a0   : > { %v3533_v27 = vadd.f32 %v3532_v26, %v3449_v25  ;;  %v4372_v29 = vpop.f32.mrb[61].mxu0 }
0x19a1   : > { %v3535_v30 = vpop.f32.mrb[62].mxu0 }
0x19a2   : > { %v4373_v0 = vpop.f32.mrb[63].mxu0  ;;  %v3539_v31 = vsel %vm3538_vm9, %v3533_v27, -inf }
0x19a3   : > { %3540 = vmax.xlane.f32.xlu1 %v3539_v31 }
0x1a30   : > { %v3541_v33 = vpop.xlane.xlu1 %3540 }
0x1a31   : > { %v3542_v34 = vsub.f32 %v3533_v27, %v3541_v33 }
0x1a33   : > { %v3543_v35 = vmul.f32 1.442695, %v3542_v34 }
0x1a35   : > { %4632 = vpow2.f32 %v3543_v35 }
0x1a3f   : > { %v4633_v36 = vpop.eup %4632 }
0x1a40   : > { %v3545_v37 = vsel %vm3538_vm9, %v4633_v36, 0.0 }
0x1a41   : > { %3546 = vadd.xlane.f32.xlu0 %v3545_v37 }
0x1ace   : > { %v3547_v38 = vpop.xlane.xlu0 %3546 }
0x1acf   : > { %4634 = vlog2.f32 %v3547_v38 }
0x1ad9   : > { %v4635_v39 = vpop.eup %4634 }
0x1ada   : > { %v3549_v40 = vmul.f32 0.6931472, %v4635_v39 }
0x1adc   : > { %v3550_v41 = vadd.f32 %v3549_v40, %v3541_v33 }
0x1ade   : > { %v3551_v43 = vsub.f32 %v3533_v27, %v3550_v41 }
0x1ae0   : > { %3552 = vst [vmem:[%s792_s26] sm:$0x1] %v3551_v43 }
0x1ae1   : > { %4649 = shalt.err (!%p4646_p3)
}
0x1ae2   : > { %s4650_s9 = scalar_lea.hbm %s5661_s25, 16  ;;  %s4654_s3 = scalar_lea.hbm %s5787_s28, 32 }
0x1ae3   : > { %p4651_p4 = scmp.ne.s32.totalorder %s5661_s25, %s4650_s9  ;;  %p4655_p9 = scmp.lt.u32.totalorder %s5661_s25, %s5787_s28 }
0x1ae4   : > { %p4656_p10 = scmp.lt.u32.totalorder %s4654_s3, %s4650_s9  ;;  %p4658_p12 = scmp.lt.u32.totalorder %s4650_s9, %s5661_s25 }
0x1ae5   : > { %p4652_p7 = pnand %p4651_p4, %p4875_p5 }
0x1ae6   : > { %p4657_p11 = por %p4656_p10, %p4655_p9 }
0x1ae7   : > { %p4653_p8 = pneg %p4652_p7 }
0x1ae8   : > { %p4659_p13 = por %p4658_p12, %p4657_p11 }
0x1aea   : > { %p4660_p0 = pnand %p4659_p13, %p4653_p8 }
0x1aec   : > { %4663 = shalt.err (!%p4660_p0)
}
0x1aed   : > { %4374 = dma.vmem_to_hbm [thread:$0]  (%p4875_p5), %s5663_s0, 16, %s5661_s25, %s3554_s30   ;;  %v3621_v4 = vld [vmem:[%s5100_s8] sm:$0xff] (%p4875_p5)  ;;  %v3623_v24 = vld [vmem:[%s5100_s8 + $0x8] sm:$0xff] (%p4875_p5)  ;;  %v3625_v44 = vld [vmem:[%s5100_s8 + $0x10] sm:$0xff] (%p4875_p5) }
0x1aee   : > { %3576 = sbr.rel (!%p4875_p5) target bundleno = 6906 (0x1afa), region = 124  ;;  %s4048_s10 = sshll.u32 (%p4875_p5), %s4858_s7, 5  ;;  %v3627_v45 = vld [vmem:[%s5100_s8 + $0x18] sm:$0xff] (%p4875_p5)  ;;  %v3629_v46 = vld [vmem:[%s5100_s8 + $0x20] sm:$0xff] (%p4875_p5)  ;;  %v3631_v47 = vld [vmem:[%s5100_s8 + $0x28] sm:$0xff] (%p4875_p5) }
0x1aef   : > { %s5788_s27 = sld [smem:[#allocation25_spill]] (%p4875_p5)  ;;  %v3633_v48 = vld [vmem:[%s5100_s8 + $0x30] sm:$0xff] (%p4875_p5)  ;;  %v3635_v49 = vld [vmem:[%s5100_s8 + $0x38] sm:$0xff] (%p4875_p5) }
0x1af5   : > { %s3579_s0 = scalar_lea.vmem %s5788_s27, %s4048_s10 }
0x1af6   : > { %3622 = vst [vmem:[%s3579_s0] sm:$0xff] %v3621_v4  ;;  %3624 = vst [vmem:[%s3579_s0 + $0x8] sm:$0xff] %v3623_v24 }
0x1af7   : > { %3626 = vst [vmem:[%s3579_s0 + $0x10] sm:$0xff] %v3625_v44  ;;  %3628 = vst [vmem:[%s3579_s0 + $0x18] sm:$0xff] %v3627_v45 }
0x1af8   : > { %3630 = vst [vmem:[%s3579_s0 + $0x40] sm:$0xff] %v3629_v46  ;;  %3632 = vst [vmem:[%s3579_s0 + $0x48] sm:$0xff] %v3631_v47 }
0x1af9   : > { %3634 = vst [vmem:[%s3579_s0 + $0x50] sm:$0xff] %v3633_v48  ;;  %3636 = vst [vmem:[%s3579_s0 + $0x58] sm:$0xff] %v3635_v49 }
0x1afa PF: > { %s5789_s7 = sld [smem:[#allocation9_spill]]  ;;  %s5790_s4 = sld [smem:[#allocation7_spill]] }
0x1b00   : > { %p4380_p5 = scmp.ge.s32.totalorder %s5789_s7, 2  ;;  %s3648_s30 = sand.u32 1, %s5790_s4  }
0x1b01   : > { %s3649_s9 = scalar_lea.sflag [#allocation4], %s3648_s30 }
0x1b02   : > { %p4377_p1 = pnand %p4380_p5, %p4879_p6 }
0x1b04   : > { %4681 = dma.done.wait (!%p4377_p1), %s3649_s9, 16  }
0x1b05   : > { %4683 = vsyncadd (!%p4377_p1), %s3649_s9, 4294967280  ;;  %s5792_s30 = sld [smem:[#allocation10_spill]]  ;;  %s5793_s6 = sld [smem:[#allocation8_spill]] }
0x1b06   : > { %s5794_s26 = sld [smem:[#allocation11_spill]]  ;;  %s5795_s29 = smov %s4690_s2 }
0x1b0b   : > { %p36_p2 = scmp.ge.s32.totalorder %s5792_s30, 4   ;;  %s5796_s2 = smov %s5793_s6 }
0x1b0c   : > { %s5797_s6 = smov %s5794_s26 }
0x1b0d   :  { %38 = sbr.rel (!%p36_p2) target bundleno = 17 (0x11), region = 229 }
0x1b14   :  { %3660 = vsyncpa [#allocation4], 1 }
0x1b15   :  { %3662 = vsyncpa [#allocation4 + $0x1], 1 }

</bundles_post_ra>
